<compile_context>
chip_gen: v6e
topology: v6e:2x2x1
jax: 0.10.0
libtpu: 0.0.40
codegen_flags: <defaults>
</compile_context>

<pallas_src>
import math

import jax
import jax.numpy as jnp
from jax.experimental import pallas as pl
from jax.experimental.pallas import tpu as pltpu  # noqa: F401 (TPU backend)

# ----------------------------- small config -----------------------------
# (scaled-down, shape-consistent stand-ins for d_model=4096, ff=2048, ...)
D_MODEL = 32          # d_model
NHEAD = 2             # nhead
N_LAYERS = 2          # num_decoder_layers
N_CLASSES = 4         # num_classes
N_QUERY = 4           # n_query
BT = 2                # batch
SEQ = 8               # Llama sequence length (memory length)
DIM_FF = 64           # TransformerDecoderLayer dim_feedforward (torch default 2048)
MLP_HID = 64          # mlp hidden (torch 1024)
VOCAB = 16            # lm_head vocab (synthetic)
HEAD_DIM = D_MODEL // NHEAD
T_TGT = 1 + N_QUERY   # cls token + queries
LN_EPS = 1e-5

# lane-dense (128-multiple) padded output widths -> unmasked vector stores
CLS_PAD = ((N_CLASSES + 127) // 128) * 128
VOCAB_PAD = ((VOCAB + 127) // 128) * 128


# ----------------------------- fused Pallas kernel -----------------------------
def _fused_head_kernel(
    mem_ref,        # (B*S, D)      bf16   Llama hidden states (flattened)
    tgt_ref,        # (T, D)        f32    cat(cls_token, queries)
    sa_wqkv_ref,    # (L, D, 3D)    bf16   fused self-attn QKV weight
    sa_bqkv_ref,    # (L, 1, 3D)    f32
    sa_wo_ref,      # (L, D, D)     bf16
    sa_bo_ref,      # (L, 1, D)     f32
    ca_wq_ref,      # (L, D, D)     bf16
    ca_bq_ref,      # (L, 1, D)     f32
    ca_wkv_ref,     # (L, D, 2D)    bf16   fused cross-attn KV weight
    ca_bkv_ref,     # (L, 1, 2D)    f32
    ca_wo_ref,      # (L, D, D)     bf16
    ca_bo_ref,      # (L, 1, D)     f32
    ff_w1_ref,      # (L, D, FF)    bf16
    ff_b1_ref,      # (L, 1, FF)    f32
    ff_w2_ref,      # (L, FF, D)    bf16
    ff_b2_ref,      # (L, 1, D)     f32
    ln_g_ref,       # (L, 3, D)     f32    [ln1, ln2, ln3] gammas
    ln_b_ref,       # (L, 3, D)     f32
    mlp_w1_ref,     # (D, MLP_HID)  bf16
    mlp_b1_ref,     # (1, MLP_HID)  f32
    mlp_w2_ref,     # (MLP_HID, CLS_PAD) bf16  (lane-padded)
    mlp_b2_ref,     # (1, CLS_PAD)  f32
    lm_w_ref,       # (D, VOCAB_PAD) bf16  (lane-padded, no bias)
    cls_ref,        # OUT (B, CLS_PAD)     f32
    lm_ref,         # OUT (B*S, VOCAB_PAD) f32
):
    f32 = jnp.float32
    bf16 = jnp.bfloat16
    D = D_MODEL
    T = T_TGT
    S = SEQ
    dh = HEAD_DIM
    scale = 1.0 / math.sqrt(dh)

    def dense(x, w, b=None):
        # bf16 MXU operands, f32 accumulation
        y = jnp.dot(x.astype(bf16), w, preferred_element_type=f32)
        if b is not None:
            y = y + b
        return y

    def layernorm(z, g, b):
        mu = jnp.mean(z, axis=-1, keepdims=True)
        var = jnp.mean((z - mu) ** 2, axis=-1, keepdims=True)
        return (z - mu) * jax.lax.rsqrt(var + LN_EPS) * g + b

    def attention(q2d, k2d, v2d, tq, tk):
        # q2d: (B*tq, D), k2d/v2d: (B*tk, D); never mix batch elements.
        out_rows = []
        for b in range(BT):                       # unrolled (B=2)
            qb = q2d[b * tq:(b + 1) * tq]
            kb = k2d[b * tk:(b + 1) * tk]
            vb = v2d[b * tk:(b + 1) * tk]
            heads = []
            for h in range(NHEAD):                # unrolled (H=2)
                sl = slice(h * dh, (h + 1) * dh)
                qh = qb[:, sl].astype(bf16)
                kh = kb[:, sl].astype(bf16)
                vh = vb[:, sl].astype(bf16)
                # contract last axes directly -> no materialized k.T
                s = jax.lax.dot_general(
                    qh, kh, (((1,), (1,)), ((), ())),
                    preferred_element_type=f32) * scale
                s = s - jnp.max(s, axis=-1, keepdims=True)
                p = jnp.exp(s)
                denom = jnp.sum(p, axis=-1, keepdims=True)
                p = p * pl.reciprocal(denom, approx=True)   # EUP slot
                heads.append(
                    jnp.dot(p.astype(bf16), vh, preferred_element_type=f32))
            out_rows.append(jnp.concatenate(heads, axis=-1))   # (tq, D)
        return jnp.concatenate(out_rows, axis=0)               # (B*tq, D)

    mem = mem_ref[...]                                  # (B*S, D) bf16

    # ---- lm_head (Llama lm_head has no bias) ----
    lm_ref[...] = jnp.dot(mem, lm_w_ref[...], preferred_element_type=f32)

    # ---- decoder: tgt = cat(cls_token, queries) broadcast over batch ----
    tgt = tgt_ref[...]                                  # (T, D) f32
    x = jnp.concatenate([tgt] * BT, axis=0)             # (B*T, D) f32

    for l in range(N_LAYERS):                           # unrolled (L=2)
        ln_g = ln_g_ref[l]                              # (3, D)
        ln_b = ln_b_ref[l]

        # self-attention block (fused QKV projection)
        qkv = dense(x, sa_wqkv_ref[l], sa_bqkv_ref[l])  # (B*T, 3D)
        sa = attention(qkv[:, :D], qkv[:, D:2 * D], qkv[:, 2 * D:], T, T)
        sa = dense(sa, sa_wo_ref[l], sa_bo_ref[l])
        x = layernorm(x + sa, ln_g[0:1], ln_b[0:1])

        # cross-attention over Llama hidden states (fused KV projection)
        q = dense(x, ca_wq_ref[l], ca_bq_ref[l])        # (B*T, D)
        kv = dense(mem, ca_wkv_ref[l], ca_bkv_ref[l])   # (B*S, 2D)
        ca = attention(q, kv[:, :D], kv[:, D:], T, S)
        ca = dense(ca, ca_wo_ref[l], ca_bo_ref[l])
        x = layernorm(x + ca, ln_g[1:2], ln_b[1:2])

        # feed-forward block (relu)
        h = jnp.maximum(dense(x, ff_w1_ref[l], ff_b1_ref[l]), 0.0)
        h = dense(h, ff_w2_ref[l], ff_b2_ref[l])
        x = layernorm(x + h, ln_g[2:3], ln_b[2:3])

    # ---- classifier MLP only on the cls-token row of each batch element ----
    cls_rows = jnp.concatenate([x[b * T:b * T + 1] for b in range(BT)], axis=0)
    h = dense(cls_rows, mlp_w1_ref[...], mlp_b1_ref[...])
    h = jnp.where(h > 0, h, 0.01 * h)                   # LeakyReLU(0.01)
    cls_ref[...] = dense(h, mlp_w2_ref[...], mlp_b2_ref[...])


# ----------------------------- forward wrapper -----------------------------
_WEIGHT_ORDER = (
    "sa_wqkv", "sa_bqkv", "sa_wo", "sa_bo",
    "ca_wq", "ca_bq", "ca_wkv", "ca_bkv", "ca_wo", "ca_bo",
    "ff_w1", "ff_b1", "ff_w2", "ff_b2", "ln_g", "ln_b",
    "mlp_w1", "mlp_b1", "mlp_w2", "mlp_b2", "lm_w",
)


def my_model_forward(hidden_states, params):
    """Returns (logits_mlp[:, 0, :], lm_logits) — mirrors MyModel.forward."""
    B, S, D = hidden_states.shape
    # layout glue (pure XLA, outside the kernel): flatten batch*seq rows and
    # cast the memory to bf16 once (it is only ever a matmul operand).
    mem2d = hidden_states.reshape(B * S, D).astype(jnp.bfloat16)
    tgt = jnp.concatenate([params["cls_token"], params["queries"]], axis=0)

    args = [mem2d, tgt] + [params[k] for k in _WEIGHT_ORDER]

    # Single fused kernel: all operands are tiny, so whole-array VMEM blocks
    # (default BlockSpecs, no grid) are the right tiling at these shapes.
    cls_pad, lm_pad = pl.pallas_call(
        _fused_head_kernel,
        out_shape=(
            jax.ShapeDtypeStruct((B, CLS_PAD), jnp.float32),
            jax.ShapeDtypeStruct((B * S, VOCAB_PAD), jnp.float32),
        ),
    )(*args)

    cls_logits = cls_pad[:, :N_CLASSES]
    lm_logits = lm_pad[:, :VOCAB].reshape(B, S, VOCAB)
    return cls_logits, lm_logits


# ----------------------------- params -----------------------------
def init_params(key):
    keys = iter(jax.random.split(key, 64))
    bf = jnp.bfloat16
    L = N_LAYERS

    def nrm(shape, scale=0.05, dtype=jnp.float32):
        return (scale * jax.random.normal(next(keys), shape)).astype(dtype)

    def pad_lanes(w, n_pad):
        return jnp.pad(w, ((0, 0), (0, n_pad - w.shape[-1])))

    return {
        # trainable query / cls tokens (torch.randn(., 4096))
        "cls_token": nrm((1, D_MODEL), 1.0),
        "queries": nrm((N_QUERY, D_MODEL), 1.0),
        # decoder layers, stacked over L; QKV (and cross-attn KV) fused along
        # the output dim (== concat of torch in_proj_weight.T chunks)
        "sa_wqkv": nrm((L, D_MODEL, 3 * D_MODEL), dtype=bf),
        "sa_bqkv": nrm((L, 1, 3 * D_MODEL)),
        "sa_wo":   nrm((L, D_MODEL, D_MODEL), dtype=bf),
        "sa_bo":   nrm((L, 1, D_MODEL)),
        "ca_wq":   nrm((L, D_MODEL, D_MODEL), dtype=bf),
        "ca_bq":   nrm((L, 1, D_MODEL)),
        "ca_wkv":  nrm((L, D_MODEL, 2 * D_MODEL), dtype=bf),
        "ca_bkv":  nrm((L, 1, 2 * D_MODEL)),
        "ca_wo":   nrm((L, D_MODEL, D_MODEL), dtype=bf),
        "ca_bo":   nrm((L, 1, D_MODEL)),
        "ff_w1":   nrm((L, D_MODEL, DIM_FF), dtype=bf),
        "ff_b1":   nrm((L, 1, DIM_FF)),
        "ff_w2":   nrm((L, DIM_FF, D_MODEL), dtype=bf),
        "ff_b2":   nrm((L, 1, D_MODEL)),
        # LayerNorms (torch init: weight=1, bias=0); rows = [ln1, ln2, ln3]
        "ln_g":    jnp.ones((L, 3, D_MODEL), jnp.float32),
        "ln_b":    jnp.zeros((L, 3, D_MODEL), jnp.float32),
        # classifier MLP (second linear lane-padded to CLS_PAD, zero columns)
        "mlp_w1":  nrm((D_MODEL, MLP_HID), dtype=bf),
        "mlp_b1":  jnp.zeros((1, MLP_HID), jnp.float32),
        "mlp_w2":  pad_lanes(nrm((MLP_HID, N_CLASSES)), CLS_PAD).astype(bf),
        "mlp_b2":  jnp.zeros((1, CLS_PAD), jnp.float32),
        # lm_head (no bias), lane-padded to VOCAB_PAD with zero columns
        "lm_w":    pad_lanes(nrm((D_MODEL, VOCAB)), VOCAB_PAD).astype(bf),
    }


# ----------------------------- main -----------------------------
if __name__ == "__main__":
    key = jax.random.PRNGKey(0)
    k_param, k_hidden = jax.random.split(key)

    params = init_params(k_param)
    # hidden_states: stand-in for the frozen Llama backbone output (B, S, D)
    hidden_states = jax.random.normal(k_hidden, (BT, SEQ, D_MODEL), jnp.float32)

    fwd = jax.jit(my_model_forward)
    cls_logits, lm_logits = fwd(hidden_states, params)
    jax.block_until_ready((cls_logits, lm_logits))

    assert cls_logits.shape == (BT, N_CLASSES)
    assert lm_logits.shape == (BT, SEQ, VOCAB)
    assert bool(jnp.all(jnp.isfinite(cls_logits)))
    assert bool(jnp.all(jnp.isfinite(lm_logits)))

    print("KERNEL_OK")
</pallas_src>

<mosaic_0001>
module attributes {stable_mosaic.version = 11 : i64} {
  func.func @_fused_head_kernel(%arg0: memref<16x32xbf16, #tpu.memory_space<vmem>>, %arg1: memref<5x32xf32, #tpu.memory_space<vmem>>, %arg2: memref<2x32x96xbf16, #tpu.memory_space<vmem>>, %arg3: memref<2x1x96xf32, #tpu.memory_space<vmem>>, %arg4: memref<2x32x32xbf16, #tpu.memory_space<vmem>>, %arg5: memref<2x1x32xf32, #tpu.memory_space<vmem>>, %arg6: memref<2x32x32xbf16, #tpu.memory_space<vmem>>, %arg7: memref<2x1x32xf32, #tpu.memory_space<vmem>>, %arg8: memref<2x32x64xbf16, #tpu.memory_space<vmem>>, %arg9: memref<2x1x64xf32, #tpu.memory_space<vmem>>, %arg10: memref<2x32x32xbf16, #tpu.memory_space<vmem>>, %arg11: memref<2x1x32xf32, #tpu.memory_space<vmem>>, %arg12: memref<2x32x64xbf16, #tpu.memory_space<vmem>>, %arg13: memref<2x1x64xf32, #tpu.memory_space<vmem>>, %arg14: memref<2x64x32xbf16, #tpu.memory_space<vmem>>, %arg15: memref<2x1x32xf32, #tpu.memory_space<vmem>>, %arg16: memref<2x3x32xf32, #tpu.memory_space<vmem>>, %arg17: memref<2x3x32xf32, #tpu.memory_space<vmem>>, %arg18: memref<32x64xbf16, #tpu.memory_space<vmem>>, %arg19: memref<1x64xf32, #tpu.memory_space<vmem>>, %arg20: memref<64x128xbf16, #tpu.memory_space<vmem>>, %arg21: memref<1x128xf32, #tpu.memory_space<vmem>>, %arg22: memref<32x128xbf16, #tpu.memory_space<vmem>>, %arg23: memref<2x128xf32, #tpu.memory_space<vmem>>, %arg24: memref<16x128xf32, #tpu.memory_space<vmem>>) attributes {dimension_semantics = [], scalar_prefetch = 0 : i64, scratch_operands = 0 : i64, tpu.core_type = #tpu.core_type<tc>} {
    %c0 = arith.constant 0 : index
    %c0_0 = arith.constant 0 : index
    %0 = vector.load %arg0[%c0, %c0_0] : memref<16x32xbf16, #tpu.memory_space<vmem>>, vector<16x32xbf16>
    %c0_1 = arith.constant 0 : index
    %c0_2 = arith.constant 0 : index
    %1 = vector.load %arg22[%c0_1, %c0_2] : memref<32x128xbf16, #tpu.memory_space<vmem>>, vector<32x128xbf16>
    %cst = arith.constant dense<0.000000e+00> : vector<16x128xf32>
    %2 = tpu.matmul %0, %1, %cst {dimension_numbers = #tpu.dot_dimension_numbers<[1], [0], [0], [1], [0, 0, 1, 1], [], []>} : vector<16x32xbf16>, vector<32x128xbf16>, vector<16x128xf32> -> vector<16x128xf32>
    %c0_3 = arith.constant 0 : index
    %c0_4 = arith.constant 0 : index
    %3 = vector.load %arg24[%c0_3, %c0_4] : memref<16x128xf32, #tpu.memory_space<vmem>>, vector<16x128xf32>
    tpu.vector_store %arg24[%c0_3, %c0_4], %2 {strides = array<i32>} : memref<16x128xf32, #tpu.memory_space<vmem>>, vector<16x128xf32>,
    %c0_5 = arith.constant 0 : index
    %c0_6 = arith.constant 0 : index
    %4 = vector.load %arg1[%c0_5, %c0_6] : memref<5x32xf32, #tpu.memory_space<vmem>>, vector<5x32xf32>
    %5 = tpu.concatenate %4, %4 in 0 : vector<5x32xf32>, vector<5x32xf32> -> vector<10x32xf32>
    %c0_7 = arith.constant 0 : index
    %c0_8 = arith.constant 0 : index
    %c0_9 = arith.constant 0 : index
    %6 = vector.load %arg16[%c0_7, %c0_8, %c0_9] : memref<2x3x32xf32, #tpu.memory_space<vmem>>, vector<1x3x32xf32>
    %7 = vector.shape_cast %6 : vector<1x3x32xf32> to vector<3x32xf32>
    %c0_10 = arith.constant 0 : index
    %c0_11 = arith.constant 0 : index
    %c0_12 = arith.constant 0 : index
    %8 = vector.load %arg17[%c0_10, %c0_11, %c0_12] : memref<2x3x32xf32, #tpu.memory_space<vmem>>, vector<1x3x32xf32>
    %9 = vector.shape_cast %8 : vector<1x3x32xf32> to vector<3x32xf32>
    %c0_13 = arith.constant 0 : index
    %c0_14 = arith.constant 0 : index
    %c0_15 = arith.constant 0 : index
    %10 = vector.load %arg2[%c0_13, %c0_14, %c0_15] : memref<2x32x96xbf16, #tpu.memory_space<vmem>>, vector<1x32x96xbf16>
    %11 = vector.shape_cast %10 : vector<1x32x96xbf16> to vector<32x96xbf16>
    %c0_16 = arith.constant 0 : index
    %c0_17 = arith.constant 0 : index
    %c0_18 = arith.constant 0 : index
    %12 = vector.load %arg3[%c0_16, %c0_17, %c0_18] : memref<2x1x96xf32, #tpu.memory_space<vmem>>, vector<1x1x96xf32>
    %13 = vector.shape_cast %12 : vector<1x1x96xf32> to vector<1x96xf32>
    %14 = arith.truncf %5 : vector<10x32xf32> to vector<10x32xbf16>
    %cst_19 = arith.constant dense<0.000000e+00> : vector<10x96xf32>
    %15 = tpu.matmul %14, %11, %cst_19 {dimension_numbers = #tpu.dot_dimension_numbers<[1], [0], [0], [1], [0, 0, 1, 1], [], []>} : vector<10x32xbf16>, vector<32x96xbf16>, vector<10x96xf32> -> vector<10x96xf32>
    %16 = vector.broadcast %13 : vector<1x96xf32> to vector<10x96xf32>
    %17 = arith.addf %15, %16 : vector<10x96xf32>
    %18 = vector.extract_strided_slice %17 {offsets = [0, 0], sizes = [10, 32], strides = [1, 1]} : vector<10x96xf32> to vector<10x32xf32>
    %19 = vector.extract_strided_slice %17 {offsets = [0, 32], sizes = [10, 32], strides = [1, 1]} : vector<10x96xf32> to vector<10x32xf32>
    %20 = vector.extract_strided_slice %17 {offsets = [0, 64], sizes = [10, 32], strides = [1, 1]} : vector<10x96xf32> to vector<10x32xf32>
    %21 = vector.extract_strided_slice %18 {offsets = [0, 0], sizes = [5, 32], strides = [1, 1]} : vector<10x32xf32> to vector<5x32xf32>
    %22 = vector.extract_strided_slice %19 {offsets = [0, 0], sizes = [5, 32], strides = [1, 1]} : vector<10x32xf32> to vector<5x32xf32>
    %23 = vector.extract_strided_slice %20 {offsets = [0, 0], sizes = [5, 32], strides = [1, 1]} : vector<10x32xf32> to vector<5x32xf32>
    %24 = vector.extract_strided_slice %21 {offsets = [0, 0], sizes = [5, 16], strides = [1, 1]} : vector<5x32xf32> to vector<5x16xf32>
    %25 = arith.truncf %24 : vector<5x16xf32> to vector<5x16xbf16>
    %26 = vector.extract_strided_slice %22 {offsets = [0, 0], sizes = [5, 16], strides = [1, 1]} : vector<5x32xf32> to vector<5x16xf32>
    %27 = arith.truncf %26 : vector<5x16xf32> to vector<5x16xbf16>
    %28 = vector.extract_strided_slice %23 {offsets = [0, 0], sizes = [5, 16], strides = [1, 1]} : vector<5x32xf32> to vector<5x16xf32>
    %29 = arith.truncf %28 : vector<5x16xf32> to vector<5x16xbf16>
    %cst_20 = arith.constant dense<0.000000e+00> : vector<5x5xf32>
    %30 = tpu.matmul %25, %27, %cst_20 {dimension_numbers = #tpu.dot_dimension_numbers<[1], [1], [0], [0], [0, 0, 1, 0], [], []>} : vector<5x16xbf16>, vector<5x16xbf16>, vector<5x5xf32> -> vector<5x5xf32>
    %cst_21 = arith.constant 2.500000e-01 : f32
    %31 = vector.broadcast %cst_21 : f32 to vector<5x5xf32>
    %32 = arith.mulf %30, %31 : vector<5x5xf32>
    %cst_22 = arith.constant dense<0xFF800000> : vector<5xf32>
    %33 = vector.multi_reduction <maximumf>, %32, %cst_22 [1] : vector<5x5xf32> to vector<5xf32>
    %34 = vector.shape_cast %33 : vector<5xf32> to vector<5x1xf32>
    %35 = vector.broadcast %34 : vector<5x1xf32> to vector<5x5xf32>
    %36 = arith.subf %32, %35 : vector<5x5xf32>
    %37 = math.exp %36 : vector<5x5xf32>
    %cst_23 = arith.constant dense<0.000000e+00> : vector<5xf32>
    %38 = vector.multi_reduction <add>, %37, %cst_23 [1] : vector<5x5xf32> to vector<5xf32>
    %39 = vector.shape_cast %38 : vector<5xf32> to vector<5x1xf32>
    %40 = tpu.reciprocal %39 {approx = true} : vector<5x1xf32> -> vector<5x1xf32>
    %41 = vector.broadcast %40 : vector<5x1xf32> to vector<5x5xf32>
    %42 = arith.mulf %37, %41 : vector<5x5xf32>
    %43 = arith.truncf %42 : vector<5x5xf32> to vector<5x5xbf16>
    %cst_24 = arith.constant dense<0.000000e+00> : vector<5x16xf32>
    %44 = tpu.matmul %43, %29, %cst_24 {dimension_numbers = #tpu.dot_dimension_numbers<[1], [0], [0], [1], [0, 0, 1, 1], [], []>} : vector<5x5xbf16>, vector<5x16xbf16>, vector<5x16xf32> -> vector<5x16xf32>
    %45 = vector.extract_strided_slice %21 {offsets = [0, 16], sizes = [5, 16], strides = [1, 1]} : vector<5x32xf32> to vector<5x16xf32>
    %46 = arith.truncf %45 : vector<5x16xf32> to vector<5x16xbf16>
    %47 = vector.extract_strided_slice %22 {offsets = [0, 16], sizes = [5, 16], strides = [1, 1]} : vector<5x32xf32> to vector<5x16xf32>
    %48 = arith.truncf %47 : vector<5x16xf32> to vector<5x16xbf16>
    %49 = vector.extract_strided_slice %23 {offsets = [0, 16], sizes = [5, 16], strides = [1, 1]} : vector<5x32xf32> to vector<5x16xf32>
    %50 = arith.truncf %49 : vector<5x16xf32> to vector<5x16xbf16>
    %cst_25 = arith.constant dense<0.000000e+00> : vector<5x5xf32>
    %51 = tpu.matmul %46, %48, %cst_25 {dimension_numbers = #tpu.dot_dimension_numbers<[1], [1], [0], [0], [0, 0, 1, 0], [], []>} : vector<5x16xbf16>, vector<5x16xbf16>, vector<5x5xf32> -> vector<5x5xf32>
    %cst_26 = arith.constant 2.500000e-01 : f32
    %52 = vector.broadcast %cst_26 : f32 to vector<5x5xf32>
    %53 = arith.mulf %51, %52 : vector<5x5xf32>
    %cst_27 = arith.constant dense<0xFF800000> : vector<5xf32>
    %54 = vector.multi_reduction <maximumf>, %53, %cst_27 [1] : vector<5x5xf32> to vector<5xf32>
    %55 = vector.shape_cast %54 : vector<5xf32> to vector<5x1xf32>
    %56 = vector.broadcast %55 : vector<5x1xf32> to vector<5x5xf32>
    %57 = arith.subf %53, %56 : vector<5x5xf32>
    %58 = math.exp %57 : vector<5x5xf32>
    %cst_28 = arith.constant dense<0.000000e+00> : vector<5xf32>
    %59 = vector.multi_reduction <add>, %58, %cst_28 [1] : vector<5x5xf32> to vector<5xf32>
    %60 = vector.shape_cast %59 : vector<5xf32> to vector<5x1xf32>
    %61 = tpu.reciprocal %60 {approx = true} : vector<5x1xf32> -> vector<5x1xf32>
    %62 = vector.broadcast %61 : vector<5x1xf32> to vector<5x5xf32>
    %63 = arith.mulf %58, %62 : vector<5x5xf32>
    %64 = arith.truncf %63 : vector<5x5xf32> to vector<5x5xbf16>
    %cst_29 = arith.constant dense<0.000000e+00> : vector<5x16xf32>
    %65 = tpu.matmul %64, %50, %cst_29 {dimension_numbers = #tpu.dot_dimension_numbers<[1], [0], [0], [1], [0, 0, 1, 1], [], []>} : vector<5x5xbf16>, vector<5x16xbf16>, vector<5x16xf32> -> vector<5x16xf32>
    %66 = tpu.concatenate %44, %65 in 1 : vector<5x16xf32>, vector<5x16xf32> -> vector<5x32xf32>
    %67 = vector.extract_strided_slice %18 {offsets = [5, 0], sizes = [5, 32], strides = [1, 1]} : vector<10x32xf32> to vector<5x32xf32>
    %68 = vector.extract_strided_slice %19 {offsets = [5, 0], sizes = [5, 32], strides = [1, 1]} : vector<10x32xf32> to vector<5x32xf32>
    %69 = vector.extract_strided_slice %20 {offsets = [5, 0], sizes = [5, 32], strides = [1, 1]} : vector<10x32xf32> to vector<5x32xf32>
    %70 = vector.extract_strided_slice %67 {offsets = [0, 0], sizes = [5, 16], strides = [1, 1]} : vector<5x32xf32> to vector<5x16xf32>
    %71 = arith.truncf %70 : vector<5x16xf32> to vector<5x16xbf16>
    %72 = vector.extract_strided_slice %68 {offsets = [0, 0], sizes = [5, 16], strides = [1, 1]} : vector<5x32xf32> to vector<5x16xf32>
    %73 = arith.truncf %72 : vector<5x16xf32> to vector<5x16xbf16>
    %74 = vector.extract_strided_slice %69 {offsets = [0, 0], sizes = [5, 16], strides = [1, 1]} : vector<5x32xf32> to vector<5x16xf32>
    %75 = arith.truncf %74 : vector<5x16xf32> to vector<5x16xbf16>
    %cst_30 = arith.constant dense<0.000000e+00> : vector<5x5xf32>
    %76 = tpu.matmul %71, %73, %cst_30 {dimension_numbers = #tpu.dot_dimension_numbers<[1], [1], [0], [0], [0, 0, 1, 0], [], []>} : vector<5x16xbf16>, vector<5x16xbf16>, vector<5x5xf32> -> vector<5x5xf32>
    %cst_31 = arith.constant 2.500000e-01 : f32
    %77 = vector.broadcast %cst_31 : f32 to vector<5x5xf32>
    %78 = arith.mulf %76, %77 : vector<5x5xf32>
    %cst_32 = arith.constant dense<0xFF800000> : vector<5xf32>
    %79 = vector.multi_reduction <maximumf>, %78, %cst_32 [1] : vector<5x5xf32> to vector<5xf32>
    %80 = vector.shape_cast %79 : vector<5xf32> to vector<5x1xf32>
    %81 = vector.broadcast %80 : vector<5x1xf32> to vector<5x5xf32>
    %82 = arith.subf %78, %81 : vector<5x5xf32>
    %83 = math.exp %82 : vector<5x5xf32>
    %cst_33 = arith.constant dense<0.000000e+00> : vector<5xf32>
    %84 = vector.multi_reduction <add>, %83, %cst_33 [1] : vector<5x5xf32> to vector<5xf32>
    %85 = vector.shape_cast %84 : vector<5xf32> to vector<5x1xf32>
    %86 = tpu.reciprocal %85 {approx = true} : vector<5x1xf32> -> vector<5x1xf32>
    %87 = vector.broadcast %86 : vector<5x1xf32> to vector<5x5xf32>
    %88 = arith.mulf %83, %87 : vector<5x5xf32>
    %89 = arith.truncf %88 : vector<5x5xf32> to vector<5x5xbf16>
    %cst_34 = arith.constant dense<0.000000e+00> : vector<5x16xf32>
    %90 = tpu.matmul %89, %75, %cst_34 {dimension_numbers = #tpu.dot_dimension_numbers<[1], [0], [0], [1], [0, 0, 1, 1], [], []>} : vector<5x5xbf16>, vector<5x16xbf16>, vector<5x16xf32> -> vector<5x16xf32>
    %91 = vector.extract_strided_slice %67 {offsets = [0, 16], sizes = [5, 16], strides = [1, 1]} : vector<5x32xf32> to vector<5x16xf32>
    %92 = arith.truncf %91 : vector<5x16xf32> to vector<5x16xbf16>
    %93 = vector.extract_strided_slice %68 {offsets = [0, 16], sizes = [5, 16], strides = [1, 1]} : vector<5x32xf32> to vector<5x16xf32>
    %94 = arith.truncf %93 : vector<5x16xf32> to vector<5x16xbf16>
    %95 = vector.extract_strided_slice %69 {offsets = [0, 16], sizes = [5, 16], strides = [1, 1]} : vector<5x32xf32> to vector<5x16xf32>
    %96 = arith.truncf %95 : vector<5x16xf32> to vector<5x16xbf16>
    %cst_35 = arith.constant dense<0.000000e+00> : vector<5x5xf32>
    %97 = tpu.matmul %92, %94, %cst_35 {dimension_numbers = #tpu.dot_dimension_numbers<[1], [1], [0], [0], [0, 0, 1, 0], [], []>} : vector<5x16xbf16>, vector<5x16xbf16>, vector<5x5xf32> -> vector<5x5xf32>
    %cst_36 = arith.constant 2.500000e-01 : f32
    %98 = vector.broadcast %cst_36 : f32 to vector<5x5xf32>
    %99 = arith.mulf %97, %98 : vector<5x5xf32>
    %cst_37 = arith.constant dense<0xFF800000> : vector<5xf32>
    %100 = vector.multi_reduction <maximumf>, %99, %cst_37 [1] : vector<5x5xf32> to vector<5xf32>
    %101 = vector.shape_cast %100 : vector<5xf32> to vector<5x1xf32>
    %102 = vector.broadcast %101 : vector<5x1xf32> to vector<5x5xf32>
    %103 = arith.subf %99, %102 : vector<5x5xf32>
    %104 = math.exp %103 : vector<5x5xf32>
    %cst_38 = arith.constant dense<0.000000e+00> : vector<5xf32>
    %105 = vector.multi_reduction <add>, %104, %cst_38 [1] : vector<5x5xf32> to vector<5xf32>
    %106 = vector.shape_cast %105 : vector<5xf32> to vector<5x1xf32>
    %107 = tpu.reciprocal %106 {approx = true} : vector<5x1xf32> -> vector<5x1xf32>
    %108 = vector.broadcast %107 : vector<5x1xf32> to vector<5x5xf32>
    %109 = arith.mulf %104, %108 : vector<5x5xf32>
    %110 = arith.truncf %109 : vector<5x5xf32> to vector<5x5xbf16>
    %cst_39 = arith.constant dense<0.000000e+00> : vector<5x16xf32>
    %111 = tpu.matmul %110, %96, %cst_39 {dimension_numbers = #tpu.dot_dimension_numbers<[1], [0], [0], [1], [0, 0, 1, 1], [], []>} : vector<5x5xbf16>, vector<5x16xbf16>, vector<5x16xf32> -> vector<5x16xf32>
    %112 = tpu.concatenate %90, %111 in 1 : vector<5x16xf32>, vector<5x16xf32> -> vector<5x32xf32>
    %113 = tpu.concatenate %66, %112 in 0 : vector<5x32xf32>, vector<5x32xf32> -> vector<10x32xf32>
    %c0_40 = arith.constant 0 : index
    %c0_41 = arith.constant 0 : index
    %c0_42 = arith.constant 0 : index
    %114 = vector.load %arg4[%c0_40, %c0_41, %c0_42] : memref<2x32x32xbf16, #tpu.memory_space<vmem>>, vector<1x32x32xbf16>
    %115 = vector.shape_cast %114 : vector<1x32x32xbf16> to vector<32x32xbf16>
    %c0_43 = arith.constant 0 : index
    %c0_44 = arith.constant 0 : index
    %c0_45 = arith.constant 0 : index
    %116 = vector.load %arg5[%c0_43, %c0_44, %c0_45] : memref<2x1x32xf32, #tpu.memory_space<vmem>>, vector<1x1x32xf32>
    %117 = vector.shape_cast %116 : vector<1x1x32xf32> to vector<1x32xf32>
    %118 = arith.truncf %113 : vector<10x32xf32> to vector<10x32xbf16>
    %cst_46 = arith.constant dense<0.000000e+00> : vector<10x32xf32>
    %119 = tpu.matmul %118, %115, %cst_46 {dimension_numbers = #tpu.dot_dimension_numbers<[1], [0], [0], [1], [0, 0, 1, 1], [], []>} : vector<10x32xbf16>, vector<32x32xbf16>, vector<10x32xf32> -> vector<10x32xf32>
    %120 = vector.broadcast %117 : vector<1x32xf32> to vector<10x32xf32>
    %121 = arith.addf %119, %120 : vector<10x32xf32>
    %122 = arith.addf %5, %121 : vector<10x32xf32>
    %123 = vector.extract_strided_slice %7 {offsets = [0, 0], sizes = [1, 32], strides = [1, 1]} : vector<3x32xf32> to vector<1x32xf32>
    %124 = vector.extract_strided_slice %9 {offsets = [0, 0], sizes = [1, 32], strides = [1, 1]} : vector<3x32xf32> to vector<1x32xf32>
    %cst_47 = arith.constant dense<0.000000e+00> : vector<10xf32>
    %125 = vector.multi_reduction <add>, %122, %cst_47 [1] : vector<10x32xf32> to vector<10xf32>
    %126 = vector.shape_cast %125 : vector<10xf32> to vector<10x1xf32>
    %cst_48 = arith.constant 3.200000e+01 : f32
    %127 = vector.broadcast %cst_48 : f32 to vector<10x1xf32>
    %128 = arith.divf %126, %127 : vector<10x1xf32>
    %129 = vector.broadcast %128 : vector<10x1xf32> to vector<10x32xf32>
    %130 = arith.subf %122, %129 : vector<10x32xf32>
    %131 = arith.mulf %130, %130 : vector<10x32xf32>
    %cst_49 = arith.constant dense<0.000000e+00> : vector<10xf32>
    %132 = vector.multi_reduction <add>, %131, %cst_49 [1] : vector<10x32xf32> to vector<10xf32>
    %133 = vector.shape_cast %132 : vector<10xf32> to vector<10x1xf32>
    %cst_50 = arith.constant 3.200000e+01 : f32
    %134 = vector.broadcast %cst_50 : f32 to vector<10x1xf32>
    %135 = arith.divf %133, %134 : vector<10x1xf32>
    %136 = vector.broadcast %128 : vector<10x1xf32> to vector<10x32xf32>
    %137 = arith.subf %122, %136 : vector<10x32xf32>
    %cst_51 = arith.constant 9.99999974E-6 : f32
    %138 = vector.broadcast %cst_51 : f32 to vector<10x1xf32>
    %139 = arith.addf %135, %138 : vector<10x1xf32>
    %140 = math.rsqrt %139 : vector<10x1xf32>
    %141 = vector.broadcast %140 : vector<10x1xf32> to vector<10x32xf32>
    %142 = arith.mulf %137, %141 : vector<10x32xf32>
    %143 = vector.broadcast %123 : vector<1x32xf32> to vector<10x32xf32>
    %144 = arith.mulf %142, %143 : vector<10x32xf32>
    %145 = vector.broadcast %124 : vector<1x32xf32> to vector<10x32xf32>
    %146 = arith.addf %144, %145 : vector<10x32xf32>
    %c0_52 = arith.constant 0 : index
    %c0_53 = arith.constant 0 : index
    %c0_54 = arith.constant 0 : index
    %147 = vector.load %arg6[%c0_52, %c0_53, %c0_54] : memref<2x32x32xbf16, #tpu.memory_space<vmem>>, vector<1x32x32xbf16>
    %148 = vector.shape_cast %147 : vector<1x32x32xbf16> to vector<32x32xbf16>
    %c0_55 = arith.constant 0 : index
    %c0_56 = arith.constant 0 : index
    %c0_57 = arith.constant 0 : index
    %149 = vector.load %arg7[%c0_55, %c0_56, %c0_57] : memref<2x1x32xf32, #tpu.memory_space<vmem>>, vector<1x1x32xf32>
    %150 = vector.shape_cast %149 : vector<1x1x32xf32> to vector<1x32xf32>
    %151 = arith.truncf %146 : vector<10x32xf32> to vector<10x32xbf16>
    %cst_58 = arith.constant dense<0.000000e+00> : vector<10x32xf32>
    %152 = tpu.matmul %151, %148, %cst_58 {dimension_numbers = #tpu.dot_dimension_numbers<[1], [0], [0], [1], [0, 0, 1, 1], [], []>} : vector<10x32xbf16>, vector<32x32xbf16>, vector<10x32xf32> -> vector<10x32xf32>
    %153 = vector.broadcast %150 : vector<1x32xf32> to vector<10x32xf32>
    %154 = arith.addf %152, %153 : vector<10x32xf32>
    %c0_59 = arith.constant 0 : index
    %c0_60 = arith.constant 0 : index
    %c0_61 = arith.constant 0 : index
    %155 = vector.load %arg8[%c0_59, %c0_60, %c0_61] : memref<2x32x64xbf16, #tpu.memory_space<vmem>>, vector<1x32x64xbf16>
    %156 = vector.shape_cast %155 : vector<1x32x64xbf16> to vector<32x64xbf16>
    %c0_62 = arith.constant 0 : index
    %c0_63 = arith.constant 0 : index
    %c0_64 = arith.constant 0 : index
    %157 = vector.load %arg9[%c0_62, %c0_63, %c0_64] : memref<2x1x64xf32, #tpu.memory_space<vmem>>, vector<1x1x64xf32>
    %158 = vector.shape_cast %157 : vector<1x1x64xf32> to vector<1x64xf32>
    %cst_65 = arith.constant dense<0.000000e+00> : vector<16x64xf32>
    %159 = tpu.matmul %0, %156, %cst_65 {dimension_numbers = #tpu.dot_dimension_numbers<[1], [0], [0], [1], [0, 0, 1, 1], [], []>} : vector<16x32xbf16>, vector<32x64xbf16>, vector<16x64xf32> -> vector<16x64xf32>
    %160 = vector.broadcast %158 : vector<1x64xf32> to vector<16x64xf32>
    %161 = arith.addf %159, %160 : vector<16x64xf32>
    %162 = vector.extract_strided_slice %161 {offsets = [0, 0], sizes = [16, 32], strides = [1, 1]} : vector<16x64xf32> to vector<16x32xf32>
    %163 = vector.extract_strided_slice %161 {offsets = [0, 32], sizes = [16, 32], strides = [1, 1]} : vector<16x64xf32> to vector<16x32xf32>
    %164 = vector.extract_strided_slice %154 {offsets = [0, 0], sizes = [5, 32], strides = [1, 1]} : vector<10x32xf32> to vector<5x32xf32>
    %165 = vector.extract_strided_slice %162 {offsets = [0, 0], sizes = [8, 32], strides = [1, 1]} : vector<16x32xf32> to vector<8x32xf32>
    %166 = vector.extract_strided_slice %163 {offsets = [0, 0], sizes = [8, 32], strides = [1, 1]} : vector<16x32xf32> to vector<8x32xf32>
    %167 = vector.extract_strided_slice %164 {offsets = [0, 0], sizes = [5, 16], strides = [1, 1]} : vector<5x32xf32> to vector<5x16xf32>
    %168 = arith.truncf %167 : vector<5x16xf32> to vector<5x16xbf16>
    %169 = vector.extract_strided_slice %165 {offsets = [0, 0], sizes = [8, 16], strides = [1, 1]} : vector<8x32xf32> to vector<8x16xf32>
    %170 = arith.truncf %169 : vector<8x16xf32> to vector<8x16xbf16>
    %171 = vector.extract_strided_slice %166 {offsets = [0, 0], sizes = [8, 16], strides = [1, 1]} : vector<8x32xf32> to vector<8x16xf32>
    %172 = arith.truncf %171 : vector<8x16xf32> to vector<8x16xbf16>
    %cst_66 = arith.constant dense<0.000000e+00> : vector<5x8xf32>
    %173 = tpu.matmul %168, %170, %cst_66 {dimension_numbers = #tpu.dot_dimension_numbers<[1], [1], [0], [0], [0, 0, 1, 0], [], []>} : vector<5x16xbf16>, vector<8x16xbf16>, vector<5x8xf32> -> vector<5x8xf32>
    %cst_67 = arith.constant 2.500000e-01 : f32
    %174 = vector.broadcast %cst_67 : f32 to vector<5x8xf32>
    %175 = arith.mulf %173, %174 : vector<5x8xf32>
    %cst_68 = arith.constant dense<0xFF800000> : vector<5xf32>
    %176 = vector.multi_reduction <maximumf>, %175, %cst_68 [1] : vector<5x8xf32> to vector<5xf32>
    %177 = vector.shape_cast %176 : vector<5xf32> to vector<5x1xf32>
    %178 = vector.broadcast %177 : vector<5x1xf32> to vector<5x8xf32>
    %179 = arith.subf %175, %178 : vector<5x8xf32>
    %180 = math.exp %179 : vector<5x8xf32>
    %cst_69 = arith.constant dense<0.000000e+00> : vector<5xf32>
    %181 = vector.multi_reduction <add>, %180, %cst_69 [1] : vector<5x8xf32> to vector<5xf32>
    %182 = vector.shape_cast %181 : vector<5xf32> to vector<5x1xf32>
    %183 = tpu.reciprocal %182 {approx = true} : vector<5x1xf32> -> vector<5x1xf32>
    %184 = vector.broadcast %183 : vector<5x1xf32> to vector<5x8xf32>
    %185 = arith.mulf %180, %184 : vector<5x8xf32>
    %186 = arith.truncf %185 : vector<5x8xf32> to vector<5x8xbf16>
    %cst_70 = arith.constant dense<0.000000e+00> : vector<5x16xf32>
    %187 = tpu.matmul %186, %172, %cst_70 {dimension_numbers = #tpu.dot_dimension_numbers<[1], [0], [0], [1], [0, 0, 1, 1], [], []>} : vector<5x8xbf16>, vector<8x16xbf16>, vector<5x16xf32> -> vector<5x16xf32>
    %188 = vector.extract_strided_slice %164 {offsets = [0, 16], sizes = [5, 16], strides = [1, 1]} : vector<5x32xf32> to vector<5x16xf32>
    %189 = arith.truncf %188 : vector<5x16xf32> to vector<5x16xbf16>
    %190 = vector.extract_strided_slice %165 {offsets = [0, 16], sizes = [8, 16], strides = [1, 1]} : vector<8x32xf32> to vector<8x16xf32>
    %191 = arith.truncf %190 : vector<8x16xf32> to vector<8x16xbf16>
    %192 = vector.extract_strided_slice %166 {offsets = [0, 16], sizes = [8, 16], strides = [1, 1]} : vector<8x32xf32> to vector<8x16xf32>
    %193 = arith.truncf %192 : vector<8x16xf32> to vector<8x16xbf16>
    %cst_71 = arith.constant dense<0.000000e+00> : vector<5x8xf32>
    %194 = tpu.matmul %189, %191, %cst_71 {dimension_numbers = #tpu.dot_dimension_numbers<[1], [1], [0], [0], [0, 0, 1, 0], [], []>} : vector<5x16xbf16>, vector<8x16xbf16>, vector<5x8xf32> -> vector<5x8xf32>
    %cst_72 = arith.constant 2.500000e-01 : f32
    %195 = vector.broadcast %cst_72 : f32 to vector<5x8xf32>
    %196 = arith.mulf %194, %195 : vector<5x8xf32>
    %cst_73 = arith.constant dense<0xFF800000> : vector<5xf32>
    %197 = vector.multi_reduction <maximumf>, %196, %cst_73 [1] : vector<5x8xf32> to vector<5xf32>
    %198 = vector.shape_cast %197 : vector<5xf32> to vector<5x1xf32>
    %199 = vector.broadcast %198 : vector<5x1xf32> to vector<5x8xf32>
    %200 = arith.subf %196, %199 : vector<5x8xf32>
    %201 = math.exp %200 : vector<5x8xf32>
    %cst_74 = arith.constant dense<0.000000e+00> : vector<5xf32>
    %202 = vector.multi_reduction <add>, %201, %cst_74 [1] : vector<5x8xf32> to vector<5xf32>
    %203 = vector.shape_cast %202 : vector<5xf32> to vector<5x1xf32>
    %204 = tpu.reciprocal %203 {approx = true} : vector<5x1xf32> -> vector<5x1xf32>
    %205 = vector.broadcast %204 : vector<5x1xf32> to vector<5x8xf32>
    %206 = arith.mulf %201, %205 : vector<5x8xf32>
    %207 = arith.truncf %206 : vector<5x8xf32> to vector<5x8xbf16>
    %cst_75 = arith.constant dense<0.000000e+00> : vector<5x16xf32>
    %208 = tpu.matmul %207, %193, %cst_75 {dimension_numbers = #tpu.dot_dimension_numbers<[1], [0], [0], [1], [0, 0, 1, 1], [], []>} : vector<5x8xbf16>, vector<8x16xbf16>, vector<5x16xf32> -> vector<5x16xf32>
    %209 = tpu.concatenate %187, %208 in 1 : vector<5x16xf32>, vector<5x16xf32> -> vector<5x32xf32>
    %210 = vector.extract_strided_slice %154 {offsets = [5, 0], sizes = [5, 32], strides = [1, 1]} : vector<10x32xf32> to vector<5x32xf32>
    %211 = vector.extract_strided_slice %162 {offsets = [8, 0], sizes = [8, 32], strides = [1, 1]} : vector<16x32xf32> to vector<8x32xf32>
    %212 = vector.extract_strided_slice %163 {offsets = [8, 0], sizes = [8, 32], strides = [1, 1]} : vector<16x32xf32> to vector<8x32xf32>
    %213 = vector.extract_strided_slice %210 {offsets = [0, 0], sizes = [5, 16], strides = [1, 1]} : vector<5x32xf32> to vector<5x16xf32>
    %214 = arith.truncf %213 : vector<5x16xf32> to vector<5x16xbf16>
    %215 = vector.extract_strided_slice %211 {offsets = [0, 0], sizes = [8, 16], strides = [1, 1]} : vector<8x32xf32> to vector<8x16xf32>
    %216 = arith.truncf %215 : vector<8x16xf32> to vector<8x16xbf16>
    %217 = vector.extract_strided_slice %212 {offsets = [0, 0], sizes = [8, 16], strides = [1, 1]} : vector<8x32xf32> to vector<8x16xf32>
    %218 = arith.truncf %217 : vector<8x16xf32> to vector<8x16xbf16>
    %cst_76 = arith.constant dense<0.000000e+00> : vector<5x8xf32>
    %219 = tpu.matmul %214, %216, %cst_76 {dimension_numbers = #tpu.dot_dimension_numbers<[1], [1], [0], [0], [0, 0, 1, 0], [], []>} : vector<5x16xbf16>, vector<8x16xbf16>, vector<5x8xf32> -> vector<5x8xf32>
    %cst_77 = arith.constant 2.500000e-01 : f32
    %220 = vector.broadcast %cst_77 : f32 to vector<5x8xf32>
    %221 = arith.mulf %219, %220 : vector<5x8xf32>
    %cst_78 = arith.constant dense<0xFF800000> : vector<5xf32>
    %222 = vector.multi_reduction <maximumf>, %221, %cst_78 [1] : vector<5x8xf32> to vector<5xf32>
    %223 = vector.shape_cast %222 : vector<5xf32> to vector<5x1xf32>
    %224 = vector.broadcast %223 : vector<5x1xf32> to vector<5x8xf32>
    %225 = arith.subf %221, %224 : vector<5x8xf32>
    %226 = math.exp %225 : vector<5x8xf32>
    %cst_79 = arith.constant dense<0.000000e+00> : vector<5xf32>
    %227 = vector.multi_reduction <add>, %226, %cst_79 [1] : vector<5x8xf32> to vector<5xf32>
    %228 = vector.shape_cast %227 : vector<5xf32> to vector<5x1xf32>
    %229 = tpu.reciprocal %228 {approx = true} : vector<5x1xf32> -> vector<5x1xf32>
    %230 = vector.broadcast %229 : vector<5x1xf32> to vector<5x8xf32>
    %231 = arith.mulf %226, %230 : vector<5x8xf32>
    %232 = arith.truncf %231 : vector<5x8xf32> to vector<5x8xbf16>
    %cst_80 = arith.constant dense<0.000000e+00> : vector<5x16xf32>
    %233 = tpu.matmul %232, %218, %cst_80 {dimension_numbers = #tpu.dot_dimension_numbers<[1], [0], [0], [1], [0, 0, 1, 1], [], []>} : vector<5x8xbf16>, vector<8x16xbf16>, vector<5x16xf32> -> vector<5x16xf32>
    %234 = vector.extract_strided_slice %210 {offsets = [0, 16], sizes = [5, 16], strides = [1, 1]} : vector<5x32xf32> to vector<5x16xf32>
    %235 = arith.truncf %234 : vector<5x16xf32> to vector<5x16xbf16>
    %236 = vector.extract_strided_slice %211 {offsets = [0, 16], sizes = [8, 16], strides = [1, 1]} : vector<8x32xf32> to vector<8x16xf32>
    %237 = arith.truncf %236 : vector<8x16xf32> to vector<8x16xbf16>
    %238 = vector.extract_strided_slice %212 {offsets = [0, 16], sizes = [8, 16], strides = [1, 1]} : vector<8x32xf32> to vector<8x16xf32>
    %239 = arith.truncf %238 : vector<8x16xf32> to vector<8x16xbf16>
    %cst_81 = arith.constant dense<0.000000e+00> : vector<5x8xf32>
    %240 = tpu.matmul %235, %237, %cst_81 {dimension_numbers = #tpu.dot_dimension_numbers<[1], [1], [0], [0], [0, 0, 1, 0], [], []>} : vector<5x16xbf16>, vector<8x16xbf16>, vector<5x8xf32> -> vector<5x8xf32>
    %cst_82 = arith.constant 2.500000e-01 : f32
    %241 = vector.broadcast %cst_82 : f32 to vector<5x8xf32>
    %242 = arith.mulf %240, %241 : vector<5x8xf32>
    %cst_83 = arith.constant dense<0xFF800000> : vector<5xf32>
    %243 = vector.multi_reduction <maximumf>, %242, %cst_83 [1] : vector<5x8xf32> to vector<5xf32>
    %244 = vector.shape_cast %243 : vector<5xf32> to vector<5x1xf32>
    %245 = vector.broadcast %244 : vector<5x1xf32> to vector<5x8xf32>
    %246 = arith.subf %242, %245 : vector<5x8xf32>
    %247 = math.exp %246 : vector<5x8xf32>
    %cst_84 = arith.constant dense<0.000000e+00> : vector<5xf32>
    %248 = vector.multi_reduction <add>, %247, %cst_84 [1] : vector<5x8xf32> to vector<5xf32>
    %249 = vector.shape_cast %248 : vector<5xf32> to vector<5x1xf32>
    %250 = tpu.reciprocal %249 {approx = true} : vector<5x1xf32> -> vector<5x1xf32>
    %251 = vector.broadcast %250 : vector<5x1xf32> to vector<5x8xf32>
    %252 = arith.mulf %247, %251 : vector<5x8xf32>
    %253 = arith.truncf %252 : vector<5x8xf32> to vector<5x8xbf16>
    %cst_85 = arith.constant dense<0.000000e+00> : vector<5x16xf32>
    %254 = tpu.matmul %253, %239, %cst_85 {dimension_numbers = #tpu.dot_dimension_numbers<[1], [0], [0], [1], [0, 0, 1, 1], [], []>} : vector<5x8xbf16>, vector<8x16xbf16>, vector<5x16xf32> -> vector<5x16xf32>
    %255 = tpu.concatenate %233, %254 in 1 : vector<5x16xf32>, vector<5x16xf32> -> vector<5x32xf32>
    %256 = tpu.concatenate %209, %255 in 0 : vector<5x32xf32>, vector<5x32xf32> -> vector<10x32xf32>
    %c0_86 = arith.constant 0 : index
    %c0_87 = arith.constant 0 : index
    %c0_88 = arith.constant 0 : index
    %257 = vector.load %arg10[%c0_86, %c0_87, %c0_88] : memref<2x32x32xbf16, #tpu.memory_space<vmem>>, vector<1x32x32xbf16>
    %258 = vector.shape_cast %257 : vector<1x32x32xbf16> to vector<32x32xbf16>
    %c0_89 = arith.constant 0 : index
    %c0_90 = arith.constant 0 : index
    %c0_91 = arith.constant 0 : index
    %259 = vector.load %arg11[%c0_89, %c0_90, %c0_91] : memref<2x1x32xf32, #tpu.memory_space<vmem>>, vector<1x1x32xf32>
    %260 = vector.shape_cast %259 : vector<1x1x32xf32> to vector<1x32xf32>
    %261 = arith.truncf %256 : vector<10x32xf32> to vector<10x32xbf16>
    %cst_92 = arith.constant dense<0.000000e+00> : vector<10x32xf32>
    %262 = tpu.matmul %261, %258, %cst_92 {dimension_numbers = #tpu.dot_dimension_numbers<[1], [0], [0], [1], [0, 0, 1, 1], [], []>} : vector<10x32xbf16>, vector<32x32xbf16>, vector<10x32xf32> -> vector<10x32xf32>
    %263 = vector.broadcast %260 : vector<1x32xf32> to vector<10x32xf32>
    %264 = arith.addf %262, %263 : vector<10x32xf32>
    %265 = arith.addf %146, %264 : vector<10x32xf32>
    %266 = vector.extract_strided_slice %7 {offsets = [1, 0], sizes = [1, 32], strides = [1, 1]} : vector<3x32xf32> to vector<1x32xf32>
    %267 = vector.extract_strided_slice %9 {offsets = [1, 0], sizes = [1, 32], strides = [1, 1]} : vector<3x32xf32> to vector<1x32xf32>
    %cst_93 = arith.constant dense<0.000000e+00> : vector<10xf32>
    %268 = vector.multi_reduction <add>, %265, %cst_93 [1] : vector<10x32xf32> to vector<10xf32>
    %269 = vector.shape_cast %268 : vector<10xf32> to vector<10x1xf32>
    %cst_94 = arith.constant 3.200000e+01 : f32
    %270 = vector.broadcast %cst_94 : f32 to vector<10x1xf32>
    %271 = arith.divf %269, %270 : vector<10x1xf32>
    %272 = vector.broadcast %271 : vector<10x1xf32> to vector<10x32xf32>
    %273 = arith.subf %265, %272 : vector<10x32xf32>
    %274 = arith.mulf %273, %273 : vector<10x32xf32>
    %cst_95 = arith.constant dense<0.000000e+00> : vector<10xf32>
    %275 = vector.multi_reduction <add>, %274, %cst_95 [1] : vector<10x32xf32> to vector<10xf32>
    %276 = vector.shape_cast %275 : vector<10xf32> to vector<10x1xf32>
    %cst_96 = arith.constant 3.200000e+01 : f32
    %277 = vector.broadcast %cst_96 : f32 to vector<10x1xf32>
    %278 = arith.divf %276, %277 : vector<10x1xf32>
    %279 = vector.broadcast %271 : vector<10x1xf32> to vector<10x32xf32>
    %280 = arith.subf %265, %279 : vector<10x32xf32>
    %cst_97 = arith.constant 9.99999974E-6 : f32
    %281 = vector.broadcast %cst_97 : f32 to vector<10x1xf32>
    %282 = arith.addf %278, %281 : vector<10x1xf32>
    %283 = math.rsqrt %282 : vector<10x1xf32>
    %284 = vector.broadcast %283 : vector<10x1xf32> to vector<10x32xf32>
    %285 = arith.mulf %280, %284 : vector<10x32xf32>
    %286 = vector.broadcast %266 : vector<1x32xf32> to vector<10x32xf32>
    %287 = arith.mulf %285, %286 : vector<10x32xf32>
    %288 = vector.broadcast %267 : vector<1x32xf32> to vector<10x32xf32>
    %289 = arith.addf %287, %288 : vector<10x32xf32>
    %c0_98 = arith.constant 0 : index
    %c0_99 = arith.constant 0 : index
    %c0_100 = arith.constant 0 : index
    %290 = vector.load %arg12[%c0_98, %c0_99, %c0_100] : memref<2x32x64xbf16, #tpu.memory_space<vmem>>, vector<1x32x64xbf16>
    %291 = vector.shape_cast %290 : vector<1x32x64xbf16> to vector<32x64xbf16>
    %c0_101 = arith.constant 0 : index
    %c0_102 = arith.constant 0 : index
    %c0_103 = arith.constant 0 : index
    %292 = vector.load %arg13[%c0_101, %c0_102, %c0_103] : memref<2x1x64xf32, #tpu.memory_space<vmem>>, vector<1x1x64xf32>
    %293 = vector.shape_cast %292 : vector<1x1x64xf32> to vector<1x64xf32>
    %294 = arith.truncf %289 : vector<10x32xf32> to vector<10x32xbf16>
    %cst_104 = arith.constant dense<0.000000e+00> : vector<10x64xf32>
    %295 = tpu.matmul %294, %291, %cst_104 {dimension_numbers = #tpu.dot_dimension_numbers<[1], [0], [0], [1], [0, 0, 1, 1], [], []>} : vector<10x32xbf16>, vector<32x64xbf16>, vector<10x64xf32> -> vector<10x64xf32>
    %296 = vector.broadcast %293 : vector<1x64xf32> to vector<10x64xf32>
    %297 = arith.addf %295, %296 : vector<10x64xf32>
    %cst_105 = arith.constant 0.000000e+00 : f32
    %298 = vector.broadcast %cst_105 : f32 to vector<10x64xf32>
    %299 = arith.maximumf %297, %298 : vector<10x64xf32>
    %c0_106 = arith.constant 0 : index
    %c0_107 = arith.constant 0 : index
    %c0_108 = arith.constant 0 : index
    %300 = vector.load %arg14[%c0_106, %c0_107, %c0_108] : memref<2x64x32xbf16, #tpu.memory_space<vmem>>, vector<1x64x32xbf16>
    %301 = vector.shape_cast %300 : vector<1x64x32xbf16> to vector<64x32xbf16>
    %c0_109 = arith.constant 0 : index
    %c0_110 = arith.constant 0 : index
    %c0_111 = arith.constant 0 : index
    %302 = vector.load %arg15[%c0_109, %c0_110, %c0_111] : memref<2x1x32xf32, #tpu.memory_space<vmem>>, vector<1x1x32xf32>
    %303 = vector.shape_cast %302 : vector<1x1x32xf32> to vector<1x32xf32>
    %304 = arith.truncf %299 : vector<10x64xf32> to vector<10x64xbf16>
    %cst_112 = arith.constant dense<0.000000e+00> : vector<10x32xf32>
    %305 = tpu.matmul %304, %301, %cst_112 {dimension_numbers = #tpu.dot_dimension_numbers<[1], [0], [0], [1], [0, 0, 1, 1], [], []>} : vector<10x64xbf16>, vector<64x32xbf16>, vector<10x32xf32> -> vector<10x32xf32>
    %306 = vector.broadcast %303 : vector<1x32xf32> to vector<10x32xf32>
    %307 = arith.addf %305, %306 : vector<10x32xf32>
    %308 = arith.addf %289, %307 : vector<10x32xf32>
    %309 = vector.extract_strided_slice %7 {offsets = [2, 0], sizes = [1, 32], strides = [1, 1]} : vector<3x32xf32> to vector<1x32xf32>
    %310 = vector.extract_strided_slice %9 {offsets = [2, 0], sizes = [1, 32], strides = [1, 1]} : vector<3x32xf32> to vector<1x32xf32>
    %cst_113 = arith.constant dense<0.000000e+00> : vector<10xf32>
    %311 = vector.multi_reduction <add>, %308, %cst_113 [1] : vector<10x32xf32> to vector<10xf32>
    %312 = vector.shape_cast %311 : vector<10xf32> to vector<10x1xf32>
    %cst_114 = arith.constant 3.200000e+01 : f32
    %313 = vector.broadcast %cst_114 : f32 to vector<10x1xf32>
    %314 = arith.divf %312, %313 : vector<10x1xf32>
    %315 = vector.broadcast %314 : vector<10x1xf32> to vector<10x32xf32>
    %316 = arith.subf %308, %315 : vector<10x32xf32>
    %317 = arith.mulf %316, %316 : vector<10x32xf32>
    %cst_115 = arith.constant dense<0.000000e+00> : vector<10xf32>
    %318 = vector.multi_reduction <add>, %317, %cst_115 [1] : vector<10x32xf32> to vector<10xf32>
    %319 = vector.shape_cast %318 : vector<10xf32> to vector<10x1xf32>
    %cst_116 = arith.constant 3.200000e+01 : f32
    %320 = vector.broadcast %cst_116 : f32 to vector<10x1xf32>
    %321 = arith.divf %319, %320 : vector<10x1xf32>
    %322 = vector.broadcast %314 : vector<10x1xf32> to vector<10x32xf32>
    %323 = arith.subf %308, %322 : vector<10x32xf32>
    %cst_117 = arith.constant 9.99999974E-6 : f32
    %324 = vector.broadcast %cst_117 : f32 to vector<10x1xf32>
    %325 = arith.addf %321, %324 : vector<10x1xf32>
    %326 = math.rsqrt %325 : vector<10x1xf32>
    %327 = vector.broadcast %326 : vector<10x1xf32> to vector<10x32xf32>
    %328 = arith.mulf %323, %327 : vector<10x32xf32>
    %329 = vector.broadcast %309 : vector<1x32xf32> to vector<10x32xf32>
    %330 = arith.mulf %328, %329 : vector<10x32xf32>
    %331 = vector.broadcast %310 : vector<1x32xf32> to vector<10x32xf32>
    %332 = arith.addf %330, %331 : vector<10x32xf32>
    %c1 = arith.constant 1 : index
    %c0_118 = arith.constant 0 : index
    %c0_119 = arith.constant 0 : index
    %333 = vector.load %arg16[%c1, %c0_118, %c0_119] : memref<2x3x32xf32, #tpu.memory_space<vmem>>, vector<1x3x32xf32>
    %334 = vector.shape_cast %333 : vector<1x3x32xf32> to vector<3x32xf32>
    %c1_120 = arith.constant 1 : index
    %c0_121 = arith.constant 0 : index
    %c0_122 = arith.constant 0 : index
    %335 = vector.load %arg17[%c1_120, %c0_121, %c0_122] : memref<2x3x32xf32, #tpu.memory_space<vmem>>, vector<1x3x32xf32>
    %336 = vector.shape_cast %335 : vector<1x3x32xf32> to vector<3x32xf32>
    %c1_123 = arith.constant 1 : index
    %c0_124 = arith.constant 0 : index
    %c0_125 = arith.constant 0 : index
    %337 = vector.load %arg2[%c1_123, %c0_124, %c0_125] : memref<2x32x96xbf16, #tpu.memory_space<vmem>>, vector<1x32x96xbf16>
    %338 = vector.shape_cast %337 : vector<1x32x96xbf16> to vector<32x96xbf16>
    %c1_126 = arith.constant 1 : index
    %c0_127 = arith.constant 0 : index
    %c0_128 = arith.constant 0 : index
    %339 = vector.load %arg3[%c1_126, %c0_127, %c0_128] : memref<2x1x96xf32, #tpu.memory_space<vmem>>, vector<1x1x96xf32>
    %340 = vector.shape_cast %339 : vector<1x1x96xf32> to vector<1x96xf32>
    %341 = arith.truncf %332 : vector<10x32xf32> to vector<10x32xbf16>
    %cst_129 = arith.constant dense<0.000000e+00> : vector<10x96xf32>
    %342 = tpu.matmul %341, %338, %cst_129 {dimension_numbers = #tpu.dot_dimension_numbers<[1], [0], [0], [1], [0, 0, 1, 1], [], []>} : vector<10x32xbf16>, vector<32x96xbf16>, vector<10x96xf32> -> vector<10x96xf32>
    %343 = vector.broadcast %340 : vector<1x96xf32> to vector<10x96xf32>
    %344 = arith.addf %342, %343 : vector<10x96xf32>
    %345 = vector.extract_strided_slice %344 {offsets = [0, 0], sizes = [10, 32], strides = [1, 1]} : vector<10x96xf32> to vector<10x32xf32>
    %346 = vector.extract_strided_slice %344 {offsets = [0, 32], sizes = [10, 32], strides = [1, 1]} : vector<10x96xf32> to vector<10x32xf32>
    %347 = vector.extract_strided_slice %344 {offsets = [0, 64], sizes = [10, 32], strides = [1, 1]} : vector<10x96xf32> to vector<10x32xf32>
    %348 = vector.extract_strided_slice %345 {offsets = [0, 0], sizes = [5, 32], strides = [1, 1]} : vector<10x32xf32> to vector<5x32xf32>
    %349 = vector.extract_strided_slice %346 {offsets = [0, 0], sizes = [5, 32], strides = [1, 1]} : vector<10x32xf32> to vector<5x32xf32>
    %350 = vector.extract_strided_slice %347 {offsets = [0, 0], sizes = [5, 32], strides = [1, 1]} : vector<10x32xf32> to vector<5x32xf32>
    %351 = vector.extract_strided_slice %348 {offsets = [0, 0], sizes = [5, 16], strides = [1, 1]} : vector<5x32xf32> to vector<5x16xf32>
    %352 = arith.truncf %351 : vector<5x16xf32> to vector<5x16xbf16>
    %353 = vector.extract_strided_slice %349 {offsets = [0, 0], sizes = [5, 16], strides = [1, 1]} : vector<5x32xf32> to vector<5x16xf32>
    %354 = arith.truncf %353 : vector<5x16xf32> to vector<5x16xbf16>
    %355 = vector.extract_strided_slice %350 {offsets = [0, 0], sizes = [5, 16], strides = [1, 1]} : vector<5x32xf32> to vector<5x16xf32>
    %356 = arith.truncf %355 : vector<5x16xf32> to vector<5x16xbf16>
    %cst_130 = arith.constant dense<0.000000e+00> : vector<5x5xf32>
    %357 = tpu.matmul %352, %354, %cst_130 {dimension_numbers = #tpu.dot_dimension_numbers<[1], [1], [0], [0], [0, 0, 1, 0], [], []>} : vector<5x16xbf16>, vector<5x16xbf16>, vector<5x5xf32> -> vector<5x5xf32>
    %cst_131 = arith.constant 2.500000e-01 : f32
    %358 = vector.broadcast %cst_131 : f32 to vector<5x5xf32>
    %359 = arith.mulf %357, %358 : vector<5x5xf32>
    %cst_132 = arith.constant dense<0xFF800000> : vector<5xf32>
    %360 = vector.multi_reduction <maximumf>, %359, %cst_132 [1] : vector<5x5xf32> to vector<5xf32>
    %361 = vector.shape_cast %360 : vector<5xf32> to vector<5x1xf32>
    %362 = vector.broadcast %361 : vector<5x1xf32> to vector<5x5xf32>
    %363 = arith.subf %359, %362 : vector<5x5xf32>
    %364 = math.exp %363 : vector<5x5xf32>
    %cst_133 = arith.constant dense<0.000000e+00> : vector<5xf32>
    %365 = vector.multi_reduction <add>, %364, %cst_133 [1] : vector<5x5xf32> to vector<5xf32>
    %366 = vector.shape_cast %365 : vector<5xf32> to vector<5x1xf32>
    %367 = tpu.reciprocal %366 {approx = true} : vector<5x1xf32> -> vector<5x1xf32>
    %368 = vector.broadcast %367 : vector<5x1xf32> to vector<5x5xf32>
    %369 = arith.mulf %364, %368 : vector<5x5xf32>
    %370 = arith.truncf %369 : vector<5x5xf32> to vector<5x5xbf16>
    %cst_134 = arith.constant dense<0.000000e+00> : vector<5x16xf32>
    %371 = tpu.matmul %370, %356, %cst_134 {dimension_numbers = #tpu.dot_dimension_numbers<[1], [0], [0], [1], [0, 0, 1, 1], [], []>} : vector<5x5xbf16>, vector<5x16xbf16>, vector<5x16xf32> -> vector<5x16xf32>
    %372 = vector.extract_strided_slice %348 {offsets = [0, 16], sizes = [5, 16], strides = [1, 1]} : vector<5x32xf32> to vector<5x16xf32>
    %373 = arith.truncf %372 : vector<5x16xf32> to vector<5x16xbf16>
    %374 = vector.extract_strided_slice %349 {offsets = [0, 16], sizes = [5, 16], strides = [1, 1]} : vector<5x32xf32> to vector<5x16xf32>
    %375 = arith.truncf %374 : vector<5x16xf32> to vector<5x16xbf16>
    %376 = vector.extract_strided_slice %350 {offsets = [0, 16], sizes = [5, 16], strides = [1, 1]} : vector<5x32xf32> to vector<5x16xf32>
    %377 = arith.truncf %376 : vector<5x16xf32> to vector<5x16xbf16>
    %cst_135 = arith.constant dense<0.000000e+00> : vector<5x5xf32>
    %378 = tpu.matmul %373, %375, %cst_135 {dimension_numbers = #tpu.dot_dimension_numbers<[1], [1], [0], [0], [0, 0, 1, 0], [], []>} : vector<5x16xbf16>, vector<5x16xbf16>, vector<5x5xf32> -> vector<5x5xf32>
    %cst_136 = arith.constant 2.500000e-01 : f32
    %379 = vector.broadcast %cst_136 : f32 to vector<5x5xf32>
    %380 = arith.mulf %378, %379 : vector<5x5xf32>
    %cst_137 = arith.constant dense<0xFF800000> : vector<5xf32>
    %381 = vector.multi_reduction <maximumf>, %380, %cst_137 [1] : vector<5x5xf32> to vector<5xf32>
    %382 = vector.shape_cast %381 : vector<5xf32> to vector<5x1xf32>
    %383 = vector.broadcast %382 : vector<5x1xf32> to vector<5x5xf32>
    %384 = arith.subf %380, %383 : vector<5x5xf32>
    %385 = math.exp %384 : vector<5x5xf32>
    %cst_138 = arith.constant dense<0.000000e+00> : vector<5xf32>
    %386 = vector.multi_reduction <add>, %385, %cst_138 [1] : vector<5x5xf32> to vector<5xf32>
    %387 = vector.shape_cast %386 : vector<5xf32> to vector<5x1xf32>
    %388 = tpu.reciprocal %387 {approx = true} : vector<5x1xf32> -> vector<5x1xf32>
    %389 = vector.broadcast %388 : vector<5x1xf32> to vector<5x5xf32>
    %390 = arith.mulf %385, %389 : vector<5x5xf32>
    %391 = arith.truncf %390 : vector<5x5xf32> to vector<5x5xbf16>
    %cst_139 = arith.constant dense<0.000000e+00> : vector<5x16xf32>
    %392 = tpu.matmul %391, %377, %cst_139 {dimension_numbers = #tpu.dot_dimension_numbers<[1], [0], [0], [1], [0, 0, 1, 1], [], []>} : vector<5x5xbf16>, vector<5x16xbf16>, vector<5x16xf32> -> vector<5x16xf32>
    %393 = tpu.concatenate %371, %392 in 1 : vector<5x16xf32>, vector<5x16xf32> -> vector<5x32xf32>
    %394 = vector.extract_strided_slice %345 {offsets = [5, 0], sizes = [5, 32], strides = [1, 1]} : vector<10x32xf32> to vector<5x32xf32>
    %395 = vector.extract_strided_slice %346 {offsets = [5, 0], sizes = [5, 32], strides = [1, 1]} : vector<10x32xf32> to vector<5x32xf32>
    %396 = vector.extract_strided_slice %347 {offsets = [5, 0], sizes = [5, 32], strides = [1, 1]} : vector<10x32xf32> to vector<5x32xf32>
    %397 = vector.extract_strided_slice %394 {offsets = [0, 0], sizes = [5, 16], strides = [1, 1]} : vector<5x32xf32> to vector<5x16xf32>
    %398 = arith.truncf %397 : vector<5x16xf32> to vector<5x16xbf16>
    %399 = vector.extract_strided_slice %395 {offsets = [0, 0], sizes = [5, 16], strides = [1, 1]} : vector<5x32xf32> to vector<5x16xf32>
    %400 = arith.truncf %399 : vector<5x16xf32> to vector<5x16xbf16>
    %401 = vector.extract_strided_slice %396 {offsets = [0, 0], sizes = [5, 16], strides = [1, 1]} : vector<5x32xf32> to vector<5x16xf32>
    %402 = arith.truncf %401 : vector<5x16xf32> to vector<5x16xbf16>
    %cst_140 = arith.constant dense<0.000000e+00> : vector<5x5xf32>
    %403 = tpu.matmul %398, %400, %cst_140 {dimension_numbers = #tpu.dot_dimension_numbers<[1], [1], [0], [0], [0, 0, 1, 0], [], []>} : vector<5x16xbf16>, vector<5x16xbf16>, vector<5x5xf32> -> vector<5x5xf32>
    %cst_141 = arith.constant 2.500000e-01 : f32
    %404 = vector.broadcast %cst_141 : f32 to vector<5x5xf32>
    %405 = arith.mulf %403, %404 : vector<5x5xf32>
    %cst_142 = arith.constant dense<0xFF800000> : vector<5xf32>
    %406 = vector.multi_reduction <maximumf>, %405, %cst_142 [1] : vector<5x5xf32> to vector<5xf32>
    %407 = vector.shape_cast %406 : vector<5xf32> to vector<5x1xf32>
    %408 = vector.broadcast %407 : vector<5x1xf32> to vector<5x5xf32>
    %409 = arith.subf %405, %408 : vector<5x5xf32>
    %410 = math.exp %409 : vector<5x5xf32>
    %cst_143 = arith.constant dense<0.000000e+00> : vector<5xf32>
    %411 = vector.multi_reduction <add>, %410, %cst_143 [1] : vector<5x5xf32> to vector<5xf32>
    %412 = vector.shape_cast %411 : vector<5xf32> to vector<5x1xf32>
    %413 = tpu.reciprocal %412 {approx = true} : vector<5x1xf32> -> vector<5x1xf32>
    %414 = vector.broadcast %413 : vector<5x1xf32> to vector<5x5xf32>
    %415 = arith.mulf %410, %414 : vector<5x5xf32>
    %416 = arith.truncf %415 : vector<5x5xf32> to vector<5x5xbf16>
    %cst_144 = arith.constant dense<0.000000e+00> : vector<5x16xf32>
    %417 = tpu.matmul %416, %402, %cst_144 {dimension_numbers = #tpu.dot_dimension_numbers<[1], [0], [0], [1], [0, 0, 1, 1], [], []>} : vector<5x5xbf16>, vector<5x16xbf16>, vector<5x16xf32> -> vector<5x16xf32>
    %418 = vector.extract_strided_slice %394 {offsets = [0, 16], sizes = [5, 16], strides = [1, 1]} : vector<5x32xf32> to vector<5x16xf32>
    %419 = arith.truncf %418 : vector<5x16xf32> to vector<5x16xbf16>
    %420 = vector.extract_strided_slice %395 {offsets = [0, 16], sizes = [5, 16], strides = [1, 1]} : vector<5x32xf32> to vector<5x16xf32>
    %421 = arith.truncf %420 : vector<5x16xf32> to vector<5x16xbf16>
    %422 = vector.extract_strided_slice %396 {offsets = [0, 16], sizes = [5, 16], strides = [1, 1]} : vector<5x32xf32> to vector<5x16xf32>
    %423 = arith.truncf %422 : vector<5x16xf32> to vector<5x16xbf16>
    %cst_145 = arith.constant dense<0.000000e+00> : vector<5x5xf32>
    %424 = tpu.matmul %419, %421, %cst_145 {dimension_numbers = #tpu.dot_dimension_numbers<[1], [1], [0], [0], [0, 0, 1, 0], [], []>} : vector<5x16xbf16>, vector<5x16xbf16>, vector<5x5xf32> -> vector<5x5xf32>
    %cst_146 = arith.constant 2.500000e-01 : f32
    %425 = vector.broadcast %cst_146 : f32 to vector<5x5xf32>
    %426 = arith.mulf %424, %425 : vector<5x5xf32>
    %cst_147 = arith.constant dense<0xFF800000> : vector<5xf32>
    %427 = vector.multi_reduction <maximumf>, %426, %cst_147 [1] : vector<5x5xf32> to vector<5xf32>
    %428 = vector.shape_cast %427 : vector<5xf32> to vector<5x1xf32>
    %429 = vector.broadcast %428 : vector<5x1xf32> to vector<5x5xf32>
    %430 = arith.subf %426, %429 : vector<5x5xf32>
    %431 = math.exp %430 : vector<5x5xf32>
    %cst_148 = arith.constant dense<0.000000e+00> : vector<5xf32>
    %432 = vector.multi_reduction <add>, %431, %cst_148 [1] : vector<5x5xf32> to vector<5xf32>
    %433 = vector.shape_cast %432 : vector<5xf32> to vector<5x1xf32>
    %434 = tpu.reciprocal %433 {approx = true} : vector<5x1xf32> -> vector<5x1xf32>
    %435 = vector.broadcast %434 : vector<5x1xf32> to vector<5x5xf32>
    %436 = arith.mulf %431, %435 : vector<5x5xf32>
    %437 = arith.truncf %436 : vector<5x5xf32> to vector<5x5xbf16>
    %cst_149 = arith.constant dense<0.000000e+00> : vector<5x16xf32>
    %438 = tpu.matmul %437, %423, %cst_149 {dimension_numbers = #tpu.dot_dimension_numbers<[1], [0], [0], [1], [0, 0, 1, 1], [], []>} : vector<5x5xbf16>, vector<5x16xbf16>, vector<5x16xf32> -> vector<5x16xf32>
    %439 = tpu.concatenate %417, %438 in 1 : vector<5x16xf32>, vector<5x16xf32> -> vector<5x32xf32>
    %440 = tpu.concatenate %393, %439 in 0 : vector<5x32xf32>, vector<5x32xf32> -> vector<10x32xf32>
    %c1_150 = arith.constant 1 : index
    %c0_151 = arith.constant 0 : index
    %c0_152 = arith.constant 0 : index
    %441 = vector.load %arg4[%c1_150, %c0_151, %c0_152] : memref<2x32x32xbf16, #tpu.memory_space<vmem>>, vector<1x32x32xbf16>
    %442 = vector.shape_cast %441 : vector<1x32x32xbf16> to vector<32x32xbf16>
    %c1_153 = arith.constant 1 : index
    %c0_154 = arith.constant 0 : index
    %c0_155 = arith.constant 0 : index
    %443 = vector.load %arg5[%c1_153, %c0_154, %c0_155] : memref<2x1x32xf32, #tpu.memory_space<vmem>>, vector<1x1x32xf32>
    %444 = vector.shape_cast %443 : vector<1x1x32xf32> to vector<1x32xf32>
    %445 = arith.truncf %440 : vector<10x32xf32> to vector<10x32xbf16>
    %cst_156 = arith.constant dense<0.000000e+00> : vector<10x32xf32>
    %446 = tpu.matmul %445, %442, %cst_156 {dimension_numbers = #tpu.dot_dimension_numbers<[1], [0], [0], [1], [0, 0, 1, 1], [], []>} : vector<10x32xbf16>, vector<32x32xbf16>, vector<10x32xf32> -> vector<10x32xf32>
    %447 = vector.broadcast %444 : vector<1x32xf32> to vector<10x32xf32>
    %448 = arith.addf %446, %447 : vector<10x32xf32>
    %449 = arith.addf %332, %448 : vector<10x32xf32>
    %450 = vector.extract_strided_slice %334 {offsets = [0, 0], sizes = [1, 32], strides = [1, 1]} : vector<3x32xf32> to vector<1x32xf32>
    %451 = vector.extract_strided_slice %336 {offsets = [0, 0], sizes = [1, 32], strides = [1, 1]} : vector<3x32xf32> to vector<1x32xf32>
    %cst_157 = arith.constant dense<0.000000e+00> : vector<10xf32>
    %452 = vector.multi_reduction <add>, %449, %cst_157 [1] : vector<10x32xf32> to vector<10xf32>
    %453 = vector.shape_cast %452 : vector<10xf32> to vector<10x1xf32>
    %cst_158 = arith.constant 3.200000e+01 : f32
    %454 = vector.broadcast %cst_158 : f32 to vector<10x1xf32>
    %455 = arith.divf %453, %454 : vector<10x1xf32>
    %456 = vector.broadcast %455 : vector<10x1xf32> to vector<10x32xf32>
    %457 = arith.subf %449, %456 : vector<10x32xf32>
    %458 = arith.mulf %457, %457 : vector<10x32xf32>
    %cst_159 = arith.constant dense<0.000000e+00> : vector<10xf32>
    %459 = vector.multi_reduction <add>, %458, %cst_159 [1] : vector<10x32xf32> to vector<10xf32>
    %460 = vector.shape_cast %459 : vector<10xf32> to vector<10x1xf32>
    %cst_160 = arith.constant 3.200000e+01 : f32
    %461 = vector.broadcast %cst_160 : f32 to vector<10x1xf32>
    %462 = arith.divf %460, %461 : vector<10x1xf32>
    %463 = vector.broadcast %455 : vector<10x1xf32> to vector<10x32xf32>
    %464 = arith.subf %449, %463 : vector<10x32xf32>
    %cst_161 = arith.constant 9.99999974E-6 : f32
    %465 = vector.broadcast %cst_161 : f32 to vector<10x1xf32>
    %466 = arith.addf %462, %465 : vector<10x1xf32>
    %467 = math.rsqrt %466 : vector<10x1xf32>
    %468 = vector.broadcast %467 : vector<10x1xf32> to vector<10x32xf32>
    %469 = arith.mulf %464, %468 : vector<10x32xf32>
    %470 = vector.broadcast %450 : vector<1x32xf32> to vector<10x32xf32>
    %471 = arith.mulf %469, %470 : vector<10x32xf32>
    %472 = vector.broadcast %451 : vector<1x32xf32> to vector<10x32xf32>
    %473 = arith.addf %471, %472 : vector<10x32xf32>
    %c1_162 = arith.constant 1 : index
    %c0_163 = arith.constant 0 : index
    %c0_164 = arith.constant 0 : index
    %474 = vector.load %arg6[%c1_162, %c0_163, %c0_164] : memref<2x32x32xbf16, #tpu.memory_space<vmem>>, vector<1x32x32xbf16>
    %475 = vector.shape_cast %474 : vector<1x32x32xbf16> to vector<32x32xbf16>
    %c1_165 = arith.constant 1 : index
    %c0_166 = arith.constant 0 : index
    %c0_167 = arith.constant 0 : index
    %476 = vector.load %arg7[%c1_165, %c0_166, %c0_167] : memref<2x1x32xf32, #tpu.memory_space<vmem>>, vector<1x1x32xf32>
    %477 = vector.shape_cast %476 : vector<1x1x32xf32> to vector<1x32xf32>
    %478 = arith.truncf %473 : vector<10x32xf32> to vector<10x32xbf16>
    %cst_168 = arith.constant dense<0.000000e+00> : vector<10x32xf32>
    %479 = tpu.matmul %478, %475, %cst_168 {dimension_numbers = #tpu.dot_dimension_numbers<[1], [0], [0], [1], [0, 0, 1, 1], [], []>} : vector<10x32xbf16>, vector<32x32xbf16>, vector<10x32xf32> -> vector<10x32xf32>
    %480 = vector.broadcast %477 : vector<1x32xf32> to vector<10x32xf32>
    %481 = arith.addf %479, %480 : vector<10x32xf32>
    %c1_169 = arith.constant 1 : index
    %c0_170 = arith.constant 0 : index
    %c0_171 = arith.constant 0 : index
    %482 = vector.load %arg8[%c1_169, %c0_170, %c0_171] : memref<2x32x64xbf16, #tpu.memory_space<vmem>>, vector<1x32x64xbf16>
    %483 = vector.shape_cast %482 : vector<1x32x64xbf16> to vector<32x64xbf16>
    %c1_172 = arith.constant 1 : index
    %c0_173 = arith.constant 0 : index
    %c0_174 = arith.constant 0 : index
    %484 = vector.load %arg9[%c1_172, %c0_173, %c0_174] : memref<2x1x64xf32, #tpu.memory_space<vmem>>, vector<1x1x64xf32>
    %485 = vector.shape_cast %484 : vector<1x1x64xf32> to vector<1x64xf32>
    %cst_175 = arith.constant dense<0.000000e+00> : vector<16x64xf32>
    %486 = tpu.matmul %0, %483, %cst_175 {dimension_numbers = #tpu.dot_dimension_numbers<[1], [0], [0], [1], [0, 0, 1, 1], [], []>} : vector<16x32xbf16>, vector<32x64xbf16>, vector<16x64xf32> -> vector<16x64xf32>
    %487 = vector.broadcast %485 : vector<1x64xf32> to vector<16x64xf32>
    %488 = arith.addf %486, %487 : vector<16x64xf32>
    %489 = vector.extract_strided_slice %488 {offsets = [0, 0], sizes = [16, 32], strides = [1, 1]} : vector<16x64xf32> to vector<16x32xf32>
    %490 = vector.extract_strided_slice %488 {offsets = [0, 32], sizes = [16, 32], strides = [1, 1]} : vector<16x64xf32> to vector<16x32xf32>
    %491 = vector.extract_strided_slice %481 {offsets = [0, 0], sizes = [5, 32], strides = [1, 1]} : vector<10x32xf32> to vector<5x32xf32>
    %492 = vector.extract_strided_slice %489 {offsets = [0, 0], sizes = [8, 32], strides = [1, 1]} : vector<16x32xf32> to vector<8x32xf32>
    %493 = vector.extract_strided_slice %490 {offsets = [0, 0], sizes = [8, 32], strides = [1, 1]} : vector<16x32xf32> to vector<8x32xf32>
    %494 = vector.extract_strided_slice %491 {offsets = [0, 0], sizes = [5, 16], strides = [1, 1]} : vector<5x32xf32> to vector<5x16xf32>
    %495 = arith.truncf %494 : vector<5x16xf32> to vector<5x16xbf16>
    %496 = vector.extract_strided_slice %492 {offsets = [0, 0], sizes = [8, 16], strides = [1, 1]} : vector<8x32xf32> to vector<8x16xf32>
    %497 = arith.truncf %496 : vector<8x16xf32> to vector<8x16xbf16>
    %498 = vector.extract_strided_slice %493 {offsets = [0, 0], sizes = [8, 16], strides = [1, 1]} : vector<8x32xf32> to vector<8x16xf32>
    %499 = arith.truncf %498 : vector<8x16xf32> to vector<8x16xbf16>
    %cst_176 = arith.constant dense<0.000000e+00> : vector<5x8xf32>
    %500 = tpu.matmul %495, %497, %cst_176 {dimension_numbers = #tpu.dot_dimension_numbers<[1], [1], [0], [0], [0, 0, 1, 0], [], []>} : vector<5x16xbf16>, vector<8x16xbf16>, vector<5x8xf32> -> vector<5x8xf32>
    %cst_177 = arith.constant 2.500000e-01 : f32
    %501 = vector.broadcast %cst_177 : f32 to vector<5x8xf32>
    %502 = arith.mulf %500, %501 : vector<5x8xf32>
    %cst_178 = arith.constant dense<0xFF800000> : vector<5xf32>
    %503 = vector.multi_reduction <maximumf>, %502, %cst_178 [1] : vector<5x8xf32> to vector<5xf32>
    %504 = vector.shape_cast %503 : vector<5xf32> to vector<5x1xf32>
    %505 = vector.broadcast %504 : vector<5x1xf32> to vector<5x8xf32>
    %506 = arith.subf %502, %505 : vector<5x8xf32>
    %507 = math.exp %506 : vector<5x8xf32>
    %cst_179 = arith.constant dense<0.000000e+00> : vector<5xf32>
    %508 = vector.multi_reduction <add>, %507, %cst_179 [1] : vector<5x8xf32> to vector<5xf32>
    %509 = vector.shape_cast %508 : vector<5xf32> to vector<5x1xf32>
    %510 = tpu.reciprocal %509 {approx = true} : vector<5x1xf32> -> vector<5x1xf32>
    %511 = vector.broadcast %510 : vector<5x1xf32> to vector<5x8xf32>
    %512 = arith.mulf %507, %511 : vector<5x8xf32>
    %513 = arith.truncf %512 : vector<5x8xf32> to vector<5x8xbf16>
    %cst_180 = arith.constant dense<0.000000e+00> : vector<5x16xf32>
    %514 = tpu.matmul %513, %499, %cst_180 {dimension_numbers = #tpu.dot_dimension_numbers<[1], [0], [0], [1], [0, 0, 1, 1], [], []>} : vector<5x8xbf16>, vector<8x16xbf16>, vector<5x16xf32> -> vector<5x16xf32>
    %515 = vector.extract_strided_slice %491 {offsets = [0, 16], sizes = [5, 16], strides = [1, 1]} : vector<5x32xf32> to vector<5x16xf32>
    %516 = arith.truncf %515 : vector<5x16xf32> to vector<5x16xbf16>
    %517 = vector.extract_strided_slice %492 {offsets = [0, 16], sizes = [8, 16], strides = [1, 1]} : vector<8x32xf32> to vector<8x16xf32>
    %518 = arith.truncf %517 : vector<8x16xf32> to vector<8x16xbf16>
    %519 = vector.extract_strided_slice %493 {offsets = [0, 16], sizes = [8, 16], strides = [1, 1]} : vector<8x32xf32> to vector<8x16xf32>
    %520 = arith.truncf %519 : vector<8x16xf32> to vector<8x16xbf16>
    %cst_181 = arith.constant dense<0.000000e+00> : vector<5x8xf32>
    %521 = tpu.matmul %516, %518, %cst_181 {dimension_numbers = #tpu.dot_dimension_numbers<[1], [1], [0], [0], [0, 0, 1, 0], [], []>} : vector<5x16xbf16>, vector<8x16xbf16>, vector<5x8xf32> -> vector<5x8xf32>
    %cst_182 = arith.constant 2.500000e-01 : f32
    %522 = vector.broadcast %cst_182 : f32 to vector<5x8xf32>
    %523 = arith.mulf %521, %522 : vector<5x8xf32>
    %cst_183 = arith.constant dense<0xFF800000> : vector<5xf32>
    %524 = vector.multi_reduction <maximumf>, %523, %cst_183 [1] : vector<5x8xf32> to vector<5xf32>
    %525 = vector.shape_cast %524 : vector<5xf32> to vector<5x1xf32>
    %526 = vector.broadcast %525 : vector<5x1xf32> to vector<5x8xf32>
    %527 = arith.subf %523, %526 : vector<5x8xf32>
    %528 = math.exp %527 : vector<5x8xf32>
    %cst_184 = arith.constant dense<0.000000e+00> : vector<5xf32>
    %529 = vector.multi_reduction <add>, %528, %cst_184 [1] : vector<5x8xf32> to vector<5xf32>
    %530 = vector.shape_cast %529 : vector<5xf32> to vector<5x1xf32>
    %531 = tpu.reciprocal %530 {approx = true} : vector<5x1xf32> -> vector<5x1xf32>
    %532 = vector.broadcast %531 : vector<5x1xf32> to vector<5x8xf32>
    %533 = arith.mulf %528, %532 : vector<5x8xf32>
    %534 = arith.truncf %533 : vector<5x8xf32> to vector<5x8xbf16>
    %cst_185 = arith.constant dense<0.000000e+00> : vector<5x16xf32>
    %535 = tpu.matmul %534, %520, %cst_185 {dimension_numbers = #tpu.dot_dimension_numbers<[1], [0], [0], [1], [0, 0, 1, 1], [], []>} : vector<5x8xbf16>, vector<8x16xbf16>, vector<5x16xf32> -> vector<5x16xf32>
    %536 = tpu.concatenate %514, %535 in 1 : vector<5x16xf32>, vector<5x16xf32> -> vector<5x32xf32>
    %537 = vector.extract_strided_slice %481 {offsets = [5, 0], sizes = [5, 32], strides = [1, 1]} : vector<10x32xf32> to vector<5x32xf32>
    %538 = vector.extract_strided_slice %489 {offsets = [8, 0], sizes = [8, 32], strides = [1, 1]} : vector<16x32xf32> to vector<8x32xf32>
    %539 = vector.extract_strided_slice %490 {offsets = [8, 0], sizes = [8, 32], strides = [1, 1]} : vector<16x32xf32> to vector<8x32xf32>
    %540 = vector.extract_strided_slice %537 {offsets = [0, 0], sizes = [5, 16], strides = [1, 1]} : vector<5x32xf32> to vector<5x16xf32>
    %541 = arith.truncf %540 : vector<5x16xf32> to vector<5x16xbf16>
    %542 = vector.extract_strided_slice %538 {offsets = [0, 0], sizes = [8, 16], strides = [1, 1]} : vector<8x32xf32> to vector<8x16xf32>
    %543 = arith.truncf %542 : vector<8x16xf32> to vector<8x16xbf16>
    %544 = vector.extract_strided_slice %539 {offsets = [0, 0], sizes = [8, 16], strides = [1, 1]} : vector<8x32xf32> to vector<8x16xf32>
    %545 = arith.truncf %544 : vector<8x16xf32> to vector<8x16xbf16>
    %cst_186 = arith.constant dense<0.000000e+00> : vector<5x8xf32>
    %546 = tpu.matmul %541, %543, %cst_186 {dimension_numbers = #tpu.dot_dimension_numbers<[1], [1], [0], [0], [0, 0, 1, 0], [], []>} : vector<5x16xbf16>, vector<8x16xbf16>, vector<5x8xf32> -> vector<5x8xf32>
    %cst_187 = arith.constant 2.500000e-01 : f32
    %547 = vector.broadcast %cst_187 : f32 to vector<5x8xf32>
    %548 = arith.mulf %546, %547 : vector<5x8xf32>
    %cst_188 = arith.constant dense<0xFF800000> : vector<5xf32>
    %549 = vector.multi_reduction <maximumf>, %548, %cst_188 [1] : vector<5x8xf32> to vector<5xf32>
    %550 = vector.shape_cast %549 : vector<5xf32> to vector<5x1xf32>
    %551 = vector.broadcast %550 : vector<5x1xf32> to vector<5x8xf32>
    %552 = arith.subf %548, %551 : vector<5x8xf32>
    %553 = math.exp %552 : vector<5x8xf32>
    %cst_189 = arith.constant dense<0.000000e+00> : vector<5xf32>
    %554 = vector.multi_reduction <add>, %553, %cst_189 [1] : vector<5x8xf32> to vector<5xf32>
    %555 = vector.shape_cast %554 : vector<5xf32> to vector<5x1xf32>
    %556 = tpu.reciprocal %555 {approx = true} : vector<5x1xf32> -> vector<5x1xf32>
    %557 = vector.broadcast %556 : vector<5x1xf32> to vector<5x8xf32>
    %558 = arith.mulf %553, %557 : vector<5x8xf32>
    %559 = arith.truncf %558 : vector<5x8xf32> to vector<5x8xbf16>
    %cst_190 = arith.constant dense<0.000000e+00> : vector<5x16xf32>
    %560 = tpu.matmul %559, %545, %cst_190 {dimension_numbers = #tpu.dot_dimension_numbers<[1], [0], [0], [1], [0, 0, 1, 1], [], []>} : vector<5x8xbf16>, vector<8x16xbf16>, vector<5x16xf32> -> vector<5x16xf32>
    %561 = vector.extract_strided_slice %537 {offsets = [0, 16], sizes = [5, 16], strides = [1, 1]} : vector<5x32xf32> to vector<5x16xf32>
    %562 = arith.truncf %561 : vector<5x16xf32> to vector<5x16xbf16>
    %563 = vector.extract_strided_slice %538 {offsets = [0, 16], sizes = [8, 16], strides = [1, 1]} : vector<8x32xf32> to vector<8x16xf32>
    %564 = arith.truncf %563 : vector<8x16xf32> to vector<8x16xbf16>
    %565 = vector.extract_strided_slice %539 {offsets = [0, 16], sizes = [8, 16], strides = [1, 1]} : vector<8x32xf32> to vector<8x16xf32>
    %566 = arith.truncf %565 : vector<8x16xf32> to vector<8x16xbf16>
    %cst_191 = arith.constant dense<0.000000e+00> : vector<5x8xf32>
    %567 = tpu.matmul %562, %564, %cst_191 {dimension_numbers = #tpu.dot_dimension_numbers<[1], [1], [0], [0], [0, 0, 1, 0], [], []>} : vector<5x16xbf16>, vector<8x16xbf16>, vector<5x8xf32> -> vector<5x8xf32>
    %cst_192 = arith.constant 2.500000e-01 : f32
    %568 = vector.broadcast %cst_192 : f32 to vector<5x8xf32>
    %569 = arith.mulf %567, %568 : vector<5x8xf32>
    %cst_193 = arith.constant dense<0xFF800000> : vector<5xf32>
    %570 = vector.multi_reduction <maximumf>, %569, %cst_193 [1] : vector<5x8xf32> to vector<5xf32>
    %571 = vector.shape_cast %570 : vector<5xf32> to vector<5x1xf32>
    %572 = vector.broadcast %571 : vector<5x1xf32> to vector<5x8xf32>
    %573 = arith.subf %569, %572 : vector<5x8xf32>
    %574 = math.exp %573 : vector<5x8xf32>
    %cst_194 = arith.constant dense<0.000000e+00> : vector<5xf32>
    %575 = vector.multi_reduction <add>, %574, %cst_194 [1] : vector<5x8xf32> to vector<5xf32>
    %576 = vector.shape_cast %575 : vector<5xf32> to vector<5x1xf32>
    %577 = tpu.reciprocal %576 {approx = true} : vector<5x1xf32> -> vector<5x1xf32>
    %578 = vector.broadcast %577 : vector<5x1xf32> to vector<5x8xf32>
    %579 = arith.mulf %574, %578 : vector<5x8xf32>
    %580 = arith.truncf %579 : vector<5x8xf32> to vector<5x8xbf16>
    %cst_195 = arith.constant dense<0.000000e+00> : vector<5x16xf32>
    %581 = tpu.matmul %580, %566, %cst_195 {dimension_numbers = #tpu.dot_dimension_numbers<[1], [0], [0], [1], [0, 0, 1, 1], [], []>} : vector<5x8xbf16>, vector<8x16xbf16>, vector<5x16xf32> -> vector<5x16xf32>
    %582 = tpu.concatenate %560, %581 in 1 : vector<5x16xf32>, vector<5x16xf32> -> vector<5x32xf32>
    %583 = tpu.concatenate %536, %582 in 0 : vector<5x32xf32>, vector<5x32xf32> -> vector<10x32xf32>
    %c1_196 = arith.constant 1 : index
    %c0_197 = arith.constant 0 : index
    %c0_198 = arith.constant 0 : index
    %584 = vector.load %arg10[%c1_196, %c0_197, %c0_198] : memref<2x32x32xbf16, #tpu.memory_space<vmem>>, vector<1x32x32xbf16>
    %585 = vector.shape_cast %584 : vector<1x32x32xbf16> to vector<32x32xbf16>
    %c1_199 = arith.constant 1 : index
    %c0_200 = arith.constant 0 : index
    %c0_201 = arith.constant 0 : index
    %586 = vector.load %arg11[%c1_199, %c0_200, %c0_201] : memref<2x1x32xf32, #tpu.memory_space<vmem>>, vector<1x1x32xf32>
    %587 = vector.shape_cast %586 : vector<1x1x32xf32> to vector<1x32xf32>
    %588 = arith.truncf %583 : vector<10x32xf32> to vector<10x32xbf16>
    %cst_202 = arith.constant dense<0.000000e+00> : vector<10x32xf32>
    %589 = tpu.matmul %588, %585, %cst_202 {dimension_numbers = #tpu.dot_dimension_numbers<[1], [0], [0], [1], [0, 0, 1, 1], [], []>} : vector<10x32xbf16>, vector<32x32xbf16>, vector<10x32xf32> -> vector<10x32xf32>
    %590 = vector.broadcast %587 : vector<1x32xf32> to vector<10x32xf32>
    %591 = arith.addf %589, %590 : vector<10x32xf32>
    %592 = arith.addf %473, %591 : vector<10x32xf32>
    %593 = vector.extract_strided_slice %334 {offsets = [1, 0], sizes = [1, 32], strides = [1, 1]} : vector<3x32xf32> to vector<1x32xf32>
    %594 = vector.extract_strided_slice %336 {offsets = [1, 0], sizes = [1, 32], strides = [1, 1]} : vector<3x32xf32> to vector<1x32xf32>
    %cst_203 = arith.constant dense<0.000000e+00> : vector<10xf32>
    %595 = vector.multi_reduction <add>, %592, %cst_203 [1] : vector<10x32xf32> to vector<10xf32>
    %596 = vector.shape_cast %595 : vector<10xf32> to vector<10x1xf32>
    %cst_204 = arith.constant 3.200000e+01 : f32
    %597 = vector.broadcast %cst_204 : f32 to vector<10x1xf32>
    %598 = arith.divf %596, %597 : vector<10x1xf32>
    %599 = vector.broadcast %598 : vector<10x1xf32> to vector<10x32xf32>
    %600 = arith.subf %592, %599 : vector<10x32xf32>
    %601 = arith.mulf %600, %600 : vector<10x32xf32>
    %cst_205 = arith.constant dense<0.000000e+00> : vector<10xf32>
    %602 = vector.multi_reduction <add>, %601, %cst_205 [1] : vector<10x32xf32> to vector<10xf32>
    %603 = vector.shape_cast %602 : vector<10xf32> to vector<10x1xf32>
    %cst_206 = arith.constant 3.200000e+01 : f32
    %604 = vector.broadcast %cst_206 : f32 to vector<10x1xf32>
    %605 = arith.divf %603, %604 : vector<10x1xf32>
    %606 = vector.broadcast %598 : vector<10x1xf32> to vector<10x32xf32>
    %607 = arith.subf %592, %606 : vector<10x32xf32>
    %cst_207 = arith.constant 9.99999974E-6 : f32
    %608 = vector.broadcast %cst_207 : f32 to vector<10x1xf32>
    %609 = arith.addf %605, %608 : vector<10x1xf32>
    %610 = math.rsqrt %609 : vector<10x1xf32>
    %611 = vector.broadcast %610 : vector<10x1xf32> to vector<10x32xf32>
    %612 = arith.mulf %607, %611 : vector<10x32xf32>
    %613 = vector.broadcast %593 : vector<1x32xf32> to vector<10x32xf32>
    %614 = arith.mulf %612, %613 : vector<10x32xf32>
    %615 = vector.broadcast %594 : vector<1x32xf32> to vector<10x32xf32>
    %616 = arith.addf %614, %615 : vector<10x32xf32>
    %c1_208 = arith.constant 1 : index
    %c0_209 = arith.constant 0 : index
    %c0_210 = arith.constant 0 : index
    %617 = vector.load %arg12[%c1_208, %c0_209, %c0_210] : memref<2x32x64xbf16, #tpu.memory_space<vmem>>, vector<1x32x64xbf16>
    %618 = vector.shape_cast %617 : vector<1x32x64xbf16> to vector<32x64xbf16>
    %c1_211 = arith.constant 1 : index
    %c0_212 = arith.constant 0 : index
    %c0_213 = arith.constant 0 : index
    %619 = vector.load %arg13[%c1_211, %c0_212, %c0_213] : memref<2x1x64xf32, #tpu.memory_space<vmem>>, vector<1x1x64xf32>
    %620 = vector.shape_cast %619 : vector<1x1x64xf32> to vector<1x64xf32>
    %621 = arith.truncf %616 : vector<10x32xf32> to vector<10x32xbf16>
    %cst_214 = arith.constant dense<0.000000e+00> : vector<10x64xf32>
    %622 = tpu.matmul %621, %618, %cst_214 {dimension_numbers = #tpu.dot_dimension_numbers<[1], [0], [0], [1], [0, 0, 1, 1], [], []>} : vector<10x32xbf16>, vector<32x64xbf16>, vector<10x64xf32> -> vector<10x64xf32>
    %623 = vector.broadcast %620 : vector<1x64xf32> to vector<10x64xf32>
    %624 = arith.addf %622, %623 : vector<10x64xf32>
    %cst_215 = arith.constant 0.000000e+00 : f32
    %625 = vector.broadcast %cst_215 : f32 to vector<10x64xf32>
    %626 = arith.maximumf %624, %625 : vector<10x64xf32>
    %c1_216 = arith.constant 1 : index
    %c0_217 = arith.constant 0 : index
    %c0_218 = arith.constant 0 : index
    %627 = vector.load %arg14[%c1_216, %c0_217, %c0_218] : memref<2x64x32xbf16, #tpu.memory_space<vmem>>, vector<1x64x32xbf16>
    %628 = vector.shape_cast %627 : vector<1x64x32xbf16> to vector<64x32xbf16>
    %c1_219 = arith.constant 1 : index
    %c0_220 = arith.constant 0 : index
    %c0_221 = arith.constant 0 : index
    %629 = vector.load %arg15[%c1_219, %c0_220, %c0_221] : memref<2x1x32xf32, #tpu.memory_space<vmem>>, vector<1x1x32xf32>
    %630 = vector.shape_cast %629 : vector<1x1x32xf32> to vector<1x32xf32>
    %631 = arith.truncf %626 : vector<10x64xf32> to vector<10x64xbf16>
    %cst_222 = arith.constant dense<0.000000e+00> : vector<10x32xf32>
    %632 = tpu.matmul %631, %628, %cst_222 {dimension_numbers = #tpu.dot_dimension_numbers<[1], [0], [0], [1], [0, 0, 1, 1], [], []>} : vector<10x64xbf16>, vector<64x32xbf16>, vector<10x32xf32> -> vector<10x32xf32>
    %633 = vector.broadcast %630 : vector<1x32xf32> to vector<10x32xf32>
    %634 = arith.addf %632, %633 : vector<10x32xf32>
    %635 = arith.addf %616, %634 : vector<10x32xf32>
    %636 = vector.extract_strided_slice %334 {offsets = [2, 0], sizes = [1, 32], strides = [1, 1]} : vector<3x32xf32> to vector<1x32xf32>
    %637 = vector.extract_strided_slice %336 {offsets = [2, 0], sizes = [1, 32], strides = [1, 1]} : vector<3x32xf32> to vector<1x32xf32>
    %cst_223 = arith.constant dense<0.000000e+00> : vector<10xf32>
    %638 = vector.multi_reduction <add>, %635, %cst_223 [1] : vector<10x32xf32> to vector<10xf32>
    %639 = vector.shape_cast %638 : vector<10xf32> to vector<10x1xf32>
    %cst_224 = arith.constant 3.200000e+01 : f32
    %640 = vector.broadcast %cst_224 : f32 to vector<10x1xf32>
    %641 = arith.divf %639, %640 : vector<10x1xf32>
    %642 = vector.broadcast %641 : vector<10x1xf32> to vector<10x32xf32>
    %643 = arith.subf %635, %642 : vector<10x32xf32>
    %644 = arith.mulf %643, %643 : vector<10x32xf32>
    %cst_225 = arith.constant dense<0.000000e+00> : vector<10xf32>
    %645 = vector.multi_reduction <add>, %644, %cst_225 [1] : vector<10x32xf32> to vector<10xf32>
    %646 = vector.shape_cast %645 : vector<10xf32> to vector<10x1xf32>
    %cst_226 = arith.constant 3.200000e+01 : f32
    %647 = vector.broadcast %cst_226 : f32 to vector<10x1xf32>
    %648 = arith.divf %646, %647 : vector<10x1xf32>
    %649 = vector.broadcast %641 : vector<10x1xf32> to vector<10x32xf32>
    %650 = arith.subf %635, %649 : vector<10x32xf32>
    %cst_227 = arith.constant 9.99999974E-6 : f32
    %651 = vector.broadcast %cst_227 : f32 to vector<10x1xf32>
    %652 = arith.addf %648, %651 : vector<10x1xf32>
    %653 = math.rsqrt %652 : vector<10x1xf32>
    %654 = vector.broadcast %653 : vector<10x1xf32> to vector<10x32xf32>
    %655 = arith.mulf %650, %654 : vector<10x32xf32>
    %656 = vector.broadcast %636 : vector<1x32xf32> to vector<10x32xf32>
    %657 = arith.mulf %655, %656 : vector<10x32xf32>
    %658 = vector.broadcast %637 : vector<1x32xf32> to vector<10x32xf32>
    %659 = arith.addf %657, %658 : vector<10x32xf32>
    %660 = vector.extract_strided_slice %659 {offsets = [0, 0], sizes = [1, 32], strides = [1, 1]} : vector<10x32xf32> to vector<1x32xf32>
    %661 = vector.extract_strided_slice %659 {offsets = [5, 0], sizes = [1, 32], strides = [1, 1]} : vector<10x32xf32> to vector<1x32xf32>
    %662 = tpu.concatenate %660, %661 in 0 : vector<1x32xf32>, vector<1x32xf32> -> vector<2x32xf32>
    %c0_228 = arith.constant 0 : index
    %c0_229 = arith.constant 0 : index
    %663 = vector.load %arg18[%c0_228, %c0_229] : memref<32x64xbf16, #tpu.memory_space<vmem>>, vector<32x64xbf16>
    %c0_230 = arith.constant 0 : index
    %c0_231 = arith.constant 0 : index
    %664 = vector.load %arg19[%c0_230, %c0_231] : memref<1x64xf32, #tpu.memory_space<vmem>>, vector<1x64xf32>
    %665 = arith.truncf %662 : vector<2x32xf32> to vector<2x32xbf16>
    %cst_232 = arith.constant dense<0.000000e+00> : vector<2x64xf32>
    %666 = tpu.matmul %665, %663, %cst_232 {dimension_numbers = #tpu.dot_dimension_numbers<[1], [0], [0], [1], [0, 0, 1, 1], [], []>} : vector<2x32xbf16>, vector<32x64xbf16>, vector<2x64xf32> -> vector<2x64xf32>
    %667 = vector.broadcast %664 : vector<1x64xf32> to vector<2x64xf32>
    %668 = arith.addf %666, %667 : vector<2x64xf32>
    %cst_233 = arith.constant 0.000000e+00 : f32
    %669 = vector.broadcast %cst_233 : f32 to vector<2x64xf32>
    %670 = arith.cmpf ogt, %668, %669 : vector<2x64xf32>
    %cst_234 = arith.constant 0.00999999977 : f32
    %671 = vector.broadcast %cst_234 : f32 to vector<2x64xf32>
    %672 = arith.mulf %671, %668 : vector<2x64xf32>
    %673 = arith.select %670, %668, %672 : vector<2x64xi1>, vector<2x64xf32>
    %c0_235 = arith.constant 0 : index
    %c0_236 = arith.constant 0 : index
    %674 = vector.load %arg20[%c0_235, %c0_236] : memref<64x128xbf16, #tpu.memory_space<vmem>>, vector<64x128xbf16>
    %c0_237 = arith.constant 0 : index
    %c0_238 = arith.constant 0 : index
    %675 = vector.load %arg21[%c0_237, %c0_238] : memref<1x128xf32, #tpu.memory_space<vmem>>, vector<1x128xf32>
    %676 = arith.truncf %673 : vector<2x64xf32> to vector<2x64xbf16>
    %cst_239 = arith.constant dense<0.000000e+00> : vector<2x128xf32>
    %677 = tpu.matmul %676, %674, %cst_239 {dimension_numbers = #tpu.dot_dimension_numbers<[1], [0], [0], [1], [0, 0, 1, 1], [], []>} : vector<2x64xbf16>, vector<64x128xbf16>, vector<2x128xf32> -> vector<2x128xf32>
    %678 = vector.broadcast %675 : vector<1x128xf32> to vector<2x128xf32>
    %679 = arith.addf %677, %678 : vector<2x128xf32>
    %c0_240 = arith.constant 0 : index
    %c0_241 = arith.constant 0 : index
    %680 = vector.load %arg23[%c0_240, %c0_241] : memref<2x128xf32, #tpu.memory_space<vmem>>, vector<2x128xf32>
    tpu.vector_store %arg23[%c0_240, %c0_241], %679 {strides = array<i32>} : memref<2x128xf32, #tpu.memory_space<vmem>>, vector<2x128xf32>,
    return
  }
}

</mosaic_0001>

<bundles_post_ra>
// kernel: my_model_forward.1
= control target key start
LH: loop header
LB: loop body
LE: loop exit
PB: predicated region body
PF: predicated region fallthrough
CT: control target
= control target key end

     0   :  { %s5412_s0 = inlined_call_operand.vmem [shape: bf16[16,32], index: 0, kind: input, shape index: {}]   ;;  %s5413_s1 = inlined_call_operand.vmem [shape: f32[5,32], index: 1, kind: input, shape index: {}]   ;;  %s5414_s2 = inlined_call_operand.vmem [shape: bf16[2,32,96], index: 2, kind: input, shape index: {}]   ;;  %s5415_s3 = inlined_call_operand.vmem [shape: f32[2,1,96], index: 3, kind: input, shape index: {}]   ;;  %s5416_s4 = inlined_call_operand.vmem [shape: bf16[2,32,32], index: 4, kind: input, shape index: {}]   ;;  %s5417_s5 = inlined_call_operand.vmem [shape: f32[2,1,32], index: 5, kind: input, shape index: {}]   ;;  %s5418_s6 = inlined_call_operand.vmem [shape: bf16[2,32,32], index: 6, kind: input, shape index: {}]   ;;  %s5419_s7 = inlined_call_operand.hbm [shape: f32[2,1,32], index: 7, kind: input, shape index: {}]   ;;  %s5420_s8 = inlined_call_operand.vmem [shape: bf16[2,32,64], index: 8, kind: input, shape index: {}]   ;;  %s5421_s9 = inlined_call_operand.hbm [shape: f32[2,1,64], index: 9, kind: input, shape index: {}]   ;;  %s5422_s10 = inlined_call_operand.hbm [shape: bf16[2,32,32], index: 10, kind: input, shape index: {}]   ;;  %s5423_s11 = inlined_call_operand.hbm [shape: f32[2,1,32], index: 11, kind: input, shape index: {}]   ;;  %s5424_s12 = inlined_call_operand.hbm [shape: bf16[2,32,64], index: 12, kind: input, shape index: {}]   ;;  %s5425_s13 = inlined_call_operand.hbm [shape: f32[2,1,64], index: 13, kind: input, shape index: {}]   ;;  %s5426_s14 = inlined_call_operand.vmem [shape: bf16[2,64,32], index: 14, kind: input, shape index: {}]   ;;  %s5427_s15 = inlined_call_operand.hbm [shape: f32[2,1,32], index: 15, kind: input, shape index: {}]   ;;  %s5428_s16 = inlined_call_operand.vmem [shape: f32[2,3,32], index: 16, kind: input, shape index: {}]   ;;  %s5429_s17 = inlined_call_operand.vmem [shape: f32[2,3,32], index: 17, kind: input, shape index: {}]   ;;  %s5430_s18 = inlined_call_operand.hbm [shape: bf16[32,64], index: 18, kind: input, shape index: {}]   ;;  %s5431_s19 = inlined_call_operand.hbm [shape: f32[1,64], index: 19, kind: input, shape index: {}]   ;;  %s5432_s20 = inlined_call_operand.vmem [shape: bf16[64,128], index: 20, kind: input, shape index: {}]   ;;  %s5433_s21 = inlined_call_operand.hbm [shape: f32[1,128], index: 21, kind: input, shape index: {}]   ;;  %s5434_s22 = inlined_call_operand.hbm [shape: bf16[32,128], index: 22, kind: input, shape index: {}]   ;;  %s5435_s23 = inlined_call_operand.hbm [shape: f32[2,128], index: 23, kind: output, shape index: {0}]   ;;  %s5436_s24 = inlined_call_operand.vmem [shape: f32[16,128], index: 24, kind: output, shape index: {1}]  }
   0x1   :  { %5444 = sst [smem:[#allocation28_spill]] %s5412_s0 }
   0x2   :  { %5445 = sst [smem:[#allocation29_spill]] %s5413_s1 }
   0x3   :  { %5446 = sst [smem:[#allocation30_spill]] %s5414_s2 }
   0x4   :  { %5447 = sst [smem:[#allocation31_spill]] %s5415_s3 }
   0x5   :  { %5448 = sst [smem:[#allocation32_spill]] %s5416_s4 }
   0x6   :  { %5449 = sst [smem:[#allocation33_spill]] %s5417_s5 }
   0x7   :  { %5450 = sst [smem:[#allocation34_spill]] %s5418_s6 }
   0x8   :  { %5451 = sst [smem:[#allocation35_spill]] %s5419_s7 }
   0x9   :  { %5452 = sst [smem:[#allocation36_spill]] %s5420_s8 }
   0xa   :  { %30 = vsyncpa [#allocation3], 0 }
   0xb   :  { %31 = vsyncpa [#allocation6], 0 }
   0xc   :  { %32 = vsyncpa [#allocation9], 0 }
   0xd   :  { %33 = vsyncpa [#allocation12], 0 }
   0xe   :  { %34 = vsyncpa [#allocation15], 0 }
   0xf   :  { %35 = vsyncpa [#allocation18], 0 }
  0x10   :  { %36 = vsyncpa [#allocation4], 0  ;;  %s4578_s5 = smov [#allocation5]   ;;  %s4579_s27 = smov [#allocation8]  }
  0x11   :  { %s70_s26 = sshll.u32 %s4578_s5, 4  ;;  %s94_s28 = sshll.u32 %s4579_s27, 4  ;;  %s71_s26 = int_to_ptr.vmem [resolvable:$true] %s70_s26  ;;  %s95_s28 = int_to_ptr.vmem [resolvable:$true] %s94_s28 }
  0x12   :  { %s4332_s6 = scalar_lea.vmem %s71_s26, 32  ;;  %p4337_p1 = scmp.lt.s32.totalorder %s71_s26, %s71_s26 }
  0x13   :  { %p4333_p0 = scmp.ne.s32.totalorder %s71_s26, %s4332_s6  ;;  %p4338_p2 = scmp.lt.s32.totalorder %s4332_s6, %s4332_s6 }
  0x15   :  { %p4339_p3 = por %p4338_p2, %p4337_p1 }
  0x17   :  { %p4340_p4 = pnand %p4339_p3, %p4333_p0 }
  0x19   :  { %4343 = shalt.err (!%p4340_p4)
}
  0x1a   :  { %s4580_s2 = smov 16   ;;  %s4581_s29 = smov 1  }
  0x1b   :  { %76 = dma.hbm_to_vmem [thread:$0]  %s5421_s9, 32, %s71_s26, [#allocation6], %s4580_s2, %s4580_s2, %s4581_s29  }
  0x1c   :  { %s4352_s30 = scalar_lea.vmem %s95_s28, 32  ;;  %p4357_p6 = scmp.lt.s32.totalorder %s95_s28, %s95_s28 }
  0x1d   :  { %p4353_p5 = scmp.ne.s32.totalorder %s95_s28, %s4352_s30  ;;  %p4358_p7 = scmp.lt.s32.totalorder %s4352_s30, %s4352_s30 }
  0x1f   :  { %p4359_p8 = por %p4358_p7, %p4357_p6 }
  0x21   :  { %p4360_p9 = pnand %p4359_p8, %p4353_p5 }
  0x23   :  { %4363 = shalt.err (!%p4360_p9)
}
  0x24   :  { %100 = dma.hbm_to_vmem [thread:$0]  %s5423_s11, 32, %s95_s28, [#allocation9], %s4580_s2, %s4580_s2, %s4581_s29  }
  0x25   :  { %s4582_s8 = smov [#allocation11]  }
  0x26   :  { %s118_s4 = sshll.u32 %s4582_s8, 4  ;;  %s119_s4 = int_to_ptr.vmem [resolvable:$true] %s118_s4 }
  0x27   :  { %s4372_s1 = scalar_lea.vmem %s119_s4, 32  ;;  %p4377_p11 = scmp.lt.s32.totalorder %s119_s4, %s119_s4 }
  0x28   :  { %p4373_p10 = scmp.ne.s32.totalorder %s119_s4, %s4372_s1  ;;  %p4378_p12 = scmp.lt.s32.totalorder %s4372_s1, %s4372_s1 }
  0x2a   :  { %p4379_p13 = por %p4378_p12, %p4377_p11 }
  0x2c   :  { %p4380_p0 = pnand %p4379_p13, %p4373_p10 }
  0x2e   :  { %4383 = shalt.err (!%p4380_p0)
}
  0x2f   :  { %124 = dma.hbm_to_vmem [thread:$0]  %s5425_s13, 32, %s119_s4, [#allocation12], %s4580_s2, %s4580_s2, %s4581_s29  }
  0x30   :  { %s4583_s26 = smov [#allocation14]   ;;  %s4584_s11 = smov [#allocation17]  }
  0x31   :  { %s148_s27 = sshll.u32 %s4583_s26, 4  ;;  %s173_s28 = sshll.u32 %s4584_s11, 4  ;;  %s149_s27 = int_to_ptr.vmem [resolvable:$true] %s148_s27  ;;  %s174_s28 = int_to_ptr.vmem [resolvable:$true] %s173_s28 }
  0x32   :  { %s4392_s6 = scalar_lea.vmem %s149_s27, 256  ;;  %p4397_p2 = scmp.lt.s32.totalorder %s149_s27, %s149_s27 }
  0x33   :  { %p4393_p1 = scmp.ne.s32.totalorder %s149_s27, %s4392_s6  ;;  %p4398_p3 = scmp.lt.s32.totalorder %s4392_s6, %s4392_s6 }
  0x35   :  { %p4399_p4 = por %p4398_p3, %p4397_p2 }
  0x37   :  { %p4400_p5 = pnand %p4399_p4, %p4393_p1 }
  0x39   :  { %4403 = shalt.err (!%p4400_p5)
}
  0x3a   :  { %s4585_s0 = smov 64   ;;  %s4586_s7 = smov 4  }
  0x3b   :  { %154 = dma.hbm_to_vmem [thread:$0]  %s5430_s18, 256, %s149_s27, [#allocation15], %s4585_s0, %s4585_s0, %s4586_s7  }
  0x3c   :  { %s4412_s13 = scalar_lea.vmem %s174_s28, 16  ;;  %s4416_s25 = scalar_lea.vmem %s174_s28, 32 }
  0x3d   :  { %p4413_p6 = scmp.ne.s32.totalorder %s174_s28, %s4412_s13  ;;  %p4417_p7 = scmp.lt.s32.totalorder %s174_s28, %s174_s28 }
  0x3e   :  { %p4418_p8 = scmp.lt.s32.totalorder %s4416_s25, %s4412_s13 }
  0x40   :  { %p4419_p9 = por %p4418_p8, %p4417_p7 }
  0x42   :  { %p4420_p10 = pnand %p4419_p9, %p4413_p6 }
  0x44   :  { %4423 = shalt.err (!%p4420_p10)
}
  0x45   :  { %176 = dma.hbm_to_vmem [thread:$0]  %s5433_s21, 16, %s174_s28, [#allocation18]  }
  0x46   :  { %s4587_s1 = smov [#allocation2]   ;;  %s4588_s5 = smov [#allocation7]  }
  0x47   :  { %s56_s9 = sshll.u32 %s4587_s1, 4  ;;  %s82_s26 = sshll.u32 %s4588_s5, 4  ;;  %s57_s9 = int_to_ptr.vmem [resolvable:$true] %s56_s9  ;;  %s83_s26 = int_to_ptr.vmem [resolvable:$true] %s82_s26 }
  0x48   :  { %s4432_s11 = scalar_lea.vmem %s57_s9, 32  ;;  %p4437_p12 = scmp.lt.s32.totalorder %s57_s9, %s57_s9 }
  0x49   :  { %p4433_p11 = scmp.ne.s32.totalorder %s57_s9, %s4432_s11  ;;  %p4438_p13 = scmp.lt.s32.totalorder %s4432_s11, %s4432_s11 }
  0x4b   :  { %p4439_p0 = por %p4438_p13, %p4437_p12 }
  0x4d   :  { %p4440_p1 = pnand %p4439_p0, %p4433_p11 }
  0x4f   :  { %4443 = shalt.err (!%p4440_p1)
}
  0x50   :  { %s5453_s6 = sld [smem:[#allocation35_spill]]  ;;  %s4452_s21 = scalar_lea.vmem %s83_s26, 512 }
  0x51   :  { %p4453_p2 = scmp.ne.s32.totalorder %s83_s26, %s4452_s21  ;;  %p4457_p3 = scmp.lt.s32.totalorder %s83_s26, %s83_s26 }
  0x52   :  { %p4458_p4 = scmp.lt.s32.totalorder %s4452_s21, %s4452_s21 }
  0x54   :  { %p4459_p5 = por %p4458_p4, %p4457_p3 }
  0x56   :  { %62 = dma.hbm_to_vmem [thread:$0]  %s5453_s6, 32, %s57_s9, [#allocation3], %s4580_s2, %s4580_s2, %s4581_s29  }
  0x57   :  { %p4460_p6 = pnand %p4459_p5, %p4453_p2 }
  0x59   :  { %4463 = shalt.err (!%p4460_p6)
}
  0x5a   :  { %88 = dma.hbm_to_vmem [thread:$0]  %s5422_s10, 512, %s83_s26, [#allocation6], %s4585_s0, %s4585_s0, %s4586_s7  }
  0x5b   :  { %s4589_s3 = smov [#allocation10]   ;;  %s4590_s25 = smov [#allocation13]  }
  0x5c   :  { %s106_s13 = sshll.u32 %s4589_s3, 4  ;;  %s132_s8 = sshll.u32 %s4590_s25, 4  ;;  %s107_s13 = int_to_ptr.vmem [resolvable:$true] %s106_s13  ;;  %s133_s8 = int_to_ptr.vmem [resolvable:$true] %s132_s8 }
  0x5d   :  { %s4472_s4 = scalar_lea.vmem %s107_s13, 512  ;;  %p4477_p8 = scmp.lt.s32.totalorder %s107_s13, %s107_s13 }
  0x5e   :  { %p4473_p7 = scmp.ne.s32.totalorder %s107_s13, %s4472_s4  ;;  %p4478_p9 = scmp.lt.s32.totalorder %s4472_s4, %s4472_s4 }
  0x60   :  { %p4479_p10 = por %p4478_p9, %p4477_p8 }
  0x62   :  { %p4480_p11 = pnand %p4479_p10, %p4473_p7 }
  0x64   :  { %4483 = shalt.err (!%p4480_p11)
}
  0x65   :  { %112 = dma.hbm_to_vmem [thread:$0]  %s5424_s12, 512, %s107_s13, [#allocation9], %s4585_s0, %s4585_s0, %s4586_s7  }
  0x66   :  { %s4492_s10 = scalar_lea.vmem %s133_s8, 32  ;;  %p4497_p13 = scmp.lt.s32.totalorder %s133_s8, %s133_s8 }
  0x67   :  { %p4493_p12 = scmp.ne.s32.totalorder %s133_s8, %s4492_s10  ;;  %p4498_p0 = scmp.lt.s32.totalorder %s4492_s10, %s4492_s10 }
  0x69   :  { %p4499_p1 = por %p4498_p0, %p4497_p13 }
  0x6b   :  { %p4500_p2 = pnand %p4499_p1, %p4493_p12 }
  0x6d   :  { %4503 = shalt.err (!%p4500_p2)
}
  0x6e   :  { %138 = dma.hbm_to_vmem [thread:$0]  %s5427_s15, 32, %s133_s8, [#allocation12], %s4580_s2, %s4580_s2, %s4581_s29  }
  0x6f   :  { %s4591_s11 = smov [#allocation16]   ;;  %s4592_s27 = smov [#allocation19]  }
  0x70   :  { %s161_s18 = sshll.u32 %s4591_s11, 4  ;;  %s182_s12 = sshll.u32 %s4592_s27, 4  ;;  %s162_s18 = int_to_ptr.vmem [resolvable:$true] %s161_s18  ;;  %s183_s12 = int_to_ptr.vmem [resolvable:$true] %s182_s12 }
  0x71   :  { %s4512_s6 = scalar_lea.vmem %s162_s18, 16  ;;  %s4516_s21 = scalar_lea.vmem %s162_s18, 32 }
  0x72   :  { %p4513_p3 = scmp.ne.s32.totalorder %s162_s18, %s4512_s6  ;;  %p4517_p4 = scmp.lt.s32.totalorder %s162_s18, %s162_s18 }
  0x73   :  { %p4518_p5 = scmp.lt.s32.totalorder %s4516_s21, %s4512_s6 }
  0x75   :  { %p4519_p6 = por %p4518_p5, %p4517_p4 }
  0x77   :  { %p4520_p7 = pnand %p4519_p6, %p4513_p3 }
  0x79   :  { %4523 = shalt.err (!%p4520_p7)
}
  0x7a   :  { %164 = dma.hbm_to_vmem [thread:$0]  %s5431_s19, 16, %s162_s18, [#allocation15]  }
  0x7b   :  { %s4532_s3 = scalar_lea.vmem %s183_s12, 256  ;;  %p4537_p9 = scmp.lt.s32.totalorder %s183_s12, %s183_s12 }
  0x7c   :  { %p4533_p8 = scmp.ne.s32.totalorder %s183_s12, %s4532_s3  ;;  %p4538_p10 = scmp.lt.s32.totalorder %s4532_s3, %s4532_s3 }
  0x7e   :  { %p4539_p11 = por %p4538_p10, %p4537_p9 }
  0x80   :  { %p4540_p12 = pnand %p4539_p11, %p4533_p8 }
  0x82   :  { %4543 = shalt.err (!%p4540_p12)
}
  0x83   :  { %188 = dma.hbm_to_vmem [thread:$0]  %s5434_s22, 256, %s183_s12, [#allocation18], %s4585_s0, %s4585_s0, %s4586_s7  }
  0x84   :  { %4564 = dma.done.wait [#allocation3], 32  }
  0x85   :  { %4565 = vsyncadd [#allocation3], 4294967264 }
  0x86   :  { %4566 = dma.done.wait [#allocation6], 544  }
  0x87   :  { %4567 = vsyncadd [#allocation6], 4294966752 }
  0x88   :  { %4568 = dma.done.wait [#allocation9], 544  }
  0x89   :  { %4569 = vsyncadd [#allocation9], 4294966752 }
  0x8a   :  { %4570 = dma.done.wait [#allocation12], 64  }
  0x8b   :  { %4571 = vsyncadd [#allocation12], 4294967232 }
  0x8c   :  { %4572 = dma.done.wait [#allocation15], 272  }
  0x8d   :  { %4573 = vsyncadd [#allocation15], 4294967024 }
  0x8e   :  { %4574 = dma.done.wait [#allocation18], 272  }
  0x8f   :  { %4575 = vsyncadd [#allocation18], 4294967024  ;;  %v4593_v0 = vmov 0.0   ;;  %vm4594_vm0 = vmmov 0   ;;  %v4196_v1 = vld [vmem:[#allocation19 + $0x8] sm:$0xff]   ;;  %v4197_v2 = vld [vmem:[#allocation19] sm:$0xff]  }
  0x90   :  { %3833 = vmatprep.subr.bf16.mxu1 %v4593_v0  ;;  %3837 = vmatprep.mubr.msk.bf16.mxu1 %vm4594_vm0, %v4593_v0  ;;  %vm246_vm1 = vcmask 261120   ;;  %s5454_s7 = sld [smem:[#allocation28_spill]]  ;;  %vm297_vm2 = vcmask 1044480   ;;  %s4595_s28 = smov 112   ;;  %vm373_vm3 = vcmask 130048   ;;  %vm421_vm4 = vcmask 36864  }
  0x91   :  { %3849 = vmatprep.subr.bf16.mxu0 %v4593_v0  ;;  %3851 = vmatprep.mubr.msk.bf16.mxu0 %vm4594_vm0, %v4593_v0  ;;  %s5455_s8 = sld [smem:[#allocation29_spill]]  ;;  %s4596_s30 = smov 96   ;;  %vm440_vm5 = vcmask 1041408   ;;  %vm441_vm6 = vcmask 1042432   ;;  %vm436_vm7 = vcmask 39936   ;;  %vm914_vm8 = vcmask 254976  }
  0x92   :  { %3834 = vmatpush3.bf16.msra.mxu1 %v4196_v1  ;;  %s5456_s9 = sld [smem:[#allocation30_spill]]  ;;  %s4598_s3 = smov 48   ;;  %vm1132_vm9 = vcmask 61440   ;;  %vm1152_vm10 = vcmask 1043456   ;;  %vm1148_vm11 = vcmask 64512   ;;  %vm1769_vm12 = vcmask 523264  }
  0x93   :  { %3835 = vmatprep.subr.bf16.mxu1 %v4593_v0  ;;  %s5457_s21 = sld [smem:[#allocation31_spill]]  ;;  %vm3398_vm13 = vcmask 1040384   ;;  %s4600_s10 = smov [#allocation20]  }
  0x94   :  { %s5458_s19 = sld [smem:[#allocation32_spill]]  ;;  %s3560_s26 = sshll.u32 %s4600_s10, 4  ;;  %s3561_s26 = int_to_ptr.vmem [resolvable:$true] %s3560_s26 }
  0x95   :  { %s5459_s4 = sld [smem:[#allocation33_spill]]  ;;  %p4549_p0 = scmp.lt.s32.totalorder %s3561_s26, %s3561_s26 }
  0x96   :  { %v4796_v3 = vld [vmem:[%s5454_s7] sm:$0xff]   ;;  %3836 = vmatpush3.bf16.msra.mxu1 %v4197_v2  ;;  %s5460_s5 = sld [smem:[#allocation36_spill]] }
  0x97   :  { %v293_v4 = vld [vmem:[%s5455_s8] sm:$0x1f]  ;;  %3841 = vmatprep.subr.bf16.mxu1 %v4593_v0  ;;  %s5461_s12 = sld [smem:[#allocation34_spill]] }
  0x98   :  { %v4199_v5 = vld [vmem:[%s5456_s9 + $0x8] sm:$0xff]   ;;  %v4804_v6 = vrot.slane %v293_v4, 3  ;;  %v4200_v7 = vld [vmem:[%s5456_s9] sm:$0xff]  }
  0x99   :  { %3838 = vmatmul.mubr.msk.bf16.vlgmr.msra.gmra.mxu1 %vm246_vm1, %v4796_v3  ;;  %v3582_v14 = vld [vmem:[%s5457_s21] ss:$0 sm:$0xff] }
  0x9a   :  { %3842 = vmatpush3.bf16.msra.mxu1 %v4199_v5  ;;  %3845 = vmatprep.mubr.msk.bf16.mxu1 %vm4594_vm0, %v4593_v0  ;;  %v4816_v8 = vsel %vm297_vm2, %v293_v4, %v4804_v6 }
  0x9b   :  { %3843 = vmatprep.subr.bf16.mxu1 %v4593_v0  ;;  %v306_v9 = vpack.c.bf16 %v4804_v6, %v4816_v8 }
  0x9e   :  { %3844 = vmatpush3.bf16.msra.mxu1 %v4200_v7 }
  0x9f   :  { %3855 = vmatprep.subr.bf16.mxu1 %v4593_v0 }
  0xa1   :  { %3846 = vmatmul.mubr.msk.bf16.vlgmr.msra.gmra.mxu1 %vm246_vm1, %v306_v9 }
  0xa2   :  { %3857 = vmatprep.mubr.msk.bf16.mxu1 %vm4594_vm0, %v4593_v0 }
 0x159   :  { %v284_v10 = vpop.f32.mrf.mxu1 }
 0x15a   :  { %291 = vst [vmem:[%s5436_s24] sm:$0xff] %v284_v10 }
 0x15b   :  { %v3839_v11 = vpop.f32.mrf.mxu1 }
 0x15d   :  { %v287_v12 = vpop.f32.mrf.mxu1 }
 0x15e   :  { %292 = vst [vmem:[%s5436_s24 + $0x8] sm:$0xff] %v287_v12  ;;  %s4597_s24 = smov 80  }
 0x15f   :  { %v3840_v13 = vpop.f32.mrf.mxu1 }
 0x161   :  { %v362_v15 = vpop.f32.mrf.mxu1 }
 0x162   :  { %v363_v16 = vadd.f32 %v3582_v14, %v362_v15 }
 0x163   :  { %v3847_v17 = vpop.f32.mrf.mxu1 }
 0x164   :  { %v4834_v18 = vpack.c.bf16 %v363_v16, %v363_v16 }
 0x165   :  { %v365_v19 = vpop.f32.mrf.mxu1 }
 0x166   :  { %v366_v20 = vadd.f32 %v3582_v14, %v365_v19  ;;  %487 = vrot.lane.b32.xlu1 %v4834_v18, %s4595_s28  ;;  %371 = vrot.lane.b32.xlu0 %v4834_v18, %s4596_s30 }
 0x167   :  { %v3848_v21 = vpop.f32.mrf.mxu1 }
 0x168   :  { %v603_v22 = vpack.c.bf16 %v366_v20, %v363_v16 }
 0x16a   :  { %v605_v23 = vshrl.u32 %v603_v22, 16  ;;  %v608_v24 = vshll.u32 %v603_v22, 16  ;;  %489 = vrot.lane.b32.xlu0 %v4834_v18, %s4597_s24 }
 0x16c   :  { %v607_v25 = vrot.slane %v605_v23, 2  ;;  %v610_v26 = vrot.slane %v608_v24, 3  ;;  %v4599_v23 = vmov 65535  }
 0x16d   :  { %v442_v24 = vsel %vm440_vm5, 4294967295, %v4599_v23 }
 0x16e   :  { %v4842_v27 = vor.u32 %v610_v26, %v607_v25  ;;  %v4888_v26 = vsel %vm441_vm6, %v442_v24, 0 }
 0x170   :  { %723 = vrot.lane.b32.xlu0 %v4842_v27, %s4597_s24  ;;  %612 = vrot.lane.b32.xlu1 %v4842_v27, %s4596_s30 }
 0x174   :  { %721 = vrot.lane.b32.xlu1 %v4842_v27, %s4595_s28 }
 0x1d8   :  { %v372_v28 = vpop.permute.xlu0 %371  ;;  %v488_v32 = vpop.permute.xlu1 %487 }
 0x1d9   :  { %v378_v29 = vsel %vm373_vm3, %v372_v28, 0 }
 0x1da   :  { %3850 = vmatpush3.bf16.xpose.msra.mxu0 %v378_v29 }
 0x1db   :  { %3861 = vmatprep.subr.bf16.mxu0 %v4593_v0 }
 0x1dc   :  { %v490_v30 = vpop.permute.xlu0 %489 }
 0x1dd   :  { %v495_v31 = vsel %vm373_vm3, %v490_v30, 0 }
 0x1e1   :  { %3852 = vmatmul.mubr.msk.bf16.vlgmr.msra.gmra.mxu0 %vm373_vm3, %v4834_v18 }
 0x1e2   :  { %3862 = vmatpush3.bf16.xpose.msra.mxu0 %v495_v31  ;;  %3863 = vmatprep.mubr.msk.bf16.mxu0 %vm4594_vm0, %v4593_v0  ;;  %v613_v33 = vpop.permute.xlu1 %612  ;;  %v724_v35 = vpop.permute.xlu0 %723 }
 0x1e3   :  { %3873 = vmatprep.subr.bf16.mxu0 %v4593_v0  ;;  %v618_v34 = vsel %vm373_vm3, %v613_v33, 0  ;;  %v729_v36 = vsel %vm373_vm3, %v724_v35, 0 }
 0x1e6   :  { %v722_v37 = vpop.permute.xlu1 %721 }
 0x1e9   :  { %3864 = vmatmul.mubr.msk.bf16.vlgmr.msra.gmra.mxu0 %vm373_vm3, %v488_v32 }
 0x1ea   :  { %3874 = vmatpush3.bf16.xpose.msra.mxu0 %v618_v34  ;;  %3875 = vmatprep.mubr.msk.bf16.mxu0 %vm4594_vm0, %v4593_v0 }
 0x1eb   :  { %3885 = vmatprep.subr.bf16.mxu0 %v4593_v0 }
 0x1f1   :  { %3876 = vmatmul.mubr.msk.bf16.vlgmr.msra.gmra.mxu0 %vm373_vm3, %v4842_v27 }
 0x1f2   :  { %3886 = vmatpush3.bf16.xpose.msra.mxu0 %v729_v36  ;;  %3887 = vmatprep.mubr.msk.bf16.mxu0 %vm4594_vm0, %v4593_v0 }
 0x1f3   :  { %3897 = vmatprep.subr.bf16.mxu0 %v4593_v0 }
 0x1f9   :  { %3888 = vmatmul.mubr.msk.bf16.vlgmr.msra.gmra.mxu0 %vm373_vm3, %v722_v37 }
 0x1fa   :  { %3901 = vmatprep.mubr.msk.bf16.mxu0 %vm4594_vm0, %v4593_v0 }
 0x2a1   :  { %v414_v38 = vpop.f32.mrf.mxu0 }
 0x2a2   :  { %v420_v39 = vmul.f32 0.25, %v414_v38 }
 0x2a3   :  { %v3853_v40 = vpop.f32.mrf.mxu0 }
 0x2a4   :  { %v422_v41 = vsel %vm421_vm4, %v420_v39, -inf }
 0x2a5   :  { %v417_v42 = vpop.f32.mrf.mxu0  ;;  %423 = vmax.xlane.f32.xlu0 %v422_v41 }
 0x2a7   :  { %v3854_v43 = vpop.f32.mrf.mxu0 }
 0x2a9   :  { %v531_v44 = vpop.f32.mrf.mxu0 }
 0x2aa   :  { %v537_v45 = vmul.f32 0.25, %v531_v44 }
 0x2ab   :  { %v3865_v46 = vpop.f32.mrf.mxu0 }
 0x2ac   :  { %v538_v47 = vsel %vm421_vm4, %v537_v45, -inf }
 0x2ad   :  { %v534_v48 = vpop.f32.mrf.mxu0  ;;  %539 = vmax.xlane.f32.xlu1 %v538_v47 }
 0x2af   :  { %v3866_v49 = vpop.f32.mrf.mxu0 }
 0x2b1   :  { %v654_v50 = vpop.f32.mrf.mxu0 }
 0x2b2   :  { %v660_v51 = vmul.f32 0.25, %v654_v50 }
 0x2b3   :  { %v3877_v52 = vpop.f32.mrf.mxu0 }
 0x2b4   :  { %v661_v53 = vsel %vm421_vm4, %v660_v51, -inf }
 0x2b5   :  { %662 = vmax.xlane.f32.xlu0 %v661_v53  ;;  %v657_v54 = vpop.f32.mrf.mxu0 }
 0x2b7   :  { %v3878_v55 = vpop.f32.mrf.mxu0 }
 0x2b9   :  { %v765_v56 = vpop.f32.mrf.mxu0 }
 0x2ba   :  { %v771_v57 = vmul.f32 0.25, %v765_v56 }
 0x2bb   :  { %v3889_v58 = vpop.f32.mrf.mxu0 }
 0x2bc   :  { %v772_v59 = vsel %vm421_vm4, %v771_v57, -inf  ;;  %v4202_v58 = vld [vmem:[%s5458_s19] sm:$0xff]  }
 0x2bd   :  { %773 = vmax.xlane.f32.xlu0 %v772_v59  ;;  %v768_v60 = vpop.f32.mrf.mxu0 }
 0x2bf   :  { %v3890_v61 = vpop.f32.mrf.mxu0 }
 0x32e   :  { %v424_v62 = vpop.xlane.xlu0 %423 }
 0x32f   :  { %v425_v63 = vsub.f32 %v420_v39, %v424_v62 }
 0x331   :  { %v426_v1 = vmul.f32 1.442695, %v425_v63 }
 0x333   :  { %4237 = vpow2.f32 %v426_v1 }
 0x336   :  { %v540_v2 = vpop.xlane.xlu1 %539 }
 0x337   :  { %v541_v4 = vsub.f32 %v537_v45, %v540_v2 }
 0x339   :  { %v542_v5 = vmul.f32 1.442695, %v541_v4 }
 0x33b   :  { %4239 = vpow2.f32 %v542_v5 }
 0x33e   :  { %v663_v10 = vpop.xlane.xlu0 %662 }
 0x33f   :  { %v664_v19 = vsub.f32 %v660_v51, %v663_v10  ;;  %v4201_v51 = vld [vmem:[%s5458_s19 + $0x8] sm:$0xff]  }
 0x340   :  { %v4238_v7 = vpop.eup %4237  ;;  %3898 = vmatpush3.bf16.msra.mxu0 %v4201_v51 }
 0x341   :  { %v428_v9 = vsel %vm421_vm4, %v4238_v7, 0.0  ;;  %v665_v20 = vmul.f32 1.442695, %v664_v19  ;;  %3899 = vmatprep.subr.bf16.mxu0 %v4593_v0 }
 0x342   :  { %429 = vadd.xlane.f32.xlu1 %v428_v9 }
 0x344   :  { %3900 = vmatpush3.bf16.msra.mxu0 %v4202_v58 }
 0x345   :  { %3913 = vmatprep.subr.bf16.mxu0 %v4593_v0 }
 0x346   :  { %v774_v11 = vpop.xlane.xlu0 %773 }
 0x347   :  { %v775_v12 = vsub.f32 %v771_v57, %v774_v11 }
 0x348   :  { %v4240_v13 = vpop.eup %4239 }
 0x349   :  { %v776_v14 = vmul.f32 1.442695, %v775_v12  ;;  %v544_v15 = vsel %vm421_vm4, %v4240_v13, 0.0 }
 0x34a   :  { %545 = vadd.xlane.f32.xlu0 %v544_v15 }
 0x34b   :  { %4241 = vpow2.f32 %v776_v14  ;;  %v3594_v14 = vld [vmem:[%s5459_s4] ss:$0 sm:$0xff] }
 0x34c   :  { %4243 = vpow2.f32 %v665_v20 }
 0x353   :  { %434 = vrot.lane.b32.xlu1 %v4834_v18, %s4585_s0 }
 0x358   :  { %v4242_v16 = vpop.eup %4241 }
 0x359   :  { %v778_v17 = vsel %vm421_vm4, %v4242_v16, 0.0  ;;  %v4244_v21 = vpop.eup %4243 }
 0x35a   :  { %779 = vadd.xlane.f32.xlu0 %v778_v17  ;;  %v667_v22 = vsel %vm421_vm4, %v4244_v21, 0.0 }
 0x370   :  { %550 = vrot.lane.b32.xlu0 %v4834_v18, %s4598_s3 }
 0x377   :  { %668 = vadd.xlane.f32.xlu1 %v667_v22 }
 0x388   :  { %673 = vrot.lane.b32.xlu1 %v4842_v27, %s4585_s0 }
 0x38c   :  { %784 = vrot.lane.b32.xlu1 %v4842_v27, %s4598_s3 }
 0x3cb   :  { %v430_v25 = vpop.xlane.xlu1 %429 }
 0x3cc   :  { %4245 = vrcp.f32 %v430_v25 }
 0x3cf   :  { %v435_v28 = vpop.permute.xlu1 %434 }
 0x3d0   :  { %v445_v18 = vand.u32 %v4888_v26, %v435_v28 }
 0x3d2   :  { %3856 = vmatpush3.bf16.msra.mxu1 %v445_v18 }
 0x3d3   :  { %3867 = vmatprep.subr.bf16.mxu1 %v4593_v0  ;;  %v546_v29 = vpop.xlane.xlu0 %545 }
 0x3d4   :  { %4247 = vrcp.f32 %v546_v29 }
 0x3d9   :  { %v4246_v30 = vpop.eup %4245 }
 0x3da   :  { %v432_v31 = vmul.f32 %v4246_v30, %v4238_v7 }
 0x3dc   :  { %v433_v27 = vpack.c.bf16 %v432_v31, %v432_v31 }
 0x3de   :  { %3858 = vmatmul.mubr.msk.bf16.vlgmr.msra.gmra.mxu1 %vm436_vm7, %v433_v27 }
 0x3df   :  { %3869 = vmatprep.mubr.msk.bf16.mxu1 %vm4594_vm0, %v4593_v0 }
 0x3e1   :  { %v4248_v33 = vpop.eup %4247 }
 0x3e2   :  { %v548_v35 = vmul.f32 %v4248_v33, %v4240_v13 }
 0x3e3   :  { %v780_v32 = vpop.xlane.xlu0 %779 }
 0x3e4   :  { %v549_v37 = vpack.c.bf16 %v548_v35, %v548_v35  ;;  %v4204_v35 = vld [vmem:[%s5460_s5] sm:$0xff]  }
 0x3e7   :  { %v551_v34 = vpop.permute.xlu0 %550 }
 0x3e8   :  { %v556_v36 = vand.u32 %v551_v34, %v4888_v26 }
 0x3ea   :  { %3868 = vmatpush3.bf16.msra.mxu1 %v556_v36  ;;  %v4205_v36 = vld [vmem:[%s5461_s12 + $0x8] sm:$0xff]  }
 0x3eb   :  { %3879 = vmatprep.subr.bf16.mxu1 %v4593_v0 }
 0x3ed   :  { %3870 = vmatmul.mubr.msk.bf16.vlgmr.msra.gmra.mxu1 %vm436_vm7, %v549_v37  ;;  %v4206_v37 = vld [vmem:[%s5461_s12] sm:$0xff]  }
 0x3ee   :  { %3881 = vmatprep.mubr.msk.bf16.mxu1 %vm4594_vm0, %v4593_v0 }
 0x400   :  { %v669_v38 = vpop.xlane.xlu1 %668 }
 0x401   :  { %4249 = vrcp.f32 %v669_v38 }
 0x402   :  { %4251 = vrcp.f32 %v780_v32 }
 0x404   :  { %v674_v39 = vpop.permute.xlu1 %673 }
 0x405   :  { %v679_v40 = vand.u32 %v674_v39, %v4888_v26 }
 0x407   :  { %3880 = vmatpush3.bf16.msra.mxu1 %v679_v40 }
 0x408   :  { %3891 = vmatprep.subr.bf16.mxu1 %v4593_v0  ;;  %v785_v42 = vpop.permute.xlu1 %784 }
 0x409   :  { %v790_v46 = vand.u32 %v785_v42, %v4888_v26 }
 0x40e   :  { %v4250_v41 = vpop.eup %4249 }
 0x40f   :  { %v671_v43 = vmul.f32 %v4250_v41, %v4244_v21  ;;  %v4252_v45 = vpop.eup %4251 }
 0x410   :  { %v782_v47 = vmul.f32 %v4252_v45, %v4242_v16 }
 0x411   :  { %v672_v44 = vpack.c.bf16 %v671_v43, %v671_v43  ;;  %v939_v43 = vlaneseq }
 0x412   :  { %v783_v48 = vpack.c.bf16 %v782_v47, %v782_v47 }
 0x413   :  { %3882 = vmatmul.mubr.msk.bf16.vlgmr.msra.gmra.mxu1 %vm436_vm7, %v672_v44  ;;  %v4955_v44 = vshrl.u32 %v939_v43, 7 }
 0x414   :  { %3892 = vmatpush3.bf16.msra.mxu1 %v790_v46  ;;  %3893 = vmatprep.mubr.msk.bf16.mxu1 %vm4594_vm0, %v4593_v0  ;;  %v4963_v46 = vld [vmem:[%s5428_s16] sm:$0x7] }
 0x415   :  { %3905 = vmatprep.subr.bf16.mxu1 %v4593_v0  ;;  %v4958_v45 = vsub.s32 0, %v4955_v44 }
 0x41b   :  { %3894 = vmatmul.mubr.msk.bf16.vlgmr.msra.gmra.mxu1 %vm436_vm7, %v783_v48 }
 0x41c   :  { %3909 = vmatprep.mubr.msk.bf16.mxu1 %vm4594_vm0, %v4593_v0  ;;  %3906 = vmatpush3.bf16.msra.mxu1 %v4205_v36 }
 0x41d   :  { %3907 = vmatprep.subr.bf16.mxu1 %v4593_v0 }
 0x420   :  { %3908 = vmatpush3.bf16.msra.mxu1 %v4206_v37 }
 0x421   :  { %3921 = vmatprep.subr.bf16.mxu1 %v4593_v0 }
 0x49e   :  { %v481_v49 = vpop.f32.mrf.mxu1 }
 0x4a0   :  { %v3859_v50 = vpop.f32.mrf.mxu1 }
 0x4a1   :  { %v4970_v50 = vld [vmem:[%s5429_s17] sm:$0x7] }
 0x4a2   :  { %v484_v52 = vpop.f32.mrf.mxu1 }
 0x4a4   :  { %v3860_v53 = vpop.f32.mrf.mxu1 }
 0x4ad   :  { %v592_v54 = vpop.f32.mrf.mxu1 }
 0x4ae   :  { %599 = vrot.lane.b32.xlu1 %v592_v54, %s4580_s2  ;;  %v948_v54 = vrot.slane %v4970_v50, %v4958_v45 }
 0x4af   :  { %v3871_v55 = vpop.f32.mrf.mxu1 }
 0x4b1   :  { %v595_v56 = vpop.f32.mrf.mxu1 }
 0x4b3   :  { %v3872_v57 = vpop.f32.mrf.mxu1 }
 0x4d3   :  { %v715_v59 = vpop.f32.mrf.mxu1 }
 0x4d5   :  { %v3883_v60 = vpop.f32.mrf.mxu1 }
 0x4d7   :  { %v718_v61 = vpop.f32.mrf.mxu1 }
 0x4d9   :  { %v3884_v62 = vpop.f32.mrf.mxu1 }
 0x4db   :  { %v826_v63 = vpop.f32.mrf.mxu1 }
 0x4dc   :  { %833 = vrot.lane.b32.xlu0 %v826_v63, %s4580_s2 }
 0x4dd   :  { %v3895_v1 = vpop.f32.mrf.mxu1 }
 0x4df   :  { %v829_v2 = vpop.f32.mrf.mxu1 }
 0x4e1   :  { %v3896_v4 = vpop.f32.mrf.mxu1 }
 0x520   :  { %v600_v5 = vpop.permute.xlu1 %599 }
 0x521   :  { %v602_v11 = vsel %vm373_vm3, %v481_v49, %v600_v5  ;;  %v942_v49 = vrot.slane %v4963_v46, %v4958_v45 }
 0x54e   :  { %v834_v7 = vpop.permute.xlu0 %833 }
 0x54f   :  { %v836_v9 = vsel %vm373_vm3, %v715_v59, %v834_v7  ;;  %v3602_v59 = vld [vmem:[#allocation5] ss:$0 sm:$0xff] }
 0x550   :  { %v838_v10 = vrot.slane %v836_v9, 3  ;;  %v3598_v9 = vld [vmem:[#allocation2] ss:$0 sm:$0xff] }
 0x552   :  { %v840_v12 = vsel %vm297_vm2, %v602_v11, %v838_v10 }
 0x553   :  { %v846_v13 = vpack.c.bf16 %v838_v10, %v840_v12 }
 0x555   :  { %3902 = vmatmul.mubr.msk.bf16.vlgmr.msra.gmra.mxu0 %vm246_vm1, %v846_v13 }
 0x556   :  { %3917 = vmatprep.mubr.msk.bf16.mxu0 %vm4594_vm0, %v4593_v0 }
 0x615   :  { %v902_v15 = vpop.f32.mrf.mxu0 }
 0x616   :  { %v903_v16 = vadd.f32 %v3594_v14, %v902_v15 }
 0x617   :  { %v3903_v17 = vpop.f32.mrf.mxu0 }
 0x618   :  { %v909_v19 = vadd.f32 %v903_v16, %v4816_v8 }
 0x619   :  { %v905_v20 = vpop.f32.mrf.mxu0 }
 0x61a   :  { %v906_v21 = vadd.f32 %v3594_v14, %v905_v20  ;;  %v911_v22 = vsel %vm246_vm1, %v909_v19, 0.0 }
 0x61b   :  { %912 = vadd.xlane.f32.xlu0 %v911_v22  ;;  %v3904_v23 = vpop.f32.mrf.mxu0 }
 0x61c   :  { %v910_v24 = vadd.f32 %v906_v21, %v4804_v6  ;;  %v4203_v6 = vld [vmem:[%s5460_s5 + $0x8] sm:$0xff]  }
 0x61d   :  { %3914 = vmatpush3.bf16.msra.mxu0 %v4203_v6 }
 0x61e   :  { %v915_v25 = vsel %vm914_vm8, %v910_v24, 0.0  ;;  %3915 = vmatprep.subr.bf16.mxu0 %v4593_v0 }
 0x61f   :  { %916 = vadd.xlane.f32.xlu1 %v915_v25 }
 0x621   :  { %3916 = vmatpush3.bf16.msra.mxu0 %v4204_v35 }
 0x622   :  { %3927 = vmatprep.subr.bf16.mxu0 %v4593_v0 }
 0x624   :  { %3918 = vmatmul.mubr.msk.bf16.vlgmr.msra.gmra.mxu0 %vm246_vm1, %v4796_v3 }
 0x625   :  { %3929 = vmatprep.mubr.msk.bf16.mxu0 %vm4594_vm0, %v4593_v0 }
 0x6a4   :  { %v913_v28 = vpop.xlane.xlu0 %912 }
 0x6a5   :  { %v919_v18 = vmul.f32 0.03125, %v913_v28 }
 0x6a7   :  { %v921_v29 = vsub.f32 %v909_v19, %v919_v18 }
 0x6a8   :  { %v917_v30 = vpop.xlane.xlu1 %916 }
 0x6a9   :  { %v920_v31 = vmul.f32 0.03125, %v917_v30  ;;  %v923_v27 = vmul.f32 %v921_v29, %v921_v29 }
 0x6ab   :  { %v922_v32 = vsub.f32 %v910_v24, %v920_v31  ;;  %v925_v8 = vsel %vm246_vm1, %v923_v27, 0.0 }
 0x6ac   :  { %926 = vadd.xlane.f32.xlu0 %v925_v8 }
 0x6ad   :  { %v924_v33 = vmul.f32 %v922_v32, %v922_v32 }
 0x6af   :  { %v928_v34 = vsel %vm914_vm8, %v924_v33, 0.0 }
 0x6b0   :  { %929 = vadd.xlane.f32.xlu0 %v928_v34 }
 0x6e4   :  { %v1076_v60 = vpop.f32.mrf.mxu0 }
 0x6e5   :  { %v1077_v61 = vadd.f32 %v3602_v59, %v1076_v60 }
 0x6e6   :  { %v3919_v62 = vpop.f32.mrf.mxu0 }
 0x6e7   :  { %v4983_v63 = vpack.c.bf16 %v1077_v61, %v1077_v61 }
 0x6e8   :  { %v1079_v1 = vpop.f32.mrf.mxu0 }
 0x6e9   :  { %v1080_v2 = vadd.f32 %v3602_v59, %v1079_v1  ;;  %1199 = vrot.lane.b32.xlu1 %v4983_v63, %s4595_s28  ;;  %v1089_v4 = vsel %vm373_vm3, %v4983_v63, 0 }
 0x6ea   :  { %v3920_v5 = vpop.f32.mrf.mxu0 }
 0x6eb   :  { %v4989_v7 = vpack.c.bf16 %v1080_v2, %v1080_v2 }
 0x6ed   :  { %1433 = vrot.lane.b32.xlu1 %v4989_v7, %s4595_s28  ;;  %v1327_v18 = vsel %vm373_vm3, %v4989_v7, 0 }
 0x735   :  { %v927_v38 = vpop.xlane.xlu0 %926 }
 0x736   :  { %v931_v39 = vmul.f32 0.03125, %v927_v38 }
 0x738   :  { %v933_v3 = vadd.f32 1e-05, %v931_v39 }
 0x739   :  { %v930_v40 = vpop.xlane.xlu0 %929 }
 0x73a   :  { %4253 = vrsqrt.f32 %v933_v3  ;;  %v932_v41 = vmul.f32 0.03125, %v930_v40 }
 0x73c   :  { %v934_v42 = vadd.f32 1e-05, %v932_v41 }
 0x73e   :  { %4255 = vrsqrt.f32 %v934_v42 }
 0x747   :  { %v4254_v47 = vpop.eup %4253 }
 0x748   :  { %v937_v48 = vmul.f32 %v4254_v47, %v921_v29 }
 0x74a   :  { %v943_v53 = vmul.f32 %v942_v49, %v937_v48 }
 0x74b   :  { %v4256_v51 = vpop.eup %4255 }
 0x74c   :  { %v938_v52 = vmul.f32 %v4256_v51, %v922_v32  ;;  %v4974_v56 = vadd.f32 %v948_v54, %v943_v53 }
 0x74e   :  { %v944_v55 = vmul.f32 %v942_v49, %v938_v52 }
 0x750   :  { %v4976_v57 = vadd.f32 %v948_v54, %v944_v55 }
 0x752   :  { %v956_v58 = vpack.c.bf16 %v4976_v57, %v4974_v56 }
 0x754   :  { %3910 = vmatmul.mubr.msk.bf16.vlgmr.msra.gmra.mxu1 %vm246_vm1, %v956_v58 }
 0x755   :  { %3923 = vmatprep.mubr.msk.bf16.mxu1 %vm4594_vm0, %v4593_v0  ;;  %3922 = vmatpush3.bf16.xpose.msra.mxu1 %v1089_v4 }
 0x756   :  { %3933 = vmatprep.subr.bf16.mxu1 %v4593_v0 }
 0x75b   :  { %v1200_v13 = vpop.permute.xlu1 %1199 }
 0x75c   :  { %v1205_v15 = vsel %vm373_vm3, %v1200_v13, 0 }
 0x75f   :  { %v1434_v29 = vpop.permute.xlu1 %1433 }
 0x760   :  { %v1439_v30 = vsel %vm373_vm3, %v1434_v29, 0 }
 0x814   :  { %v1012_v10 = vpop.f32.mrf.mxu1 }
 0x815   :  { %v1013_v11 = vadd.f32 %v3598_v9, %v1012_v10 }
 0x816   :  { %v3911_v12 = vpop.f32.mrf.mxu1 }
 0x817   :  { %v1083_v14 = vpack.c.bf16 %v1013_v11, %v1013_v11 }
 0x818   :  { %v1015_v16 = vpop.f32.mrf.mxu1 }
 0x819   :  { %v1016_v17 = vadd.f32 %v3598_v9, %v1015_v16  ;;  %1197 = vrot.lane.b32.xlu0 %v1083_v14, %s4595_s28  ;;  %3924 = vmatmul.mubr.msk.bf16.vlgmr.msra.gmra.mxu1 %vm373_vm3, %v1083_v14 }
 0x81a   :  { %v3912_v19 = vpop.f32.mrf.mxu1  ;;  %3934 = vmatpush3.bf16.xpose.msra.mxu1 %v1205_v15  ;;  %3935 = vmatprep.mubr.msk.bf16.mxu1 %vm4594_vm0, %v4593_v0 }
 0x81b   :  { %v1313_v20 = vpack.c.bf16 %v1016_v17, %v1013_v11  ;;  %3945 = vmatprep.subr.bf16.mxu1 %v4593_v0 }
 0x81d   :  { %v1316_v21 = vshrl.u32 %v1313_v20, 16  ;;  %v1319_v22 = vshll.u32 %v1313_v20, 16 }
 0x81f   :  { %v1318_v23 = vrot.slane %v1316_v21, 2  ;;  %v1321_v24 = vrot.slane %v1319_v22, 3 }
 0x821   :  { %v1322_v25 = vor.u32 %v1321_v24, %v1318_v23 }
 0x823   :  { %1431 = vrot.lane.b32.xlu1 %v1322_v25, %s4595_s28 }
 0x88b   :  { %v1198_v28 = vpop.permute.xlu0 %1197 }
 0x88c   :  { %3936 = vmatmul.mubr.msk.bf16.vlgmr.msra.gmra.mxu1 %vm373_vm3, %v1198_v28 }
 0x88d   :  { %3946 = vmatpush3.bf16.xpose.msra.mxu1 %v1327_v18  ;;  %3947 = vmatprep.mubr.msk.bf16.mxu1 %vm4594_vm0, %v4593_v0 }
 0x88e   :  { %3957 = vmatprep.subr.bf16.mxu1 %v4593_v0 }
 0x894   :  { %3948 = vmatmul.mubr.msk.bf16.vlgmr.msra.gmra.mxu1 %vm373_vm3, %v1322_v25 }
 0x895   :  { %3958 = vmatpush3.bf16.xpose.msra.mxu1 %v1439_v30  ;;  %3959 = vmatprep.mubr.msk.bf16.mxu1 %vm4594_vm0, %v4593_v0  ;;  %v1432_v31 = vpop.permute.xlu1 %1431 }
 0x896   :  { %3969 = vmatprep.subr.bf16.mxu1 %v4593_v0 }
 0x89c   :  { %3960 = vmatmul.mubr.msk.bf16.vlgmr.msra.gmra.mxu1 %vm373_vm3, %v1432_v31 }
 0x89d   :  { %3973 = vmatprep.mubr.msk.bf16.mxu1 %vm4594_vm0, %v4593_v0 }
 0x8d9   :  { %v1125_v27 = vpop.f32.mrf.mxu1 }
 0x8da   :  { %v1131_v32 = vmul.f32 0.25, %v1125_v27 }
 0x8db   :  { %v3925_v8 = vpop.f32.mrf.mxu1 }
 0x8dc   :  { %v1133_v33 = vsel %vm1132_vm9, %v1131_v32, -inf }
 0x8dd   :  { %1134 = vmax.xlane.f32.xlu0 %v1133_v33  ;;  %v1128_v34 = vpop.f32.mrf.mxu1 }
 0x8df   :  { %v3926_v6 = vpop.f32.mrf.mxu1 }
 0x94c   :  { %v1241_v35 = vpop.f32.mrf.mxu1 }
 0x94d   :  { %v1247_v36 = vmul.f32 0.25, %v1241_v35 }
 0x94e   :  { %v3937_v37 = vpop.f32.mrf.mxu1 }
 0x94f   :  { %v1248_v38 = vsel %vm1132_vm9, %v1247_v36, -inf }
 0x950   :  { %1249 = vmax.xlane.f32.xlu1 %v1248_v38  ;;  %v1244_v39 = vpop.f32.mrf.mxu1 }
 0x952   :  { %v3938_v3 = vpop.f32.mrf.mxu1 }
 0x954   :  { %v1363_v40 = vpop.f32.mrf.mxu1 }
 0x955   :  { %v1369_v41 = vmul.f32 0.25, %v1363_v40 }
 0x956   :  { %v3949_v42 = vpop.f32.mrf.mxu1 }
 0x957   :  { %v1370_v43 = vsel %vm1132_vm9, %v1369_v41, -inf }
 0x958   :  { %1371 = vmax.xlane.f32.xlu0 %v1370_v43  ;;  %v1366_v47 = vpop.f32.mrf.mxu1 }
 0x959   :  { %v4207_v47 = vld [vmem:[#allocation7 + $0x8] sm:$0xff]  }
 0x95a   :  { %v3950_v48 = vpop.f32.mrf.mxu1  ;;  %3970 = vmatpush3.bf16.msra.mxu1 %v4207_v47 }
 0x95b   :  { %3971 = vmatprep.subr.bf16.mxu1 %v4593_v0 }
 0x95c   :  { %v1475_v49 = vpop.f32.mrf.mxu1 }
 0x95d   :  { %v1481_v51 = vmul.f32 0.25, %v1475_v49 }
 0x95e   :  { %v3961_v52 = vpop.f32.mrf.mxu1 }
 0x95f   :  { %v1482_v53 = vsel %vm1132_vm9, %v1481_v51, -inf }
 0x960   :  { %1483 = vmax.xlane.f32.xlu0 %v1482_v53  ;;  %v1478_v54 = vpop.f32.mrf.mxu1  ;;  %v4208_v53 = vld [vmem:[#allocation7] sm:$0xff]  }
 0x961   :  { %3972 = vmatpush3.bf16.msra.mxu1 %v4208_v53  ;;  %v4212_v53 = vld [vmem:[%s5426_s14 + $0x10] sm:$0xff]  }
 0x962   :  { %v3962_v55 = vpop.f32.mrf.mxu1  ;;  %3985 = vmatprep.subr.bf16.mxu1 %v4593_v0 }
 0x966   :  { %v1135_v58 = vpop.xlane.xlu0 %1134 }
 0x967   :  { %v1136_v59 = vsub.f32 %v1131_v32, %v1135_v58 }
 0x969   :  { %v1137_v60 = vmul.f32 1.442695, %v1136_v59 }
 0x96b   :  { %4257 = vpow2.f32 %v1137_v60 }
 0x978   :  { %v4258_v61 = vpop.eup %4257 }
 0x979   :  { %v1139_v62 = vsel %vm1132_vm9, %v4258_v61, 0.0 }
 0x97a   :  { %1140 = vadd.xlane.f32.xlu1 %v1139_v62 }
 0x98b   :  { %1146 = vrot.lane.b32.xlu1 %v4983_v63, %s4596_s30 }
 0x9d9   :  { %v1250_v1 = vpop.xlane.xlu1 %1249 }
 0x9da   :  { %v1251_v2 = vsub.f32 %v1247_v36, %v1250_v1 }
 0x9dc   :  { %v1252_v4 = vmul.f32 1.442695, %v1251_v2 }
 0x9de   :  { %4259 = vpow2.f32 %v1252_v4 }
 0x9e1   :  { %v1372_v5 = vpop.xlane.xlu0 %1371 }
 0x9e2   :  { %v1373_v9 = vsub.f32 %v1369_v41, %v1372_v5 }
 0x9e4   :  { %v1374_v10 = vmul.f32 1.442695, %v1373_v9 }
 0x9e6   :  { %4261 = vpow2.f32 %v1374_v10 }
 0x9e9   :  { %v1484_v11 = vpop.xlane.xlu0 %1483 }
 0x9ea   :  { %v1485_v12 = vsub.f32 %v1481_v51, %v1484_v11 }
 0x9eb   :  { %v4260_v13 = vpop.eup %4259 }
 0x9ec   :  { %v1486_v14 = vmul.f32 1.442695, %v1485_v12  ;;  %v1254_v15 = vsel %vm1132_vm9, %v4260_v13, 0.0 }
 0x9ed   :  { %1255 = vadd.xlane.f32.xlu0 %v1254_v15 }
 0x9ee   :  { %4263 = vpow2.f32 %v1486_v14 }
 0x9f3   :  { %v4262_v16 = vpop.eup %4261 }
 0x9f4   :  { %v1376_v17 = vsel %vm1132_vm9, %v4262_v16, 0.0 }
 0x9f5   :  { %1377 = vadd.xlane.f32.xlu1 %v1376_v17 }
 0x9fb   :  { %v4264_v19 = vpop.eup %4263 }
 0x9fc   :  { %v1488_v20 = vsel %vm1132_vm9, %v4264_v19, 0.0 }
 0x9fd   :  { %1489 = vadd.xlane.f32.xlu0 %v1488_v20 }
 0xa03   :  { %v1141_v21 = vpop.xlane.xlu1 %1140 }
 0xa04   :  { %4265 = vrcp.f32 %v1141_v21 }
 0xa06   :  { %1383 = vrot.lane.b32.xlu1 %v4989_v7, %s4596_s30 }
 0xa07   :  { %v1147_v22 = vpop.permute.xlu1 %1146 }
 0xa08   :  { %v1154_v23 = vsel %vm1152_vm10, %v1147_v22, 0 }
 0xa09   :  { %3928 = vmatpush3.bf16.msra.mxu0 %v1154_v23 }
 0xa0a   :  { %1494 = vrot.lane.b32.xlu1 %v4989_v7, %s4597_s24  ;;  %3939 = vmatprep.subr.bf16.mxu0 %v4593_v0 }
 0xa11   :  { %v4266_v24 = vpop.eup %4265 }
 0xa12   :  { %v1143_v25 = vmul.f32 %v4266_v24, %v4258_v61 }
 0xa13   :  { %1260 = vrot.lane.b32.xlu0 %v4983_v63, %s4597_s24 }
 0xa14   :  { %v1144_v28 = vpack.c.bf16 %v1143_v25, %v1143_v25 }
 0xa16   :  { %3930 = vmatmul.mubr.msk.bf16.vlgmr.msra.gmra.mxu0 %vm1148_vm11, %v1144_v28 }
 0xa17   :  { %3941 = vmatprep.mubr.msk.bf16.mxu0 %vm4594_vm0, %v4593_v0 }
 0xa76   :  { %v1256_v18 = vpop.xlane.xlu0 %1255 }
 0xa77   :  { %4267 = vrcp.f32 %v1256_v18 }
 0xa7e   :  { %v1378_v29 = vpop.xlane.xlu1 %1377 }
 0xa7f   :  { %4269 = vrcp.f32 %v1378_v29 }
 0xa82   :  { %v1384_v8 = vpop.permute.xlu1 %1383 }
 0xa83   :  { %v1389_v34 = vsel %vm1152_vm10, %v1384_v8, 0  ;;  %v4209_v8 = vld [vmem:[#allocation10 + $0x8] sm:$0xff]  }
 0xa84   :  { %v4268_v30 = vpop.eup %4267 }
 0xa85   :  { %v1258_v31 = vmul.f32 %v4268_v30, %v4260_v13  ;;  %v3614_v13 = vld [vmem:[#allocation8] ss:$0 sm:$0xff] }
 0xa86   :  { %v1490_v7 = vpop.xlane.xlu0 %1489  ;;  %v1495_v35 = vpop.permute.xlu1 %1494 }
 0xa87   :  { %4271 = vrcp.f32 %v1490_v7  ;;  %v1259_v63 = vpack.c.bf16 %v1258_v31, %v1258_v31  ;;  %v1500_v38 = vsel %vm1152_vm10, %v1495_v35, 0 }
 0xa8a   :  { %v1261_v27 = vpop.permute.xlu0 %1260 }
 0xa8b   :  { %v1266_v32 = vsel %vm1152_vm10, %v1261_v27, 0 }
 0xa8c   :  { %3940 = vmatpush3.bf16.msra.mxu0 %v1266_v32  ;;  %v4270_v33 = vpop.eup %4269 }
 0xa8d   :  { %3951 = vmatprep.subr.bf16.mxu0 %v4593_v0  ;;  %v1380_v6 = vmul.f32 %v4270_v33, %v4262_v16 }
 0xa8f   :  { %3942 = vmatmul.mubr.msk.bf16.vlgmr.msra.gmra.mxu0 %vm1148_vm11, %v1259_v63  ;;  %v1381_v36 = vpack.c.bf16 %v1380_v6, %v1380_v6  ;;  %v4211_v63 = vld [vmem:[%s5426_s14 + $0x18] sm:$0xff]  }
 0xa90   :  { %3952 = vmatpush3.bf16.msra.mxu0 %v1389_v34  ;;  %3953 = vmatprep.mubr.msk.bf16.mxu0 %vm4594_vm0, %v4593_v0 }
 0xa91   :  { %3963 = vmatprep.subr.bf16.mxu0 %v4593_v0 }
 0xa94   :  { %v4272_v37 = vpop.eup %4271 }
 0xa95   :  { %v1492_v39 = vmul.f32 %v4272_v37, %v4264_v19 }
 0xa97   :  { %3954 = vmatmul.mubr.msk.bf16.vlgmr.msra.gmra.mxu0 %vm1148_vm11, %v1381_v36  ;;  %v1493_v3 = vpack.c.bf16 %v1492_v39, %v1492_v39 }
 0xa98   :  { %3964 = vmatpush3.bf16.msra.mxu0 %v1500_v38  ;;  %3965 = vmatprep.mubr.msk.bf16.mxu0 %vm4594_vm0, %v4593_v0  ;;  %v5074_v38 = vsub.s32 1, %v4955_v44 }
 0xa99   :  { %3977 = vmatprep.subr.bf16.mxu0 %v4593_v0 }
 0xa9a   :  { %v1656_v47 = vrot.slane %v4970_v50, %v5074_v38 }
 0xa9f   :  { %3966 = vmatmul.mubr.msk.bf16.vlgmr.msra.gmra.mxu0 %vm1148_vm11, %v1493_v3 }
 0xaa0   :  { %3981 = vmatprep.mubr.msk.bf16.mxu0 %vm4594_vm0, %v4593_v0  ;;  %3978 = vmatpush3.bf16.msra.mxu0 %v4209_v8 }
 0xaa1   :  { %3979 = vmatprep.subr.bf16.mxu0 %v4593_v0 }
 0xad6   :  { %v1190_v40 = vpop.f32.mrf.mxu0 }
 0xad8   :  { %v3931_v41 = vpop.f32.mrf.mxu0 }
 0xada   :  { %v1193_v42 = vpop.f32.mrf.mxu0 }
 0xadc   :  { %v3932_v43 = vpop.f32.mrf.mxu0 }
 0xb4f   :  { %v1302_v48 = vpop.f32.mrf.mxu0 }
 0xb50   :  { %1309 = vrot.lane.b32.xlu1 %v1302_v48, %s4580_s2 }
 0xb51   :  { %v3943_v49 = vpop.f32.mrf.mxu0 }
 0xb53   :  { %v1305_v51 = vpop.f32.mrf.mxu0 }
 0xb55   :  { %v3944_v52 = vpop.f32.mrf.mxu0 }
 0xb57   :  { %v1425_v54 = vpop.f32.mrf.mxu0 }
 0xb59   :  { %v3955_v55 = vpop.f32.mrf.mxu0 }
 0xb5a   :  { %v4214_v55 = vld [vmem:[%s5426_s14] sm:$0xff]  }
 0xb5b   :  { %v1428_v58 = vpop.f32.mrf.mxu0 }
 0xb5c   :  { %v3618_v58 = vld [vmem:[#allocation11] ss:$0 sm:$0xff] }
 0xb5d   :  { %v3956_v59 = vpop.f32.mrf.mxu0 }
 0xb5f   :  { %v1536_v60 = vpop.f32.mrf.mxu0 }
 0xb60   :  { %1543 = vrot.lane.b32.xlu0 %v1536_v60, %s4580_s2 }
 0xb61   :  { %v3967_v61 = vpop.f32.mrf.mxu0 }
 0xb63   :  { %v1539_v62 = vpop.f32.mrf.mxu0 }
 0xb65   :  { %v3968_v1 = vpop.f32.mrf.mxu0 }
 0xbc2   :  { %v1310_v2 = vpop.permute.xlu1 %1309 }
 0xbc3   :  { %v1312_v10 = vsel %vm373_vm3, %v1190_v40, %v1310_v2  ;;  %v1650_v40 = vrot.slane %v4963_v46, %v5074_v38 }
 0xbd2   :  { %v1544_v4 = vpop.permute.xlu0 %1543 }
 0xbd3   :  { %v1546_v5 = vsel %vm373_vm3, %v1425_v54, %v1544_v4  ;;  %v4213_v54 = vld [vmem:[%s5426_s14 + $0x8] sm:$0xff]  }
 0xbd4   :  { %v1548_v9 = vrot.slane %v1546_v5, 3 }
 0xbd6   :  { %v1550_v11 = vsel %vm297_vm2, %v1312_v10, %v1548_v9  ;;  %v3622_v10 = vld [vmem:[#allocation13] ss:$0 sm:$0xff] }
 0xbd7   :  { %v1556_v12 = vpack.c.bf16 %v1548_v9, %v1550_v11 }
 0xbd9   :  { %3974 = vmatmul.mubr.msk.bf16.vlgmr.msra.gmra.mxu1 %vm246_vm1, %v1556_v12 }
 0xbda   :  { %3993 = vmatprep.mubr.msk.bf16.mxu1 %vm4594_vm0, %v4593_v0  ;;  %3986 = vmatpush3.bf16.msra.mxu1 %v4211_v63 }
 0xbdb   :  { %3987 = vmatprep.subr.bf16.mxu1 %v4593_v0 }
 0xbde   :  { %3988 = vmatpush3.bf16.msra.mxu1 %v4212_v53 }
 0xbdf   :  { %3989 = vmatprep.subr.bf16.mxu1 %v4593_v0 }
 0xbe2   :  { %3990 = vmatpush3.bf16.msra.mxu1 %v4213_v54 }
 0xbe3   :  { %3991 = vmatprep.subr.bf16.mxu1 %v4593_v0 }
 0xbe6   :  { %3992 = vmatpush3.bf16.msra.mxu1 %v4214_v55 }
 0xbe7   :  { %4011 = vmatprep.subr.bf16.mxu1 %v4593_v0 }
 0xc99   :  { %v1612_v14 = vpop.f32.mrf.mxu1 }
 0xc9a   :  { %v1613_v15 = vadd.f32 %v3614_v13, %v1612_v14 }
 0xc9b   :  { %v3975_v16 = vpop.f32.mrf.mxu1 }
 0xc9c   :  { %v1619_v17 = vadd.f32 %v1613_v15, %v4974_v56 }
 0xc9d   :  { %v1615_v19 = vpop.f32.mrf.mxu1 }
 0xc9e   :  { %v1616_v20 = vadd.f32 %v3614_v13, %v1615_v19  ;;  %v1621_v21 = vsel %vm246_vm1, %v1619_v17, 0.0 }
 0xc9f   :  { %1622 = vadd.xlane.f32.xlu0 %v1621_v21  ;;  %v3976_v22 = vpop.f32.mrf.mxu1 }
 0xca0   :  { %v1620_v23 = vadd.f32 %v1616_v20, %v4976_v57  ;;  %v4210_v57 = vld [vmem:[#allocation10] sm:$0xff]  }
 0xca1   :  { %3980 = vmatpush3.bf16.msra.mxu0 %v4210_v57 }
 0xca2   :  { %v1624_v24 = vsel %vm914_vm8, %v1620_v23, 0.0  ;;  %3997 = vmatprep.subr.bf16.mxu0 %v4593_v0 }
 0xca3   :  { %1625 = vadd.xlane.f32.xlu1 %v1624_v24 }
 0xd28   :  { %v1623_v25 = vpop.xlane.xlu0 %1622 }
 0xd29   :  { %v1627_v28 = vmul.f32 0.03125, %v1623_v25 }
 0xd2b   :  { %v1629_v18 = vsub.f32 %v1619_v17, %v1627_v28 }
 0xd2c   :  { %v1626_v29 = vpop.xlane.xlu1 %1625 }
 0xd2d   :  { %v1628_v30 = vmul.f32 0.03125, %v1626_v29  ;;  %v1631_v7 = vmul.f32 %v1629_v18, %v1629_v18 }
 0xd2f   :  { %v1630_v31 = vsub.f32 %v1620_v23, %v1628_v30  ;;  %v1633_v56 = vsel %vm246_vm1, %v1631_v7, 0.0 }
 0xd30   :  { %1634 = vadd.xlane.f32.xlu0 %v1633_v56  ;;  %v4215_v56 = vld [vmem:[%s5456_s9 + $0x18] sm:$0xff]  }
 0xd31   :  { %v1632_v27 = vmul.f32 %v1630_v31, %v1630_v31 }
 0xd33   :  { %v1636_v32 = vsel %vm914_vm8, %v1632_v27, 0.0  ;;  %v4216_v27 = vld [vmem:[%s5456_s9 + $0x10] sm:$0xff]  }
 0xd34   :  { %1637 = vadd.xlane.f32.xlu0 %v1636_v32 }
 0xdb9   :  { %v1635_v33 = vpop.xlane.xlu0 %1634 }
 0xdba   :  { %v1639_v34 = vmul.f32 0.03125, %v1635_v33 }
 0xdbc   :  { %v1641_v6 = vadd.f32 1e-05, %v1639_v34 }
 0xdbd   :  { %v1638_v35 = vpop.xlane.xlu0 %1637 }
 0xdbe   :  { %4273 = vrsqrt.f32 %v1641_v6  ;;  %v1640_v36 = vmul.f32 0.03125, %v1638_v35  ;;  %v5111_v6 = vsub.s32 2, %v4955_v44 }
 0xdc0   :  { %v1642_v37 = vadd.f32 1e-05, %v1640_v36 }
 0xdc2   :  { %4275 = vrsqrt.f32 %v1642_v37  ;;  %v1845_v37 = vrot.slane %v4963_v46, %v5111_v6  ;;  %v3635_v46 = vld [vmem:[%s5457_s21 + $0x1] ss:$0 sm:$0xff] }
 0xdcb   :  { %v4274_v39 = vpop.eup %4273 }
 0xdcc   :  { %v1645_v3 = vmul.f32 %v4274_v39, %v1629_v18 }
 0xdce   :  { %v1651_v43 = vmul.f32 %v1650_v40, %v1645_v3 }
 0xdcf   :  { %v4276_v41 = vpop.eup %4275 }
 0xdd0   :  { %v1646_v42 = vmul.f32 %v4276_v41, %v1630_v31  ;;  %v1657_v49 = vadd.f32 %v1656_v47, %v1651_v43  ;;  %v1851_v41 = vrot.slane %v4970_v50, %v5111_v6 }
 0xdd2   :  { %v1652_v48 = vmul.f32 %v1650_v40, %v1646_v42 }
 0xdd4   :  { %v1658_v51 = vadd.f32 %v1656_v47, %v1652_v48 }
 0xdd6   :  { %v1664_v52 = vpack.c.bf16 %v1658_v51, %v1657_v49 }
 0xdd8   :  { %3982 = vmatmul.mubr.msk.bf16.vlgmr.msra.gmra.mxu0 %vm246_vm1, %v1664_v52 }
 0xdd9   :  { %4001 = vmatprep.mubr.msk.bf16.mxu0 %vm4594_vm0, %v4593_v0  ;;  %3998 = vmatpush3.bf16.msra.mxu0 %v4215_v56 }
 0xdda   :  { %3999 = vmatprep.subr.bf16.mxu0 %v4593_v0 }
 0xddd   :  { %4000 = vmatpush3.bf16.msra.mxu0 %v4216_v27 }
 0xdde   :  { %4005 = vmatprep.subr.bf16.mxu0 %v4593_v0 }
 0xe98   :  { %v1720_v59 = vpop.f32.mrf.mxu0 }
 0xe99   :  { %v1721_v61 = vadd.f32 %v3618_v58, %v1720_v59 }
 0xe9a   :  { %v3983_v60 = vpop.f32.mrf.mxu0 }
 0xe9b   :  { %v1727_v4 = vmax.f32 %v1721_v61, 0.0 }
 0xe9c   :  { %v1723_v62 = vpop.f32.mrf.mxu0 }
 0xe9d   :  { %v1724_v1 = vadd.f32 %v3618_v58, %v1723_v62 }
 0xe9e   :  { %v3984_v2 = vpop.f32.mrf.mxu0 }
 0xe9f   :  { %v1728_v5 = vmax.f32 %v1724_v1, 0.0 }
 0xea1   :  { %v1738_v9 = vpack.c.bf16 %v1728_v5, %v1727_v4 }
 0xea3   :  { %3994 = vmatmul.mubr.msk.bf16.vlgmr.msra.gmra.mxu1 %vm1769_vm12, %v1738_v9 }
 0xea4   :  { %4013 = vmatprep.mubr.msk.bf16.mxu1 %vm4594_vm0, %v4593_v0 }
 0xf63   :  { %v1807_v11 = vpop.f32.mrf.mxu1 }
 0xf64   :  { %v1808_v12 = vadd.f32 %v3622_v10, %v1807_v11 }
 0xf65   :  { %v3995_v13 = vpop.f32.mrf.mxu1 }
 0xf66   :  { %v1814_v14 = vadd.f32 %v1808_v12, %v1657_v49 }
 0xf67   :  { %v1810_v15 = vpop.f32.mrf.mxu1 }
 0xf68   :  { %v1811_v16 = vadd.f32 %v3622_v10, %v1810_v15  ;;  %v1816_v17 = vsel %vm246_vm1, %v1814_v14, 0.0 }
 0xf69   :  { %1817 = vadd.xlane.f32.xlu1 %v1816_v17  ;;  %v3996_v19 = vpop.f32.mrf.mxu1 }
 0xf6a   :  { %v1815_v20 = vadd.f32 %v1811_v16, %v1658_v51 }
 0xf6c   :  { %v1819_v21 = vsel %vm914_vm8, %v1815_v20, 0.0 }
 0xf6d   :  { %1820 = vadd.xlane.f32.xlu0 %v1819_v21 }
 0xff2   :  { %v1818_v22 = vpop.xlane.xlu1 %1817 }
 0xff3   :  { %v1822_v23 = vmul.f32 0.03125, %v1818_v22 }
 0xff5   :  { %v1824_v24 = vsub.f32 %v1814_v14, %v1822_v23 }
 0xff6   :  { %v1821_v25 = vpop.xlane.xlu0 %1820 }
 0xff7   :  { %v1823_v28 = vmul.f32 0.03125, %v1821_v25  ;;  %v1826_v18 = vmul.f32 %v1824_v24, %v1824_v24 }
 0xff9   :  { %v1825_v29 = vsub.f32 %v1815_v20, %v1823_v28  ;;  %v1828_v30 = vsel %vm246_vm1, %v1826_v18, 0.0 }
 0xffa   :  { %1829 = vadd.xlane.f32.xlu1 %v1828_v30 }
 0xffb   :  { %v1827_v7 = vmul.f32 %v1825_v29, %v1825_v29 }
 0xffd   :  { %v1831_v31 = vsel %vm914_vm8, %v1827_v7, 0.0 }
 0xffe   :  { %1832 = vadd.xlane.f32.xlu0 %v1831_v31 }
0x1083   :  { %v1830_v32 = vpop.xlane.xlu1 %1829 }
0x1084   :  { %v1834_v8 = vmul.f32 0.03125, %v1830_v32 }
0x1086   :  { %v1836_v57 = vadd.f32 1e-05, %v1834_v8 }
0x1087   :  { %v1833_v63 = vpop.xlane.xlu0 %1832 }
0x1088   :  { %4277 = vrsqrt.f32 %v1836_v57  ;;  %v1835_v33 = vmul.f32 0.03125, %v1833_v63 }
0x108a   :  { %v1837_v34 = vadd.f32 1e-05, %v1835_v33 }
0x108c   :  { %4279 = vrsqrt.f32 %v1837_v34 }
0x1095   :  { %v4278_v35 = vpop.eup %4277 }
0x1096   :  { %v1840_v36 = vmul.f32 %v4278_v35, %v1824_v24 }
0x1098   :  { %v1846_v40 = vmul.f32 %v1845_v37, %v1840_v36 }
0x1099   :  { %v4280_v39 = vpop.eup %4279 }
0x109a   :  { %v1841_v3 = vmul.f32 %v4280_v39, %v1825_v29  ;;  %v5117_v43 = vadd.f32 %v1851_v41, %v1846_v40 }
0x109c   :  { %v1847_v42 = vmul.f32 %v1845_v37, %v1841_v3 }
0x109e   :  { %v5119_v47 = vadd.f32 %v1851_v41, %v1847_v42 }
0x10a0   :  { %v1865_v44 = vpack.c.bf16 %v5119_v47, %v5117_v43 }
0x10a2   :  { %4002 = vmatmul.mubr.msk.bf16.vlgmr.msra.gmra.mxu0 %vm246_vm1, %v1865_v44 }
0x10a3   :  { %4007 = vmatprep.mubr.msk.bf16.mxu0 %vm4594_vm0, %v4593_v0 }
0x1162   :  { %v1921_v48 = vpop.f32.mrf.mxu0 }
0x1163   :  { %v1922_v49 = vadd.f32 %v3635_v46, %v1921_v48 }
0x1164   :  { %v4003_v50 = vpop.f32.mrf.mxu0 }
0x1165   :  { %v5129_v51 = vpack.c.bf16 %v1922_v49, %v1922_v49 }
0x1166   :  { %v1924_v52 = vpop.f32.mrf.mxu0 }
0x1167   :  { %v1925_v53 = vadd.f32 %v3635_v46, %v1924_v52  ;;  %2041 = vrot.lane.b32.xlu0 %v5129_v51, %s4597_s24  ;;  %1930 = vrot.lane.b32.xlu1 %v5129_v51, %s4596_s30 }
0x1168   :  { %v4004_v54 = vpop.f32.mrf.mxu0 }
0x1169   :  { %v2155_v55 = vpack.c.bf16 %v1925_v53, %v1922_v49 }
0x116b   :  { %v2157_v58 = vshrl.u32 %v2155_v55, 16  ;;  %v2160_v59 = vshll.u32 %v2155_v55, 16  ;;  %2039 = vrot.lane.b32.xlu1 %v5129_v51, %s4595_s28 }
0x116d   :  { %v2159_v60 = vrot.slane %v2157_v58, 2  ;;  %v2162_v61 = vrot.slane %v2160_v59, 3 }
0x116f   :  { %v5137_v62 = vor.u32 %v2162_v61, %v2159_v60 }
0x1171   :  { %2275 = vrot.lane.b32.xlu0 %v5137_v62, %s4597_s24  ;;  %2164 = vrot.lane.b32.xlu1 %v5137_v62, %s4596_s30 }
0x1175   :  { %2273 = vrot.lane.b32.xlu1 %v5137_v62, %s4595_s28 }
0x11d9   :  { %v1931_v1 = vpop.permute.xlu1 %1930  ;;  %v2042_v4 = vpop.permute.xlu0 %2041 }
0x11da   :  { %v1936_v2 = vsel %vm373_vm3, %v1931_v1, 0  ;;  %v2047_v5 = vsel %vm373_vm3, %v2042_v4, 0 }
0x11db   :  { %4006 = vmatpush3.bf16.xpose.msra.mxu0 %v1936_v2 }
0x11dc   :  { %4017 = vmatprep.subr.bf16.mxu0 %v4593_v0 }
0x11dd   :  { %v2040_v9 = vpop.permute.xlu1 %2039 }
0x11e2   :  { %4008 = vmatmul.mubr.msk.bf16.vlgmr.msra.gmra.mxu0 %vm373_vm3, %v5129_v51 }
0x11e3   :  { %4018 = vmatpush3.bf16.xpose.msra.mxu0 %v2047_v5  ;;  %4019 = vmatprep.mubr.msk.bf16.mxu0 %vm4594_vm0, %v4593_v0  ;;  %v2165_v10 = vpop.permute.xlu1 %2164  ;;  %v2276_v12 = vpop.permute.xlu0 %2275 }
0x11e4   :  { %4029 = vmatprep.subr.bf16.mxu0 %v4593_v0  ;;  %v2170_v11 = vsel %vm373_vm3, %v2165_v10, 0  ;;  %v2281_v13 = vsel %vm373_vm3, %v2276_v12, 0 }
0x11e7   :  { %v2274_v14 = vpop.permute.xlu1 %2273 }
0x11ea   :  { %4020 = vmatmul.mubr.msk.bf16.vlgmr.msra.gmra.mxu0 %vm373_vm3, %v2040_v9 }
0x11eb   :  { %4030 = vmatpush3.bf16.xpose.msra.mxu0 %v2170_v11  ;;  %4031 = vmatprep.mubr.msk.bf16.mxu0 %vm4594_vm0, %v4593_v0 }
0x11ec   :  { %4041 = vmatprep.subr.bf16.mxu0 %v4593_v0 }
0x11f2   :  { %4032 = vmatmul.mubr.msk.bf16.vlgmr.msra.gmra.mxu0 %vm373_vm3, %v5137_v62 }
0x11f3   :  { %4042 = vmatpush3.bf16.xpose.msra.mxu0 %v2281_v13  ;;  %4043 = vmatprep.mubr.msk.bf16.mxu0 %vm4594_vm0, %v4593_v0 }
0x11f4   :  { %4053 = vmatprep.subr.bf16.mxu0 %v4593_v0 }
0x11fa   :  { %4044 = vmatmul.mubr.msk.bf16.vlgmr.msra.gmra.mxu0 %vm373_vm3, %v2274_v14 }
0x11fb   :  { %4057 = vmatprep.mubr.msk.bf16.mxu0 %vm4594_vm0, %v4593_v0 }
0x12a2   :  { %v1972_v15 = vpop.f32.mrf.mxu0 }
0x12a3   :  { %v1978_v16 = vmul.f32 0.25, %v1972_v15 }
0x12a4   :  { %v4009_v17 = vpop.f32.mrf.mxu0 }
0x12a5   :  { %v1979_v19 = vsel %vm421_vm4, %v1978_v16, -inf }
0x12a6   :  { %1980 = vmax.xlane.f32.xlu0 %v1979_v19  ;;  %v1975_v20 = vpop.f32.mrf.mxu0 }
0x12a8   :  { %v4010_v21 = vpop.f32.mrf.mxu0 }
0x12aa   :  { %v2083_v22 = vpop.f32.mrf.mxu0 }
0x12ab   :  { %v2089_v23 = vmul.f32 0.25, %v2083_v22 }
0x12ac   :  { %v4021_v24 = vpop.f32.mrf.mxu0 }
0x12ad   :  { %v2090_v25 = vsel %vm421_vm4, %v2089_v23, -inf }
0x12ae   :  { %2091 = vmax.xlane.f32.xlu1 %v2090_v25  ;;  %v2086_v28 = vpop.f32.mrf.mxu0 }
0x12b0   :  { %v4022_v18 = vpop.f32.mrf.mxu0 }
0x12b2   :  { %v2206_v29 = vpop.f32.mrf.mxu0 }
0x12b3   :  { %v2212_v30 = vmul.f32 0.25, %v2206_v29 }
0x12b4   :  { %v4033_v7 = vpop.f32.mrf.mxu0 }
0x12b5   :  { %v2213_v31 = vsel %vm421_vm4, %v2212_v30, -inf }
0x12b6   :  { %2214 = vmax.xlane.f32.xlu0 %v2213_v31  ;;  %v2209_v56 = vpop.f32.mrf.mxu0 }
0x12b8   :  { %v4034_v27 = vpop.f32.mrf.mxu0 }
0x12ba   :  { %v2317_v32 = vpop.f32.mrf.mxu0 }
0x12bb   :  { %v2323_v8 = vmul.f32 0.25, %v2317_v32 }
0x12bc   :  { %v4045_v57 = vpop.f32.mrf.mxu0 }
0x12bd   :  { %v2324_v63 = vsel %vm421_vm4, %v2323_v8, -inf }
0x12be   :  { %2325 = vmax.xlane.f32.xlu0 %v2324_v63  ;;  %v2320_v33 = vpop.f32.mrf.mxu0 }
0x12c0   :  { %v4046_v34 = vpop.f32.mrf.mxu0 }
0x132f   :  { %v1981_v35 = vpop.xlane.xlu0 %1980 }
0x1330   :  { %v1982_v36 = vsub.f32 %v1978_v16, %v1981_v35 }
0x1332   :  { %v1983_v37 = vmul.f32 1.442695, %v1982_v36 }
0x1334   :  { %4281 = vpow2.f32 %v1983_v37 }
0x1337   :  { %v2092_v39 = vpop.xlane.xlu1 %2091 }
0x1338   :  { %v2093_v3 = vsub.f32 %v2089_v23, %v2092_v39 }
0x133a   :  { %v2094_v40 = vmul.f32 1.442695, %v2093_v3 }
0x133c   :  { %4283 = vpow2.f32 %v2094_v40 }
0x133f   :  { %v2215_v44 = vpop.xlane.xlu0 %2214 }
0x1340   :  { %v2216_v55 = vsub.f32 %v2212_v30, %v2215_v44 }
0x1341   :  { %v4282_v41 = vpop.eup %4281 }
0x1342   :  { %v1985_v42 = vsel %vm421_vm4, %v4282_v41, 0.0  ;;  %v2217_v58 = vmul.f32 1.442695, %v2216_v55 }
0x1343   :  { %1986 = vadd.xlane.f32.xlu1 %v1985_v42 }
0x1347   :  { %v2326_v46 = vpop.xlane.xlu0 %2325 }
0x1348   :  { %v2327_v48 = vsub.f32 %v2323_v8, %v2326_v46  ;;  %v4218_v8 = vld [vmem:[%s5458_s19 + $0x10] sm:$0xff]  }
0x1349   :  { %v4284_v49 = vpop.eup %4283 }
0x134a   :  { %v2328_v50 = vmul.f32 1.442695, %v2327_v48  ;;  %v2096_v52 = vsel %vm421_vm4, %v4284_v49, 0.0 }
0x134b   :  { %2097 = vadd.xlane.f32.xlu0 %v2096_v52 }
0x134c   :  { %4285 = vpow2.f32 %v2328_v50 }
0x134d   :  { %4287 = vpow2.f32 %v2217_v58 }
0x1354   :  { %1991 = vrot.lane.b32.xlu1 %v5129_v51, %s4585_s0 }
0x1359   :  { %v4286_v53 = vpop.eup %4285 }
0x135a   :  { %v2330_v54 = vsel %vm421_vm4, %v4286_v53, 0.0  ;;  %v4288_v59 = vpop.eup %4287 }
0x135b   :  { %2331 = vadd.xlane.f32.xlu0 %v2330_v54  ;;  %v2219_v60 = vsel %vm421_vm4, %v4288_v59, 0.0 }
0x1371   :  { %2102 = vrot.lane.b32.xlu0 %v5129_v51, %s4598_s3 }
0x1378   :  { %2220 = vadd.xlane.f32.xlu1 %v2219_v60 }
0x1389   :  { %2225 = vrot.lane.b32.xlu1 %v5137_v62, %s4585_s0 }
0x138d   :  { %2336 = vrot.lane.b32.xlu1 %v5137_v62, %s4598_s3 }
0x13cc   :  { %v1987_v61 = vpop.xlane.xlu1 %1986 }
0x13cd   :  { %4289 = vrcp.f32 %v1987_v61 }
0x13d0   :  { %v1992_v1 = vpop.permute.xlu1 %1991 }
0x13d1   :  { %v1997_v2 = vand.u32 %v1992_v1, %v4888_v26 }
0x13d3   :  { %4012 = vmatpush3.bf16.msra.mxu1 %v1997_v2 }
0x13d4   :  { %4023 = vmatprep.subr.bf16.mxu1 %v4593_v0  ;;  %v2098_v4 = vpop.xlane.xlu0 %2097 }
0x13d5   :  { %4291 = vrcp.f32 %v2098_v4 }
0x13da   :  { %v4290_v51 = vpop.eup %4289 }
0x13db   :  { %v1989_v5 = vmul.f32 %v4290_v51, %v4282_v41 }
0x13dd   :  { %v1990_v9 = vpack.c.bf16 %v1989_v5, %v1989_v5 }
0x13df   :  { %4014 = vmatmul.mubr.msk.bf16.vlgmr.msra.gmra.mxu1 %vm436_vm7, %v1990_v9 }
0x13e0   :  { %4025 = vmatprep.mubr.msk.bf16.mxu1 %vm4594_vm0, %v4593_v0 }
0x13e2   :  { %v4292_v62 = vpop.eup %4291 }
0x13e3   :  { %v2100_v12 = vmul.f32 %v4292_v62, %v4284_v49  ;;  %v3652_v49 = vld [vmem:[%s5459_s4 + $0x1] ss:$0 sm:$0xff] }
0x13e4   :  { %v2332_v10 = vpop.xlane.xlu0 %2331 }
0x13e5   :  { %v2101_v14 = vpack.c.bf16 %v2100_v12, %v2100_v12 }
0x13e8   :  { %v2103_v11 = vpop.permute.xlu0 %2102 }
0x13e9   :  { %v2108_v13 = vand.u32 %v2103_v11, %v4888_v26 }
0x13eb   :  { %4024 = vmatpush3.bf16.msra.mxu1 %v2108_v13  ;;  %v4220_v13 = vld [vmem:[%s5460_s5 + $0x10] sm:$0xff]  }
0x13ec   :  { %4035 = vmatprep.subr.bf16.mxu1 %v4593_v0 }
0x13ee   :  { %4026 = vmatmul.mubr.msk.bf16.vlgmr.msra.gmra.mxu1 %vm436_vm7, %v2101_v14  ;;  %v4323_v14 = vld [vmem:[%s5454_s7] sm:$0xff]  }
0x13ef   :  { %4037 = vmatprep.mubr.msk.bf16.mxu1 %vm4594_vm0, %v4593_v0 }
0x1401   :  { %v2221_v15 = vpop.xlane.xlu1 %2220 }
0x1402   :  { %4293 = vrcp.f32 %v2221_v15  ;;  %v4221_v15 = vld [vmem:[%s5461_s12 + $0x18] sm:$0xff]  }
0x1403   :  { %4295 = vrcp.f32 %v2332_v10 }
0x1405   :  { %v2226_v16 = vpop.permute.xlu1 %2225 }
0x1406   :  { %v2231_v17 = vand.u32 %v2226_v16, %v4888_v26  ;;  %v4222_v16 = vld [vmem:[%s5461_s12 + $0x10] sm:$0xff]  }
0x1408   :  { %4036 = vmatpush3.bf16.msra.mxu1 %v2231_v17 }
0x1409   :  { %4047 = vmatprep.subr.bf16.mxu1 %v4593_v0  ;;  %v2337_v20 = vpop.permute.xlu1 %2336 }
0x140a   :  { %v2342_v24 = vand.u32 %v2337_v20, %v4888_v26  ;;  %v4217_v26 = vld [vmem:[%s5458_s19 + $0x18] sm:$0xff]  }
0x140b   :  { %4054 = vmatpush3.bf16.msra.mxu0 %v4217_v26 }
0x140c   :  { %4055 = vmatprep.subr.bf16.mxu0 %v4593_v0 }
0x140f   :  { %v4294_v19 = vpop.eup %4293  ;;  %4056 = vmatpush3.bf16.msra.mxu0 %v4218_v8 }
0x1410   :  { %v2223_v21 = vmul.f32 %v4294_v19, %v4288_v59  ;;  %v4296_v23 = vpop.eup %4295  ;;  %4069 = vmatprep.subr.bf16.mxu0 %v4593_v0 }
0x1411   :  { %v2334_v25 = vmul.f32 %v4296_v23, %v4286_v53 }
0x1412   :  { %v2224_v22 = vpack.c.bf16 %v2223_v21, %v2223_v21 }
0x1413   :  { %v2335_v28 = vpack.c.bf16 %v2334_v25, %v2334_v25 }
0x1414   :  { %4038 = vmatmul.mubr.msk.bf16.vlgmr.msra.gmra.mxu1 %vm436_vm7, %v2224_v22 }
0x1415   :  { %4048 = vmatpush3.bf16.msra.mxu1 %v2342_v24  ;;  %4049 = vmatprep.mubr.msk.bf16.mxu1 %vm4594_vm0, %v4593_v0  ;;  %v5253_v24 = vld [vmem:[%s5428_s16 + $0x4] sm:$0x7] }
0x1416   :  { %4061 = vmatprep.subr.bf16.mxu1 %v4593_v0 }
0x141c   :  { %4050 = vmatmul.mubr.msk.bf16.vlgmr.msra.gmra.mxu1 %vm436_vm7, %v2335_v28 }
0x141d   :  { %4065 = vmatprep.mubr.msk.bf16.mxu1 %vm4594_vm0, %v4593_v0  ;;  %4062 = vmatpush3.bf16.msra.mxu1 %v4221_v15 }
0x141e   :  { %4063 = vmatprep.subr.bf16.mxu1 %v4593_v0 }
0x1421   :  { %4064 = vmatpush3.bf16.msra.mxu1 %v4222_v16 }
0x1422   :  { %4077 = vmatprep.subr.bf16.mxu1 %v4593_v0 }
0x149f   :  { %v2033_v18 = vpop.f32.mrf.mxu1 }
0x14a1   :  { %v4015_v29 = vpop.f32.mrf.mxu1 }
0x14a2   :  { %v5260_v29 = vld [vmem:[%s5429_s17 + $0x4] sm:$0x7] }
0x14a3   :  { %v2036_v30 = vpop.f32.mrf.mxu1 }
0x14a5   :  { %v4016_v7 = vpop.f32.mrf.mxu1 }
0x14ae   :  { %v2144_v31 = vpop.f32.mrf.mxu1 }
0x14af   :  { %2151 = vrot.lane.b32.xlu1 %v2144_v31, %s4580_s2  ;;  %v2500_v31 = vrot.slane %v5260_v29, %v4958_v45 }
0x14b0   :  { %v4027_v56 = vpop.f32.mrf.mxu1 }
0x14b2   :  { %v2147_v27 = vpop.f32.mrf.mxu1 }
0x14b4   :  { %v4028_v32 = vpop.f32.mrf.mxu1 }
0x14d4   :  { %v2267_v57 = vpop.f32.mrf.mxu1 }
0x14d6   :  { %v4039_v63 = vpop.f32.mrf.mxu1 }
0x14d8   :  { %v2270_v33 = vpop.f32.mrf.mxu1 }
0x14da   :  { %v4040_v34 = vpop.f32.mrf.mxu1 }
0x14dc   :  { %v2378_v35 = vpop.f32.mrf.mxu1 }
0x14dd   :  { %2385 = vrot.lane.b32.xlu0 %v2378_v35, %s4580_s2 }
0x14de   :  { %v4051_v36 = vpop.f32.mrf.mxu1 }
0x14e0   :  { %v2381_v37 = vpop.f32.mrf.mxu1 }
0x14e2   :  { %v4052_v39 = vpop.f32.mrf.mxu1 }
0x1521   :  { %v2152_v3 = vpop.permute.xlu1 %2151 }
0x1522   :  { %v2154_v44 = vsel %vm373_vm3, %v2033_v18, %v2152_v3  ;;  %v2494_v18 = vrot.slane %v5253_v24, %v4958_v45 }
0x154f   :  { %v2386_v40 = vpop.permute.xlu0 %2385 }
0x1550   :  { %v2388_v41 = vsel %vm373_vm3, %v2267_v57, %v2386_v40  ;;  %v3668_v57 = vld [vmem:[#allocation5 + $0x1] ss:$0 sm:$0xff]  ;;  %v3660_v40 = vld [vmem:[#allocation2 + $0x1] ss:$0 sm:$0xff] }
0x1551   :  { %v2390_v42 = vrot.slane %v2388_v41, 3 }
0x1553   :  { %v2392_v46 = vsel %vm297_vm2, %v2154_v44, %v2390_v42 }
0x1554   :  { %v2400_v48 = vpack.c.bf16 %v2390_v42, %v2392_v46 }
0x1556   :  { %4058 = vmatmul.mubr.msk.bf16.vlgmr.msra.gmra.mxu0 %vm246_vm1, %v2400_v48 }
0x1557   :  { %4073 = vmatprep.mubr.msk.bf16.mxu0 %vm4594_vm0, %v4593_v0 }
0x1616   :  { %v2456_v50 = vpop.f32.mrf.mxu0 }
0x1617   :  { %v2457_v52 = vadd.f32 %v3652_v49, %v2456_v50 }
0x1618   :  { %v4059_v53 = vpop.f32.mrf.mxu0 }
0x1619   :  { %v2463_v54 = vadd.f32 %v2457_v52, %v5117_v43 }
0x161a   :  { %v2459_v55 = vpop.f32.mrf.mxu0 }
0x161b   :  { %v2460_v58 = vadd.f32 %v3652_v49, %v2459_v55  ;;  %v2465_v59 = vsel %vm246_vm1, %v2463_v54, 0.0 }
0x161c   :  { %2466 = vadd.xlane.f32.xlu0 %v2465_v59  ;;  %v4060_v60 = vpop.f32.mrf.mxu0 }
0x161d   :  { %v2464_v61 = vadd.f32 %v2460_v58, %v5119_v47  ;;  %v4219_v47 = vld [vmem:[%s5460_s5 + $0x18] sm:$0xff]  }
0x161e   :  { %4070 = vmatpush3.bf16.msra.mxu0 %v4219_v47 }
0x161f   :  { %v2468_v1 = vsel %vm914_vm8, %v2464_v61, 0.0  ;;  %4071 = vmatprep.subr.bf16.mxu0 %v4593_v0 }
0x1620   :  { %2469 = vadd.xlane.f32.xlu1 %v2468_v1 }
0x1622   :  { %4072 = vmatpush3.bf16.msra.mxu0 %v4220_v13 }
0x1623   :  { %4083 = vmatprep.subr.bf16.mxu0 %v4593_v0 }
0x1625   :  { %4074 = vmatmul.mubr.msk.bf16.vlgmr.msra.gmra.mxu0 %vm246_vm1, %v4323_v14 }
0x1626   :  { %4085 = vmatprep.mubr.msk.bf16.mxu0 %vm4594_vm0, %v4593_v0 }
0x16a5   :  { %v2467_v2 = vpop.xlane.xlu0 %2466 }
0x16a6   :  { %v2471_v4 = vmul.f32 0.03125, %v2467_v2 }
0x16a8   :  { %v2473_v51 = vsub.f32 %v2463_v54, %v2471_v4 }
0x16a9   :  { %v2470_v5 = vpop.xlane.xlu1 %2469 }
0x16aa   :  { %v2472_v9 = vmul.f32 0.03125, %v2470_v5  ;;  %v2475_v10 = vmul.f32 %v2473_v51, %v2473_v51 }
0x16ac   :  { %v2474_v62 = vsub.f32 %v2464_v61, %v2472_v9  ;;  %v2477_v43 = vsel %vm246_vm1, %v2475_v10, 0.0 }
0x16ad   :  { %2478 = vadd.xlane.f32.xlu0 %v2477_v43 }
0x16ae   :  { %v2476_v11 = vmul.f32 %v2474_v62, %v2474_v62 }
0x16b0   :  { %v2480_v12 = vsel %vm914_vm8, %v2476_v11, 0.0 }
0x16b1   :  { %2481 = vadd.xlane.f32.xlu0 %v2480_v12 }
0x16e5   :  { %v2632_v63 = vpop.f32.mrf.mxu0 }
0x16e6   :  { %v2633_v33 = vadd.f32 %v3668_v57, %v2632_v63 }
0x16e7   :  { %v4075_v34 = vpop.f32.mrf.mxu0 }
0x16e8   :  { %v5273_v35 = vpack.c.bf16 %v2633_v33, %v2633_v33 }
0x16e9   :  { %v2635_v45 = vpop.f32.mrf.mxu0 }
0x16ea   :  { %v2636_v36 = vadd.f32 %v3668_v57, %v2635_v45  ;;  %2752 = vrot.lane.b32.xlu1 %v5273_v35, %s4595_s28  ;;  %v2645_v37 = vsel %vm373_vm3, %v5273_v35, 0 }
0x16eb   :  { %v4076_v39 = vpop.f32.mrf.mxu0 }
0x16ec   :  { %v5279_v3 = vpack.c.bf16 %v2636_v36, %v2636_v36 }
0x16ee   :  { %2986 = vrot.lane.b32.xlu1 %v5279_v3, %s4595_s28  ;;  %v2880_v2 = vsel %vm373_vm3, %v5279_v3, 0 }
0x1736   :  { %v2479_v17 = vpop.xlane.xlu0 %2478 }
0x1737   :  { %v2483_v19 = vmul.f32 0.03125, %v2479_v17 }
0x1739   :  { %v2485_v20 = vadd.f32 1e-05, %v2483_v19 }
0x173a   :  { %v2482_v21 = vpop.xlane.xlu0 %2481 }
0x173b   :  { %4297 = vrsqrt.f32 %v2485_v20  ;;  %v2484_v22 = vmul.f32 0.03125, %v2482_v21 }
0x173d   :  { %v2486_v23 = vadd.f32 1e-05, %v2484_v22 }
0x173f   :  { %4299 = vrsqrt.f32 %v2486_v23 }
0x1748   :  { %v4298_v25 = vpop.eup %4297 }
0x1749   :  { %v2489_v28 = vmul.f32 %v4298_v25, %v2473_v51 }
0x174b   :  { %v2495_v7 = vmul.f32 %v2494_v18, %v2489_v28 }
0x174c   :  { %v4300_v26 = vpop.eup %4299 }
0x174d   :  { %v2490_v30 = vmul.f32 %v4300_v26, %v2474_v62  ;;  %v5264_v27 = vadd.f32 %v2500_v31, %v2495_v7 }
0x174f   :  { %v2496_v56 = vmul.f32 %v2494_v18, %v2490_v30 }
0x1751   :  { %v5266_v32 = vadd.f32 %v2500_v31, %v2496_v56 }
0x1753   :  { %v2510_v8 = vpack.c.bf16 %v5266_v32, %v5264_v27 }
0x1755   :  { %4066 = vmatmul.mubr.msk.bf16.vlgmr.msra.gmra.mxu1 %vm246_vm1, %v2510_v8 }
0x1756   :  { %4079 = vmatprep.mubr.msk.bf16.mxu1 %vm4594_vm0, %v4593_v0  ;;  %4078 = vmatpush3.bf16.xpose.msra.mxu1 %v2645_v37 }
0x1757   :  { %4089 = vmatprep.subr.bf16.mxu1 %v4593_v0 }
0x175c   :  { %v2753_v46 = vpop.permute.xlu1 %2752 }
0x175d   :  { %v2758_v49 = vsel %vm373_vm3, %v2753_v46, 0 }
0x1760   :  { %v2987_v4 = vpop.permute.xlu1 %2986 }
0x1761   :  { %v2992_v51 = vsel %vm373_vm3, %v2987_v4, 0 }
0x1815   :  { %v2566_v41 = vpop.f32.mrf.mxu1 }
0x1816   :  { %v2567_v42 = vadd.f32 %v3660_v40, %v2566_v41 }
0x1817   :  { %v4067_v44 = vpop.f32.mrf.mxu1 }
0x1818   :  { %v2639_v48 = vpack.c.bf16 %v2567_v42, %v2567_v42 }
0x1819   :  { %v2569_v50 = vpop.f32.mrf.mxu1 }
0x181a   :  { %v2570_v52 = vadd.f32 %v3660_v40, %v2569_v50  ;;  %2750 = vrot.lane.b32.xlu0 %v2639_v48, %s4595_s28  ;;  %4080 = vmatmul.mubr.msk.bf16.vlgmr.msra.gmra.mxu1 %vm373_vm3, %v2639_v48 }
0x181b   :  { %v4068_v53 = vpop.f32.mrf.mxu1  ;;  %4090 = vmatpush3.bf16.xpose.msra.mxu1 %v2758_v49  ;;  %4091 = vmatprep.mubr.msk.bf16.mxu1 %vm4594_vm0, %v4593_v0 }
0x181c   :  { %v2866_v54 = vpack.c.bf16 %v2570_v52, %v2567_v42  ;;  %4101 = vmatprep.subr.bf16.mxu1 %v4593_v0 }
0x181e   :  { %v2869_v55 = vshrl.u32 %v2866_v54, 16  ;;  %v2872_v58 = vshll.u32 %v2866_v54, 16 }
0x1820   :  { %v2871_v59 = vrot.slane %v2869_v55, 2  ;;  %v2874_v60 = vrot.slane %v2872_v58, 3 }
0x1822   :  { %v2875_v61 = vor.u32 %v2874_v60, %v2871_v59 }
0x1824   :  { %2984 = vrot.lane.b32.xlu1 %v2875_v61, %s4595_s28 }
0x188c   :  { %v2751_v1 = vpop.permute.xlu0 %2750 }
0x188d   :  { %4092 = vmatmul.mubr.msk.bf16.vlgmr.msra.gmra.mxu1 %vm373_vm3, %v2751_v1 }
0x188e   :  { %4102 = vmatpush3.bf16.xpose.msra.mxu1 %v2880_v2  ;;  %4103 = vmatprep.mubr.msk.bf16.mxu1 %vm4594_vm0, %v4593_v0 }
0x188f   :  { %4113 = vmatprep.subr.bf16.mxu1 %v4593_v0 }
0x1895   :  { %4104 = vmatmul.mubr.msk.bf16.vlgmr.msra.gmra.mxu1 %vm373_vm3, %v2875_v61 }
0x1896   :  { %4114 = vmatpush3.bf16.xpose.msra.mxu1 %v2992_v51  ;;  %4115 = vmatprep.mubr.msk.bf16.mxu1 %vm4594_vm0, %v4593_v0  ;;  %v2985_v5 = vpop.permute.xlu1 %2984 }
0x1897   :  { %4125 = vmatprep.subr.bf16.mxu1 %v4593_v0 }
0x189d   :  { %4116 = vmatmul.mubr.msk.bf16.vlgmr.msra.gmra.mxu1 %vm373_vm3, %v2985_v5 }
0x189e   :  { %4129 = vmatprep.mubr.msk.bf16.mxu1 %vm4594_vm0, %v4593_v0 }
0x18da   :  { %v2681_v9 = vpop.f32.mrf.mxu1 }
0x18db   :  { %v2687_v10 = vmul.f32 0.25, %v2681_v9 }
0x18dc   :  { %v4081_v62 = vpop.f32.mrf.mxu1 }
0x18dd   :  { %v2688_v43 = vsel %vm1132_vm9, %v2687_v10, -inf }
0x18de   :  { %2689 = vmax.xlane.f32.xlu0 %v2688_v43  ;;  %v2684_v11 = vpop.f32.mrf.mxu1 }
0x18e0   :  { %v4082_v12 = vpop.f32.mrf.mxu1 }
0x194d   :  { %v2794_v47 = vpop.f32.mrf.mxu1 }
0x194e   :  { %v2800_v13 = vmul.f32 0.25, %v2794_v47 }
0x194f   :  { %v4093_v14 = vpop.f32.mrf.mxu1 }
0x1950   :  { %v2801_v15 = vsel %vm1132_vm9, %v2800_v13, -inf }
0x1951   :  { %2802 = vmax.xlane.f32.xlu1 %v2801_v15  ;;  %v2797_v16 = vpop.f32.mrf.mxu1 }
0x1953   :  { %v4094_v17 = vpop.f32.mrf.mxu1 }
0x1955   :  { %v2916_v19 = vpop.f32.mrf.mxu1 }
0x1956   :  { %v2922_v20 = vmul.f32 0.25, %v2916_v19 }
0x1957   :  { %v4105_v21 = vpop.f32.mrf.mxu1 }
0x1958   :  { %v2923_v22 = vsel %vm1132_vm9, %v2922_v20, -inf }
0x1959   :  { %2924 = vmax.xlane.f32.xlu0 %v2923_v22  ;;  %v2919_v23 = vpop.f32.mrf.mxu1  ;;  %v4223_v22 = vld [vmem:[#allocation7 + $0x18] sm:$0xff]  }
0x195a   :  { %4126 = vmatpush3.bf16.msra.mxu1 %v4223_v22 }
0x195b   :  { %v4106_v25 = vpop.f32.mrf.mxu1  ;;  %4127 = vmatprep.subr.bf16.mxu1 %v4593_v0 }
0x195d   :  { %v3028_v28 = vpop.f32.mrf.mxu1 }
0x195e   :  { %v3034_v18 = vmul.f32 0.25, %v3028_v28 }
0x195f   :  { %v4117_v26 = vpop.f32.mrf.mxu1 }
0x1960   :  { %v3035_v30 = vsel %vm1132_vm9, %v3034_v18, -inf  ;;  %v4224_v26 = vld [vmem:[#allocation7 + $0x10] sm:$0xff]  }
0x1961   :  { %3036 = vmax.xlane.f32.xlu0 %v3035_v30  ;;  %v3031_v7 = vpop.f32.mrf.mxu1  ;;  %4128 = vmatpush3.bf16.msra.mxu1 %v4224_v26  ;;  %v3684_v26 = vld [vmem:[#allocation11 + $0x1] ss:$0 sm:$0xff] }
0x1962   :  { %4141 = vmatprep.subr.bf16.mxu1 %v4593_v0 }
0x1963   :  { %v4118_v31 = vpop.f32.mrf.mxu1 }
0x1967   :  { %v2690_v56 = vpop.xlane.xlu0 %2689 }
0x1968   :  { %v2691_v8 = vsub.f32 %v2687_v10, %v2690_v56 }
0x196a   :  { %v2692_v57 = vmul.f32 1.442695, %v2691_v8 }
0x196c   :  { %4301 = vpow2.f32 %v2692_v57 }
0x1979   :  { %v4302_v63 = vpop.eup %4301 }
0x197a   :  { %v2694_v33 = vsel %vm1132_vm9, %v4302_v63, 0.0 }
0x197b   :  { %2695 = vadd.xlane.f32.xlu1 %v2694_v33 }
0x198c   :  { %2701 = vrot.lane.b32.xlu1 %v5273_v35, %s4596_s30 }
0x19da   :  { %v2803_v34 = vpop.xlane.xlu1 %2802 }
0x19db   :  { %v2804_v45 = vsub.f32 %v2800_v13, %v2803_v34 }
0x19dd   :  { %v2805_v36 = vmul.f32 1.442695, %v2804_v45 }
0x19df   :  { %4303 = vpow2.f32 %v2805_v36 }
0x19e2   :  { %v2925_v37 = vpop.xlane.xlu0 %2924 }
0x19e3   :  { %v2926_v39 = vsub.f32 %v2922_v20, %v2925_v37 }
0x19e5   :  { %v2927_v40 = vmul.f32 1.442695, %v2926_v39 }
0x19e7   :  { %4305 = vpow2.f32 %v2927_v40 }
0x19ea   :  { %v3037_v41 = vpop.xlane.xlu0 %3036 }
0x19eb   :  { %v3038_v42 = vsub.f32 %v3034_v18, %v3037_v41 }
0x19ec   :  { %v4304_v44 = vpop.eup %4303 }
0x19ed   :  { %v3039_v46 = vmul.f32 1.442695, %v3038_v42  ;;  %v2807_v48 = vsel %vm1132_vm9, %v4304_v44, 0.0  ;;  %v3680_v42 = vld [vmem:[#allocation8 + $0x1] ss:$0 sm:$0xff] }
0x19ee   :  { %2808 = vadd.xlane.f32.xlu0 %v2807_v48 }
0x19ef   :  { %4307 = vpow2.f32 %v3039_v46 }
0x19f4   :  { %v4306_v49 = vpop.eup %4305 }
0x19f5   :  { %v2929_v50 = vsel %vm1132_vm9, %v4306_v49, 0.0 }
0x19f6   :  { %2930 = vadd.xlane.f32.xlu1 %v2929_v50 }
0x19fc   :  { %v4308_v52 = vpop.eup %4307 }
0x19fd   :  { %v3041_v53 = vsel %vm1132_vm9, %v4308_v52, 0.0 }
0x19fe   :  { %3042 = vadd.xlane.f32.xlu0 %v3041_v53 }
0x1a04   :  { %v2696_v54 = vpop.xlane.xlu1 %2695 }
0x1a05   :  { %4309 = vrcp.f32 %v2696_v54 }
0x1a07   :  { %2936 = vrot.lane.b32.xlu1 %v5279_v3, %s4596_s30 }
0x1a08   :  { %v2702_v55 = vpop.permute.xlu1 %2701 }
0x1a09   :  { %v2707_v58 = vsel %vm1152_vm10, %v2702_v55, 0 }
0x1a0a   :  { %4084 = vmatpush3.bf16.msra.mxu0 %v2707_v58 }
0x1a0b   :  { %3047 = vrot.lane.b32.xlu1 %v5279_v3, %s4597_s24  ;;  %4095 = vmatprep.subr.bf16.mxu0 %v4593_v0 }
0x1a12   :  { %v4310_v59 = vpop.eup %4309 }
0x1a13   :  { %v2698_v60 = vmul.f32 %v4310_v59, %v4302_v63 }
0x1a14   :  { %2813 = vrot.lane.b32.xlu0 %v5273_v35, %s4597_s24 }
0x1a15   :  { %v2699_v61 = vpack.c.bf16 %v2698_v60, %v2698_v60 }
0x1a17   :  { %4086 = vmatmul.mubr.msk.bf16.vlgmr.msra.gmra.mxu0 %vm1148_vm11, %v2699_v61 }
0x1a18   :  { %4097 = vmatprep.mubr.msk.bf16.mxu0 %vm4594_vm0, %v4593_v0 }
0x1a77   :  { %v2809_v1 = vpop.xlane.xlu0 %2808 }
0x1a78   :  { %4311 = vrcp.f32 %v2809_v1 }
0x1a7f   :  { %v2931_v2 = vpop.xlane.xlu1 %2930 }
0x1a80   :  { %4313 = vrcp.f32 %v2931_v2 }
0x1a83   :  { %v2937_v10 = vpop.permute.xlu1 %2936 }
0x1a84   :  { %v2942_v43 = vsel %vm1152_vm10, %v2937_v10, 0  ;;  %v4227_v10 = vld [vmem:[%s5426_s14 + $0x38] sm:$0xff]  }
0x1a85   :  { %v4312_v4 = vpop.eup %4311 }
0x1a86   :  { %v2811_v3 = vmul.f32 %v4312_v4, %v4304_v44 }
0x1a87   :  { %v3043_v51 = vpop.xlane.xlu0 %3042  ;;  %v3048_v12 = vpop.permute.xlu1 %3047 }
0x1a88   :  { %4315 = vrcp.f32 %v3043_v51  ;;  %v2812_v35 = vpack.c.bf16 %v2811_v3, %v2811_v3  ;;  %v3053_v14 = vsel %vm1152_vm10, %v3048_v12, 0 }
0x1a8b   :  { %v2814_v5 = vpop.permute.xlu0 %2813 }
0x1a8c   :  { %v2819_v9 = vsel %vm1152_vm10, %v2814_v5, 0 }
0x1a8d   :  { %4096 = vmatpush3.bf16.msra.mxu0 %v2819_v9  ;;  %v4314_v62 = vpop.eup %4313  ;;  %v4225_v9 = vld [vmem:[#allocation10 + $0x18] sm:$0xff]  }
0x1a8e   :  { %4107 = vmatprep.subr.bf16.mxu0 %v4593_v0  ;;  %v2933_v11 = vmul.f32 %v4314_v62, %v4306_v49 }
0x1a90   :  { %4098 = vmatmul.mubr.msk.bf16.vlgmr.msra.gmra.mxu0 %vm1148_vm11, %v2812_v35  ;;  %v2934_v47 = vpack.c.bf16 %v2933_v11, %v2933_v11 }
0x1a91   :  { %4108 = vmatpush3.bf16.msra.mxu0 %v2942_v43  ;;  %4109 = vmatprep.mubr.msk.bf16.mxu0 %vm4594_vm0, %v4593_v0 }
0x1a92   :  { %4119 = vmatprep.subr.bf16.mxu0 %v4593_v0 }
0x1a95   :  { %v4316_v13 = vpop.eup %4315 }
0x1a96   :  { %v3045_v15 = vmul.f32 %v4316_v13, %v4308_v52 }
0x1a98   :  { %4110 = vmatmul.mubr.msk.bf16.vlgmr.msra.gmra.mxu0 %vm1148_vm11, %v2934_v47  ;;  %v3046_v16 = vpack.c.bf16 %v3045_v15, %v3045_v15  ;;  %v3205_v15 = vrot.slane %v5253_v24, %v5074_v38 }
0x1a99   :  { %4120 = vmatpush3.bf16.msra.mxu0 %v3053_v14  ;;  %4121 = vmatprep.mubr.msk.bf16.mxu0 %vm4594_vm0, %v4593_v0 }
0x1a9a   :  { %4133 = vmatprep.subr.bf16.mxu0 %v4593_v0 }
0x1aa0   :  { %4122 = vmatmul.mubr.msk.bf16.vlgmr.msra.gmra.mxu0 %vm1148_vm11, %v3046_v16 }
0x1aa1   :  { %4137 = vmatprep.mubr.msk.bf16.mxu0 %vm4594_vm0, %v4593_v0  ;;  %4134 = vmatpush3.bf16.msra.mxu0 %v4225_v9 }
0x1aa2   :  { %4135 = vmatprep.subr.bf16.mxu0 %v4593_v0 }
0x1ad7   :  { %v2743_v17 = vpop.f32.mrf.mxu0 }
0x1ad9   :  { %v4087_v19 = vpop.f32.mrf.mxu0 }
0x1adb   :  { %v2746_v20 = vpop.f32.mrf.mxu0 }
0x1adc   :  { %v3211_v20 = vrot.slane %v5260_v29, %v5074_v38  ;;  %v4229_v38 = vld [vmem:[%s5426_s14 + $0x28] sm:$0xff]  }
0x1add   :  { %v4088_v21 = vpop.f32.mrf.mxu0 }
0x1b50   :  { %v2855_v23 = vpop.f32.mrf.mxu0 }
0x1b51   :  { %2862 = vrot.lane.b32.xlu1 %v2855_v23, %s4580_s2 }
0x1b52   :  { %v4099_v25 = vpop.f32.mrf.mxu0 }
0x1b54   :  { %v2858_v28 = vpop.f32.mrf.mxu0 }
0x1b55   :  { %v4228_v28 = vld [vmem:[%s5426_s14 + $0x30] sm:$0xff]  }
0x1b56   :  { %v4100_v18 = vpop.f32.mrf.mxu0 }
0x1b57   :  { %v4230_v18 = vld [vmem:[%s5426_s14 + $0x20] sm:$0xff]  }
0x1b58   :  { %v2978_v30 = vpop.f32.mrf.mxu0 }
0x1b5a   :  { %v4111_v7 = vpop.f32.mrf.mxu0 }
0x1b5c   :  { %v2981_v31 = vpop.f32.mrf.mxu0 }
0x1b5e   :  { %v4112_v56 = vpop.f32.mrf.mxu0 }
0x1b60   :  { %v3089_v8 = vpop.f32.mrf.mxu0 }
0x1b61   :  { %3096 = vrot.lane.b32.xlu0 %v3089_v8, %s4580_s2 }
0x1b62   :  { %v4123_v57 = vpop.f32.mrf.mxu0 }
0x1b64   :  { %v3092_v63 = vpop.f32.mrf.mxu0 }
0x1b66   :  { %v4124_v33 = vpop.f32.mrf.mxu0 }
0x1bc3   :  { %v2863_v34 = vpop.permute.xlu1 %2862 }
0x1bc4   :  { %v2865_v39 = vsel %vm373_vm3, %v2743_v17, %v2863_v34 }
0x1bd3   :  { %v3097_v45 = vpop.permute.xlu0 %3096 }
0x1bd4   :  { %v3099_v36 = vsel %vm373_vm3, %v2978_v30, %v3097_v45  ;;  %v3696_v45 = vld [vmem:[#allocation13 + $0x1] ss:$0 sm:$0xff] }
0x1bd5   :  { %v3101_v37 = vrot.slane %v3099_v36, 3 }
0x1bd7   :  { %v3103_v40 = vsel %vm297_vm2, %v2865_v39, %v3101_v37 }
0x1bd8   :  { %v3111_v41 = vpack.c.bf16 %v3101_v37, %v3103_v40 }
0x1bda   :  { %4130 = vmatmul.mubr.msk.bf16.vlgmr.msra.gmra.mxu1 %vm246_vm1, %v3111_v41 }
0x1bdb   :  { %4149 = vmatprep.mubr.msk.bf16.mxu1 %vm4594_vm0, %v4593_v0  ;;  %4142 = vmatpush3.bf16.msra.mxu1 %v4227_v10 }
0x1bdc   :  { %4143 = vmatprep.subr.bf16.mxu1 %v4593_v0 }
0x1bdf   :  { %4144 = vmatpush3.bf16.msra.mxu1 %v4228_v28 }
0x1be0   :  { %4145 = vmatprep.subr.bf16.mxu1 %v4593_v0 }
0x1be3   :  { %4146 = vmatpush3.bf16.msra.mxu1 %v4229_v38 }
0x1be4   :  { %4147 = vmatprep.subr.bf16.mxu1 %v4593_v0 }
0x1be7   :  { %4148 = vmatpush3.bf16.msra.mxu1 %v4230_v18 }
0x1c9a   :  { %v3167_v44 = vpop.f32.mrf.mxu1 }
0x1c9b   :  { %v3168_v46 = vadd.f32 %v3680_v42, %v3167_v44 }
0x1c9c   :  { %v4131_v48 = vpop.f32.mrf.mxu1 }
0x1c9d   :  { %v3174_v49 = vadd.f32 %v3168_v46, %v5264_v27 }
0x1c9e   :  { %v3170_v50 = vpop.f32.mrf.mxu1 }
0x1c9f   :  { %v3171_v52 = vadd.f32 %v3680_v42, %v3170_v50  ;;  %v3176_v53 = vsel %vm246_vm1, %v3174_v49, 0.0 }
0x1ca0   :  { %3177 = vadd.xlane.f32.xlu0 %v3176_v53  ;;  %v4132_v54 = vpop.f32.mrf.mxu1  ;;  %v4231_v53 = vld [vmem:[#allocation14 + $0x8] sm:$0xff]  }
0x1ca1   :  { %v3175_v55 = vadd.f32 %v3171_v52, %v5266_v32  ;;  %v4226_v32 = vld [vmem:[#allocation10 + $0x10] sm:$0xff]   ;;  %v4232_v54 = vld [vmem:[#allocation14] sm:$0xff]  }
0x1ca2   :  { %4136 = vmatpush3.bf16.msra.mxu0 %v4226_v32  ;;  %v3702_v32 = vld [vmem:[#allocation16] ss:$0 sm:$0xff] }
0x1ca3   :  { %v3179_v58 = vsel %vm914_vm8, %v3175_v55, 0.0  ;;  %4153 = vmatprep.subr.bf16.mxu0 %v4593_v0 }
0x1ca4   :  { %3180 = vadd.xlane.f32.xlu1 %v3179_v58 }
0x1d29   :  { %v3178_v59 = vpop.xlane.xlu0 %3177 }
0x1d2a   :  { %v3182_v60 = vmul.f32 0.03125, %v3178_v59 }
0x1d2c   :  { %v3184_v61 = vsub.f32 %v3174_v49, %v3182_v60  ;;  %v3388_v60 = vrot.slane %v5253_v24, %v5111_v6  ;;  %v4234_v24 = vld [vmem:[%s5432_s20 + $0x10] sm:$0xff]  }
0x1d2d   :  { %v3181_v1 = vpop.xlane.xlu1 %3180 }
0x1d2e   :  { %v3183_v2 = vmul.f32 0.03125, %v3181_v1  ;;  %v3186_v4 = vmul.f32 %v3184_v61, %v3184_v61 }
0x1d30   :  { %v3185_v51 = vsub.f32 %v3175_v55, %v3183_v2  ;;  %v3188_v27 = vsel %vm246_vm1, %v3186_v4, 0.0  ;;  %v3393_v2 = vrot.slane %v5260_v29, %v5111_v6  ;;  %v4235_v6 = vld [vmem:[%s5432_s20 + $0x8] sm:$0xff]   ;;  %v4236_v29 = vld [vmem:[%s5432_s20] sm:$0xff]  }
0x1d31   :  { %3189 = vadd.xlane.f32.xlu0 %v3188_v27 }
0x1d32   :  { %v3187_v3 = vmul.f32 %v3185_v51, %v3185_v51 }
0x1d34   :  { %v3191_v5 = vsel %vm914_vm8, %v3187_v3, 0.0 }
0x1d35   :  { %3192 = vadd.xlane.f32.xlu0 %v3191_v5  ;;  %v4233_v5 = vld [vmem:[%s5432_s20 + $0x18] sm:$0xff]   ;;  %s4544_s20 = scalar_lea.vmem %s3561_s26, 32 }
0x1d36   :  { %p4545_p13 = scmp.ne.s32.totalorder %s3561_s26, %s4544_s20  ;;  %p4550_p1 = scmp.lt.s32.totalorder %s4544_s20, %s4544_s20 }
0x1d38   :  { %p4551_p2 = por %p4550_p1, %p4549_p0 }
0x1d3a   :  { %p4552_p3 = pnand %p4551_p2, %p4545_p13 }
0x1dba   :  { %v3190_v35 = vpop.xlane.xlu0 %3189 }
0x1dbb   :  { %v3194_v62 = vmul.f32 0.03125, %v3190_v35 }
0x1dbd   :  { %v3196_v43 = vadd.f32 1e-05, %v3194_v62 }
0x1dbe   :  { %v3193_v11 = vpop.xlane.xlu0 %3192 }
0x1dbf   :  { %4317 = vrsqrt.f32 %v3196_v43  ;;  %v3195_v12 = vmul.f32 0.03125, %v3193_v11 }
0x1dc1   :  { %v3197_v47 = vadd.f32 1e-05, %v3195_v12 }
0x1dc3   :  { %4319 = vrsqrt.f32 %v3197_v47 }
0x1dcc   :  { %v4318_v13 = vpop.eup %4317 }
0x1dcd   :  { %v3200_v14 = vmul.f32 %v4318_v13, %v3184_v61 }
0x1dcf   :  { %v3206_v19 = vmul.f32 %v3205_v15, %v3200_v14  ;;  %v3706_v14 = vld [vmem:[#allocation17] ss:$0 sm:$0xff] }
0x1dd0   :  { %v4320_v16 = vpop.eup %4319 }
0x1dd1   :  { %v3201_v17 = vmul.f32 %v4320_v16, %v3185_v51  ;;  %v3212_v22 = vadd.f32 %v3211_v20, %v3206_v19 }
0x1dd3   :  { %v3207_v21 = vmul.f32 %v3205_v15, %v3201_v17 }
0x1dd5   :  { %v3213_v23 = vadd.f32 %v3211_v20, %v3207_v21 }
0x1dd7   :  { %v3221_v25 = vpack.c.bf16 %v3213_v23, %v3212_v22 }
0x1dd9   :  { %4138 = vmatmul.mubr.msk.bf16.vlgmr.msra.gmra.mxu0 %vm246_vm1, %v3221_v25 }
0x1dda   :  { %4157 = vmatprep.mubr.msk.bf16.mxu0 %vm4594_vm0, %v4593_v0  ;;  %4154 = vmatpush3.bf16.msra.mxu0 %v4231_v53 }
0x1ddb   :  { %4155 = vmatprep.subr.bf16.mxu0 %v4593_v0 }
0x1dde   :  { %4156 = vmatpush3.bf16.msra.mxu0 %v4232_v54 }
0x1ddf   :  { %4161 = vmatprep.subr.bf16.mxu0 %v4593_v0 }
0x1e99   :  { %v3277_v30 = vpop.f32.mrf.mxu0 }
0x1e9a   :  { %v3278_v31 = vadd.f32 %v3684_v26, %v3277_v30 }
0x1e9b   :  { %v4139_v7 = vpop.f32.mrf.mxu0 }
0x1e9c   :  { %v3284_v63 = vmax.f32 %v3278_v31, 0.0 }
0x1e9d   :  { %v3280_v56 = vpop.f32.mrf.mxu0 }
0x1e9e   :  { %v3281_v8 = vadd.f32 %v3684_v26, %v3280_v56 }
0x1e9f   :  { %v4140_v57 = vpop.f32.mrf.mxu0 }
0x1ea0   :  { %v3285_v33 = vmax.f32 %v3281_v8, 0.0 }
0x1ea2   :  { %v3297_v34 = vpack.c.bf16 %v3285_v33, %v3284_v63 }
0x1ea4   :  { %4150 = vmatmul.mubr.msk.bf16.vlgmr.msra.gmra.mxu1 %vm1769_vm12, %v3297_v34 }
0x1f64   :  { %v3365_v36 = vpop.f32.mrf.mxu1 }
0x1f65   :  { %v3366_v37 = vadd.f32 %v3696_v45, %v3365_v36 }
0x1f66   :  { %v4151_v39 = vpop.f32.mrf.mxu1 }
0x1f67   :  { %v3371_v40 = vadd.f32 %v3366_v37, %v3212_v22 }
0x1f68   :  { %v3368_v41 = vpop.f32.mrf.mxu1 }
0x1f69   :  { %v3372_v42 = vsel %vm246_vm1, %v3371_v40, 0.0 }
0x1f6a   :  { %3373 = vadd.xlane.f32.xlu1 %v3372_v42  ;;  %v4152_v44 = vpop.f32.mrf.mxu1 }
0x1ff3   :  { %v3374_v46 = vpop.xlane.xlu1 %3373 }
0x1ff4   :  { %v3375_v48 = vmul.f32 0.03125, %v3374_v46 }
0x1ff6   :  { %v3376_v49 = vsub.f32 %v3371_v40, %v3375_v48 }
0x1ff8   :  { %v3377_v50 = vmul.f32 %v3376_v49, %v3376_v49 }
0x1ffa   :  { %v3378_v52 = vsel %vm246_vm1, %v3377_v50, 0.0 }
0x1ffb   :  { %3379 = vadd.xlane.f32.xlu0 %v3378_v52 }
0x2084   :  { %v3380_v55 = vpop.xlane.xlu0 %3379 }
0x2085   :  { %v3381_v58 = vmul.f32 0.03125, %v3380_v55 }
0x2087   :  { %v3382_v59 = vadd.f32 1e-05, %v3381_v58 }
0x2089   :  { %4321 = vrsqrt.f32 %v3382_v59 }
0x2096   :  { %v4322_v61 = vpop.eup %4321 }
0x2097   :  { %v3384_v1 = vmul.f32 %v4322_v61, %v3376_v49 }
0x2099   :  { %v3389_v4 = vmul.f32 %v3388_v60, %v3384_v1 }
0x209b   :  { %v3394_v51 = vadd.f32 %v3393_v2, %v3389_v4 }
0x209d   :  { %v3396_v27 = vrot.slane %v3394_v51, 4 }
0x209f   :  { %v3399_v3 = vsel %vm3398_vm13, %v3394_v51, %v3396_v27 }
0x20a0   :  { %v3405_v9 = vpack.c.bf16 %v3399_v3, %v3399_v3 }
0x20a2   :  { %4158 = vmatmul.mubr.msk.bf16.vlgmr.msra.gmra.mxu0 %vm246_vm1, %v3405_v9 }
0x20a3   :  { %4162 = vmatpush3.bf16.msra.mxu0 %v4233_v5  ;;  %4169 = vmatprep.mubr.msk.bf16.mxu0 %vm4594_vm0, %v4593_v0 }
0x20a4   :  { %4163 = vmatprep.subr.bf16.mxu0 %v4593_v0 }
0x20a7   :  { %4164 = vmatpush3.bf16.msra.mxu0 %v4234_v24 }
0x20a8   :  { %4165 = vmatprep.subr.bf16.mxu0 %v4593_v0 }
0x20ab   :  { %4166 = vmatpush3.bf16.msra.mxu0 %v4235_v6 }
0x20ac   :  { %4167 = vmatprep.subr.bf16.mxu0 %v4593_v0 }
0x20af   :  { %4168 = vmatpush3.bf16.msra.mxu0 %v4236_v29 }
0x2162   :  { %v3461_v10 = vpop.f32.mrf.mxu0 }
0x2163   :  { %v3462_v35 = vadd.f32 %v3702_v32, %v3461_v10 }
0x2164   :  { %v4159_v62 = vpop.f32.mrf.mxu0 }
0x2165   :  { %vm3467_vm14 = vcmp.gt.f32.partialorder %v3462_v35, 0.0  ;;  %v3468_v43 = vmul.f32 0.01, %v3462_v35 }
0x2166   :  { %v3464_v11 = vpop.f32.mrf.mxu0 }
0x2167   :  { %v3469_v12 = vsel %vm3467_vm14, %v3462_v35, %v3468_v43 }
0x2168   :  { %v3479_v47 = vpack.c.bf16 %v3469_v12, %v3469_v12  ;;  %v4160_v13 = vpop.f32.mrf.mxu0 }
0x216a   :  { %4170 = vmatmul.mubr.msk.bf16.vlgmr.msra.gmra.mxu0 %vm1769_vm12, %v3479_v47 }
0x222a   :  { %v3547_v0 = vpop.f32.mrf.mxu0 }
0x222b   :  { %v3548_v15 = vadd.f32 %v3706_v14, %v3547_v0 }
0x222c   :  { %v4171_v16 = vpop.f32.mrf.mxu0 }
0x222d   :  { %3553 = vst [vmem:[#allocation20] sm:$0x3] %v3548_v15 }
0x222e   :  { %v3550_v17 = vpop.f32.mrf.mxu0 }
0x222f   :  { %4555 = shalt.err (!%p4552_p3)
}
0x2230   :  { %3563 = dma.vmem_to_hbm [thread:$0]  %s3561_s26, 32, %s5435_s23, [#allocation4]   ;;  %v4172_v19 = vpop.f32.mrf.mxu0 }
0x2231   :  { %4576 = dma.done.wait [#allocation4], 32  }
0x2232   :  { %4577 = vsyncadd [#allocation4], 4294967264 }
0x2233   :  { %3571 = vsyncpa [#allocation3], 1 }
0x2234   :  { %3572 = vsyncpa [#allocation6], 1 }
0x2235   :  { %3573 = vsyncpa [#allocation9], 1 }
0x2236   :  { %3574 = vsyncpa [#allocation12], 1 }
0x2237   :  { %3575 = vsyncpa [#allocation15], 1 }
0x2238   :  { %3576 = vsyncpa [#allocation18], 1 }
0x2239   :  { %3577 = vsyncpa [#allocation4], 1 }

</bundles_post_ra>
